<compile_context>
chip_gen: v7x
topology: tpu7x:2x2x1
jax: 0.10.0
libtpu: 0.0.40
codegen_flags: <defaults>
</compile_context>

<pallas_src>
import functools

import numpy as np
import jax
import jax.numpy as jnp
from jax import lax
from jax.experimental import pallas as pl
from jax.experimental.pallas import tpu as pltpu

F32 = jnp.float32
BF16 = jnp.bfloat16

# (in_c, kernel, expanded_c, out_c, use_se, se_squeeze_c, activation, stride)
# == torchvision mobilenet_v3_small inverted-residual configs for features[1:8]
BLOCK_CFG = [
    (16, 3, 16, 16, True, 8, "relu", 2),
    (16, 3, 72, 24, False, 0, "relu", 2),
    (24, 3, 88, 24, False, 0, "relu", 1),
    (24, 5, 96, 40, True, 24, "hardswish", 2),
    (40, 5, 240, 40, True, 64, "hardswish", 1),
    (40, 5, 240, 40, True, 64, "hardswish", 1),
    (40, 5, 120, 48, True, 32, "hardswish", 1),
]

STEM_K, STEM_STRIDE, STEM_OUT = 3, 2, 16
_NUM_CHW_BLOCKS = 3          # stem + blocks 1..3 run in (C, HW) orientation


# ------------------------------- small helpers ------------------------------

def _act(y, kind):
    if kind == "relu":
        return jnp.maximum(y, 0.0)
    if kind == "hardswish":
        return y * (jnp.minimum(jnp.maximum(y + 3.0, 0.0), 6.0) * (1.0 / 6.0))
    if kind == "hardsigmoid":
        return jnp.minimum(jnp.maximum(y + 3.0, 0.0), 6.0) * (1.0 / 6.0)
    return y


def _conv_out(size, k, stride):
    pad = (k - 1) // 2
    return (size + 2 * pad - k) // stride + 1


def _round_up(x, m):
    return -(-x // m) * m


def _tap_matrix(H, W, k, stride):
    """0/1 matrix S of shape (k*k*Ho*Wo, H*W).

    Row t*Ho*Wo + (ho*Wo + wo) selects the input pixel feeding tap t of output
    (ho, wo); taps that fall in the zero padding are all-zero rows, so S @ x
    implements padded im2col as one MXU matmul inside the kernel.
    """
    pad = (k - 1) // 2
    Ho = _conv_out(H, k, stride)
    Wo = _conv_out(W, k, stride)
    S = np.zeros((k * k * Ho * Wo, H * W), np.float32)
    for di in range(k):
        for dj in range(k):
            t = di * k + dj
            for ho in range(Ho):
                hi = ho * stride + di - pad
                if hi < 0 or hi >= H:
                    continue
                for wo in range(Wo):
                    wi = wo * stride + dj - pad
                    if wi < 0 or wi >= W:
                        continue
                    S[t * Ho * Wo + ho * Wo + wo, hi * W + wi] = 1.0
    return S, Ho, Wo


def _stem_patches(x_nhwc, k, stride):
    # 1-channel stem im2col done on the raw input (tiny: N*Ho*Wo*k*k floats).
    pad = (k - 1) // 2
    N, H, W, _ = x_nhwc.shape
    Ho = _conv_out(H, k, stride)
    Wo = _conv_out(W, k, stride)
    xp = jnp.pad(x_nhwc, ((0, 0), (pad, pad), (pad, pad), (0, 0)))
    taps = []
    for di in range(k):
        for dj in range(k):
            taps.append(xp[:, di:di + stride * (Ho - 1) + 1:stride,
                              dj:dj + stride * (Wo - 1) + 1:stride, 0])
    p = jnp.stack(taps, axis=-1)                       # (N, Ho, Wo, k*k)
    return p.reshape(N, Ho * Wo, k * k)


# ------------------------------ operand packing ------------------------------

class _Packer:
    """Packs many small 2-D arrays into one (rows, width) blob.

    Row offsets are aligned so every in-kernel read is a static, tile-aligned
    slice.  Returns (row0, rows, cols) indices for the kernel.
    """

    def __init__(self, width, out_dtype, align):
        self.width = width
        self.dtype = out_dtype
        self.align = align
        self.row = 0
        self.chunks = []

    def add(self, arr):
        arr = jnp.asarray(arr, F32)
        r, c = arr.shape
        assert c <= self.width, (c, self.width)
        idx = (self.row, int(r), int(c))
        rp = _round_up(int(r), self.align)
        self.chunks.append(jnp.pad(arr, ((0, rp - r), (0, self.width - c))))
        self.row += rp
        return idx

    def finalize(self):
        if not self.chunks:
            self.chunks.append(jnp.zeros((self.align, self.width), F32))
        return jnp.concatenate(self.chunks, axis=0).astype(self.dtype)


class _ColPacker:
    """Packs per-channel bias vectors as columns of one (height, ncols) blob
    (used by the (C, HW)-oriented stem / early blocks)."""

    def __init__(self, height=128):
        self.height = height
        self.cols = []

    def add(self, vec):
        v = jnp.asarray(vec, F32).reshape(-1)
        c = int(v.shape[0])
        assert c <= self.height
        idx = (len(self.cols), c)
        self.cols.append(jnp.pad(v, (0, self.height - c)))
        return idx

    def finalize(self):
        n = _round_up(max(len(self.cols), 1), 8)
        while len(self.cols) < n:
            self.cols.append(jnp.zeros((self.height,), F32))
        return jnp.stack(self.cols, axis=1)


def _build_packs(params, Hs, Ws):
    """Fold BN, build tap/reduce constants and pack everything into a handful
    of operands.  Returns (static meta, packed operands, flop estimate)."""
    # TODO(synk): the dense tap-gather constant grows O((H*W)^2); tile it
    # spatially (or use strided in-kernel gathers) if the post-stem resolution
    # ever exceeds ~64x64 -- v7x's 64 MiB VMEM is the first budget it blows.
    assert Hs * Ws <= 64 * 64, "spatially tile the tap matrices for large inputs"

    wp = _Packer(width=256, out_dtype=BF16, align=16)   # bf16 MXU operands
    wbp = _Packer(width=256, out_dtype=F32, align=8)    # f32 depthwise planes
    vp = _Packer(width=256, out_dtype=F32, align=1)     # (1, C) row biases
    cp = _ColPacker(height=128)                         # (C, 1) column biases

    flops = 0
    s1t = None
    wbig1t = None

    # ---- stem: (C, HW) orientation, BN scale folded into the weight --------
    stem = dict(w=wp.add((params["stem_w"] * params["stem_s"]).T),   # (16, 9)
                b=cp.add(params["stem_b"]))
    flops += 2 * STEM_OUT * STEM_K * STEM_K * Hs * Ws

    blocks = []
    H, W = Hs, Ws
    for bi, (cfg, bp) in enumerate(zip(BLOCK_CFG, params["blocks"])):
        in_c, k, exp, out_c, use_se, sq, act, stride = cfg
        tr = bi < _NUM_CHW_BLOCKS
        S_np, Ho, Wo = _tap_matrix(H, W, k, stride)
        HW_in, HWo, KH = H * W, Ho * Wo, k * k * Ho * Wo
        R_np = np.tile(np.eye(HWo, dtype=np.float32), (1, k * k))  # (HWo, KH)
        dw = bp["dw_w"] * bp["dw_s"]                    # (kk, exp), BN folded

        m = dict(tr=tr, act=act, use_se=use_se, sep=(bi == 0),
                 has_exp=(exp != in_c),
                 residual=(stride == 1 and in_c == out_c),
                 switch=(bi == _NUM_CHW_BLOCKS - 1))
        flops += 2 * exp * HW_in * KH + 2 * exp * KH * HWo + 2 * out_c * exp * HWo
        if m["has_exp"]:
            flops += 2 * exp * in_c * HW_in
        if use_se:
            flops += 4 * sq * exp

        if tr:
            # -------- (C, HW) orientation: weights stored pre-transposed ----
            if m["has_exp"]:
                m["exp_w"] = wp.add((bp["exp_w"] * bp["exp_s"]).T)   # (exp, in)
                m["exp_b"] = cp.add(bp["exp_b"])
            if bi == 0:
                # block-1 gather constants are wider than the pack -> own DMAs
                s1t = jnp.asarray(S_np.T, BF16)                      # (HW, KH)
                wbig1t = jnp.repeat(dw.T, HWo, axis=1).astype(F32)   # (exp, KH)
            else:
                m["S"] = wp.add(S_np.T)                              # (HW, KH)
                m["wbig"] = wbp.add(jnp.repeat(dw.T, HWo, axis=1))   # (exp, KH)
            m["R"] = wp.add(R_np.T)                                  # (KH, HWo)
            m["dw_b"] = cp.add(bp["dw_b"])
            if use_se:
                m["se_w1"] = wp.add(bp["se_w1"].T)                   # (sq, exp)
                m["se_b1"] = cp.add(bp["se_b1"])
                m["se_w2"] = wp.add(bp["se_w2"].T)                   # (exp, sq)
                m["se_b2"] = cp.add(bp["se_b2"])
            m["proj"] = wp.add((bp["proj_w"] * bp["proj_s"]).T)      # (out, exp)
            m["proj_b"] = cp.add(bp["proj_b"])
        else:
            # -------- (HW, C) orientation ------------------------------------
            if m["has_exp"]:
                m["exp_w"] = wp.add(bp["exp_w"] * bp["exp_s"])       # (in, exp)
                m["exp_b"] = vp.add(bp["exp_b"])
            m["S"] = wp.add(S_np)                                    # (KH, HW)
            m["wbig"] = wbp.add(jnp.repeat(dw, HWo, axis=0))         # (KH, exp)
            m["R"] = wp.add(R_np)                                    # (HWo, KH)
            m["dw_b"] = vp.add(bp["dw_b"])
            if use_se:
                m["se_w1"] = wp.add(bp["se_w1"])                     # (exp, sq)
                m["se_b1"] = vp.add(bp["se_b1"])
                m["se_w2"] = wp.add(bp["se_w2"])                     # (sq, exp)
                m["se_b2"] = vp.add(bp["se_b2"])
            m["proj"] = wp.add(bp["proj_w"] * bp["proj_s"])          # (exp, out)
            m["proj_b"] = vp.add(bp["proj_b"])
        blocks.append(m)
        H, W = Ho, Wo

    # ---- merged MLP heads: shared first matmul, block-diagonal second ------
    nc = params["fs_w2"].shape[1]
    h_sc = params["sc_w1"].shape[1]
    h_fs = params["fs_w1"].shape[1]
    hw1 = jnp.concatenate([params["sc_w1"], params["fs_w1"]], axis=1)
    hb1 = jnp.concatenate([params["sc_b1"], params["fs_b1"]], axis=1)
    hw2 = jnp.zeros((h_sc + h_fs, 1 + nc), F32)
    hw2 = hw2.at[:h_sc, :1].set(params["sc_w2"])
    hw2 = hw2.at[h_sc:, 1:].set(params["fs_w2"])
    hb2 = jnp.concatenate([params["sc_b2"], params["fs_b2"]], axis=1)
    head = dict(w1=wp.add(hw1), b1=vp.add(hb1), w2=wp.add(hw2), b2=vp.add(hb2))
    flops += 2 * hw1.shape[0] * hw1.shape[1] + 2 * hw2.shape[0] * hw2.shape[1]

    meta = dict(stem=stem, blocks=blocks, head=head)
    operands = (s1t, wbig1t, cp.finalize(), wp.finalize(), wbp.finalize(),
                vp.finalize())
    return meta, operands, int(flops)


# ------------------------------- fused kernel -------------------------------

def _fused_kernel(patches_ref, s1t_ref, wbig1t_ref, col_ref, w_ref, wbig_ref,
                  vec_ref, out_ref, *, meta):
    stem, blocks, head = meta["stem"], meta["blocks"], meta["head"]

    def wsl(idx):                       # bf16 matmul operand
        r0, r, c = idx
        return w_ref[r0:r0 + r, :c]

    def wbsl(idx):                      # f32 depthwise weight plane
        r0, r, c = idx
        return wbig_ref[r0:r0 + r, :c]

    def vec(idx):                       # (1, C) row bias
        r0, _, c = idx
        return vec_ref[r0:r0 + 1, :c]

    def col(idx):                       # (C, 1) column bias
        j, c = idx
        return col_ref[:c, j:j + 1]

    def mm(a, b):
        return jnp.dot(a, b, preferred_element_type=jnp.float32)

    def bf(x):
        return x.astype(BF16)

    # ---- stem: (16, 9) @ (9, HW0) in (C, HW) orientation, lane-dense -------
    pt = patches_ref[0]                                   # (9, HW0) bf16
    h = _act(mm(wsl(stem["w"]), pt) + col(stem["b"]), "hardswish")  # (16, HW0)

    # ---- inverted residual blocks (all intermediates stay in VMEM / vregs) -
    for m in blocks:
        x_in = h
        act = m["act"]
        if m["tr"]:
            # ---------------- (C, HW) orientation ----------------------------
            if m["has_exp"]:
                h = _act(mm(wsl(m["exp_w"]), bf(h)) + col(m["exp_b"]), act)
            S = s1t_ref[...] if m["sep"] else wsl(m["S"])
            Wb = wbig1t_ref[...] if m["sep"] else wbsl(m["wbig"])
            P = mm(bf(h), S) * Wb                          # (exp, kk*HWo) f32
            h = _act(mm(bf(P), wsl(m["R"])) + col(m["dw_b"]), act)  # (exp, HWo)
            if m["use_se"]:
                pooled = jnp.mean(h, axis=1, keepdims=True)          # (exp, 1)
                z = jnp.maximum(
                    mm(wsl(m["se_w1"]), bf(pooled)) + col(m["se_b1"]), 0.0)
                sg = _act(mm(wsl(m["se_w2"]), bf(z)) + col(m["se_b2"]),
                          "hardsigmoid")
                h = h * sg
            h = mm(wsl(m["proj"]), bf(h)) + col(m["proj_b"])        # (out, HWo)
        else:
            # ---------------- (HW, C) orientation ----------------------------
            if m["has_exp"]:
                h = _act(mm(bf(h), wsl(m["exp_w"])) + vec(m["exp_b"]), act)
            P = mm(wsl(m["S"]), bf(h)) * wbsl(m["wbig"])   # (kk*HWo, exp) f32
            h = _act(mm(wsl(m["R"]), bf(P)) + vec(m["dw_b"]), act)  # (HWo, exp)
            if m["use_se"]:
                pooled = jnp.mean(h, axis=0, keepdims=True)          # (1, exp)
                z = jnp.maximum(
                    mm(bf(pooled), wsl(m["se_w1"])) + vec(m["se_b1"]), 0.0)
                sg = _act(mm(bf(z), wsl(m["se_w2"])) + vec(m["se_b2"]),
                          "hardsigmoid")
                h = h * sg
            h = mm(bf(h), wsl(m["proj"])) + vec(m["proj_b"])        # (HWo, out)
        if m["residual"]:
            h = h + x_in
        if m["switch"]:           # single crossover: (C, HW) -> (HW, C)
            h = h.T

    # ---- global average pool + merged MLP heads -----------------------------
    feats = jnp.mean(h, axis=0, keepdims=True)                       # (1, 48)
    z = jnp.maximum(mm(bf(feats), wsl(head["w1"])) + vec(head["b1"]), 0.0)
    o = mm(bf(z), wsl(head["w2"])) + vec(head["b2"])                 # (1, 1+nc)
    out_ref[...] = o.reshape(out_ref.shape)


# --------------------------------- wrapper -----------------------------------

def forward(params, x_nchw):
    N, _, H, W = x_nchw.shape
    num_classes = params["fs_w2"].shape[1]
    x = jnp.transpose(x_nchw, (0, 2, 3, 1)).astype(F32)        # NCHW -> NHWC
    Hs = _conv_out(H, STEM_K, STEM_STRIDE)
    Ws = _conv_out(W, STEM_K, STEM_STRIDE)
    HW0 = Hs * Ws
    # Lane-dense stem patches: (N, k*k, HW0) with HW0 in the lane dimension.
    patches = _stem_patches(x, STEM_K, STEM_STRIDE)            # (N, HW0, 9)
    patches = jnp.transpose(patches, (0, 2, 1)).astype(BF16)   # (N, 9, HW0)

    meta, packs, flops = _build_packs(params, Hs, Ws)
    s1t, wbig1t, col_pack, w_pack, wbig_pack, vec_pack = packs
    ops = (patches, s1t, wbig1t, col_pack, w_pack, wbig_pack, vec_pack)

    def const_spec(a):
        nd = a.ndim
        return pl.BlockSpec(a.shape, lambda n, _nd=nd: (0,) * _nd)

    in_specs = ([pl.BlockSpec((1, patches.shape[1], HW0), lambda n: (n, 0, 0))]
                + [const_spec(a) for a in ops[1:]])

    bytes_accessed = int(sum(int(np.prod(a.shape)) * a.dtype.itemsize
                             for a in ops) + N * (1 + num_classes) * 4)
    cost = pl.CostEstimate(flops=flops * N, transcendentals=0,
                           bytes_accessed=bytes_accessed)

    # grid=(batch,): on v7x both TensorCores are used when N % 2 == 0; on
    # v5e/v6e it is a cheap serial loop and the weight packs are DMA'd once.
    out = pl.pallas_call(
        functools.partial(_fused_kernel, meta=meta),
        out_shape=jax.ShapeDtypeStruct((N, 1, 1 + num_classes), F32),
        grid=(N,),
        in_specs=in_specs,
        out_specs=pl.BlockSpec((1, 1, 1 + num_classes), lambda n: (n, 0, 0)),
        compiler_params=pltpu.CompilerParams(
            dimension_semantics=("parallel",)),
        cost_estimate=cost,
    )(*ops)

    out = out[:, 0, :]                                          # (N, 1 + nc)
    return {"stroke_count": out[:, 0], "first_stroke": out[:, 1:]}


# --------------------------- pure-JAX/XLA reference --------------------------

def _ref_forward(params, x_nchw):
    P = lax.Precision.HIGHEST
    x = jnp.transpose(x_nchw, (0, 2, 3, 1)).astype(F32)

    def conv(h, w_hwio, stride, pad, groups=1):
        return lax.conv_general_dilated(
            h, w_hwio, window_strides=(stride, stride),
            padding=[(pad, pad), (pad, pad)],
            dimension_numbers=("NHWC", "HWIO", "NHWC"),
            feature_group_count=groups, precision=P)

    def bn(y, s, b):
        return y * s.reshape(1, 1, 1, -1) + b.reshape(1, 1, 1, -1)

    w = params["stem_w"].reshape(STEM_K, STEM_K, 1, STEM_OUT)
    h = _act(bn(conv(x, w, STEM_STRIDE, (STEM_K - 1) // 2),
                params["stem_s"], params["stem_b"]), "hardswish")

    for bp, cfg in zip(params["blocks"], BLOCK_CFG):
        in_c, k, exp, out_c, use_se, _sq, act, stride = cfg
        x_in = h
        if exp != in_c:
            y = jnp.einsum("nhwc,cd->nhwd", h, bp["exp_w"], precision=P)
            h = _act(bn(y, bp["exp_s"], bp["exp_b"]), act)
        wdw = bp["dw_w"].reshape(k, k, 1, exp)
        y = conv(h, wdw, stride, (k - 1) // 2, groups=exp)
        h = _act(bn(y, bp["dw_s"], bp["dw_b"]), act)
        if use_se:
            pooled = jnp.mean(h, axis=(1, 2))
            z = jnp.maximum(jnp.matmul(pooled, bp["se_w1"], precision=P)
                            + bp["se_b1"], 0.0)
            sg = _act(jnp.matmul(z, bp["se_w2"], precision=P) + bp["se_b2"],
                      "hardsigmoid")
            h = h * sg[:, None, None, :]
        y = jnp.einsum("nhwc,cd->nhwd", h, bp["proj_w"], precision=P)
        h = bn(y, bp["proj_s"], bp["proj_b"])
        if stride == 1 and in_c == out_c:
            h = h + x_in

    feats = jnp.mean(h, axis=(1, 2))                              # (N, 48)
    sc = jnp.matmul(
        jnp.maximum(jnp.matmul(feats, params["sc_w1"], precision=P)
                    + params["sc_b1"], 0.0),
        params["sc_w2"], precision=P) + params["sc_b2"]
    fs = jnp.matmul(
        jnp.maximum(jnp.matmul(feats, params["fs_w1"], precision=P)
                    + params["fs_b1"], 0.0),
        params["fs_w2"], precision=P) + params["fs_b2"]
    return {"stroke_count": sc[:, 0], "first_stroke": fs}


# --------------------------- deterministic params ---------------------------

def _bn_fold(key, c, eps=1e-3):
    k1, k2, k3, k4 = jax.random.split(key, 4)
    gamma = 1.0 + 0.1 * jax.random.normal(k1, (c,), F32)
    beta = 0.1 * jax.random.normal(k2, (c,), F32)
    mean = 0.1 * jax.random.normal(k3, (c,), F32)
    var = 1.0 + 0.1 * jax.random.uniform(k4, (c,), F32)
    scale = gamma / jnp.sqrt(var + eps)
    bias = beta - mean * scale
    return scale.reshape(1, c), bias.reshape(1, c)


def init_params(key, num_classes):
    def normal(k, shape, s=1.0):
        return s * jax.random.normal(k, shape, F32)

    def dense(k, fi, fo):
        return normal(k, (fi, fo), 1.0 / float(fi) ** 0.5)

    p = {}
    key, k0, kb0 = jax.random.split(key, 3)
    p["stem_w"] = dense(k0, STEM_K * STEM_K, STEM_OUT)      # (9, 16)
    p["stem_s"], p["stem_b"] = _bn_fold(kb0, STEM_OUT)

    blocks = []
    for (in_c, k, exp, out_c, use_se, sq, _act_kind, _stride) in BLOCK_CFG:
        key, *ks = jax.random.split(key, 13)
        bp = {}
        if exp != in_c:
            bp["exp_w"] = dense(ks[0], in_c, exp)
            bp["exp_s"], bp["exp_b"] = _bn_fold(ks[1], exp)
        bp["dw_w"] = normal(ks[2], (k * k, exp), 0.2)
        bp["dw_s"], bp["dw_b"] = _bn_fold(ks[3], exp)
        if use_se:
            bp["se_w1"] = dense(ks[4], exp, sq)
            bp["se_b1"] = normal(ks[5], (1, sq), 0.01)
            bp["se_w2"] = dense(ks[6], sq, exp)
            bp["se_b2"] = normal(ks[7], (1, exp), 0.01)
        bp["proj_w"] = dense(ks[8], exp, out_c)
        bp["proj_s"], bp["proj_b"] = _bn_fold(ks[9], out_c)
        blocks.append(bp)
    p["blocks"] = blocks

    key, k1, k2, k3, k4, k5, k6, k7, k8 = jax.random.split(key, 9)
    p["sc_w1"] = dense(k1, 48, 64)
    p["sc_b1"] = normal(k2, (1, 64), 0.01)
    p["sc_w2"] = dense(k3, 64, 1)
    p["sc_b2"] = normal(k4, (1, 1), 0.01)
    p["fs_w1"] = dense(k5, 48, 64)
    p["fs_b1"] = normal(k6, (1, 64), 0.01)
    p["fs_w2"] = dense(k7, 64, num_classes)
    p["fs_b2"] = normal(k8, (1, num_classes), 0.01)
    return p


if __name__ == "__main__":
    num_strokes, num_classes = 30, 10  # num_strokes unused in forward (as in PyTorch)
    key = jax.random.PRNGKey(0)
    kp, kx = jax.random.split(key)
    params = init_params(kp, num_classes)
    x = jax.random.normal(kx, (2, 1, 32, 32), F32)   # NCHW, 1-channel images

    out = jax.jit(forward)(params, x)
    out = jax.tree_util.tree_map(jax.block_until_ready, out)

    assert out["stroke_count"].shape == (2,)
    assert out["first_stroke"].shape == (2, num_classes)
    assert bool(jnp.all(jnp.isfinite(out["stroke_count"])))
    assert bool(jnp.all(jnp.isfinite(out["first_stroke"])))

    # cross-check against an independent pure-JAX (lax.conv, f32) reference;
    # the kernel feeds bf16 operands to the MXU, so allow a 5% relative band.
    ref = jax.jit(_ref_forward)(params, x)
    ref = jax.tree_util.tree_map(jax.block_until_ready, ref)
    tol = 5e-2
    err_sc = float(jnp.max(jnp.abs(out["stroke_count"] - ref["stroke_count"])))
    err_fs = float(jnp.max(jnp.abs(out["first_stroke"] - ref["first_stroke"])))
    sc_scale = 1.0 + float(jnp.max(jnp.abs(ref["stroke_count"])))
    fs_scale = 1.0 + float(jnp.max(jnp.abs(ref["first_stroke"])))
    assert err_sc <= tol * sc_scale, f"stroke_count mismatch: {err_sc}"
    assert err_fs <= tol * fs_scale, f"first_stroke mismatch: {err_fs}"

    print("KERNEL_OK")
</pallas_src>

<mosaic_0001>
module attributes {stable_mosaic.version = 11 : i64} {
  func.func @_fused_kernel(%arg0: i32, %arg1: memref<1x9x256xbf16, #tpu.memory_space<vmem>>, %arg2: memref<256x576xbf16, #tpu.memory_space<vmem>>, %arg3: memref<16x576xf32, #tpu.memory_space<vmem>>, %arg4: memref<128x16xf32, #tpu.memory_space<vmem>>, %arg5: memref<3712x256xbf16, #tpu.memory_space<vmem>>, %arg6: memref<576x256xf32, #tpu.memory_space<vmem>>, %arg7: memref<22x256xf32, #tpu.memory_space<vmem>>, %arg8: memref<1x1x11xf32, #tpu.memory_space<vmem>>) attributes {dimension_semantics = [#tpu.dimension_semantics<parallel>], iteration_bounds = array<i64: 2>, scalar_prefetch = 0 : i64, scratch_operands = 0 : i64, tpu.core_type = #tpu.core_type<tc>, window_params = [{transform_indices = @transform_0, window_bounds = array<i64: 1, 9, 256>}, {pipeline_mode = #tpu.pipeline_mode<synchronous>, transform_indices = @transform_1, window_bounds = array<i64: 256, 576>}, {pipeline_mode = #tpu.pipeline_mode<synchronous>, transform_indices = @transform_2, window_bounds = array<i64: 16, 576>}, {pipeline_mode = #tpu.pipeline_mode<synchronous>, transform_indices = @transform_3, window_bounds = array<i64: 128, 16>}, {pipeline_mode = #tpu.pipeline_mode<synchronous>, transform_indices = @transform_4, window_bounds = array<i64: 3712, 256>}, {pipeline_mode = #tpu.pipeline_mode<synchronous>, transform_indices = @transform_5, window_bounds = array<i64: 576, 256>}, {pipeline_mode = #tpu.pipeline_mode<synchronous>, transform_indices = @transform_6, window_bounds = array<i64: 22, 256>}, {transform_indices = @transform_7, window_bounds = array<i64: 1, 1, 11>}]} {
    %c0 = arith.constant 0 : index
    %c0_0 = arith.constant 0 : index
    %c0_1 = arith.constant 0 : index
    %0 = vector.load %arg1[%c0, %c0_0, %c0_1] : memref<1x9x256xbf16, #tpu.memory_space<vmem>>, vector<1x9x256xbf16>
    %1 = vector.shape_cast %0 : vector<1x9x256xbf16> to vector<9x256xbf16>
    %c0_2 = arith.constant 0 : index
    %c0_3 = arith.constant 0 : index
    %2 = vector.load %arg5[%c0_2, %c0_3] : memref<3712x256xbf16, #tpu.memory_space<vmem>>, vector<16x9xbf16>
    %cst = arith.constant dense<0.000000e+00> : vector<16x256xf32>
    %3 = tpu.matmul %2, %1, %cst {dimension_numbers = #tpu.dot_dimension_numbers<[1], [0], [0], [1], [0, 0, 1, 1], [], []>} : vector<16x9xbf16>, vector<9x256xbf16>, vector<16x256xf32> -> vector<16x256xf32>
    %c0_4 = arith.constant 0 : index
    %c0_5 = arith.constant 0 : index
    %4 = vector.load %arg4[%c0_4, %c0_5] : memref<128x16xf32, #tpu.memory_space<vmem>>, vector<16x1xf32>
    %5 = vector.broadcast %4 : vector<16x1xf32> to vector<16x256xf32>
    %6 = arith.addf %3, %5 : vector<16x256xf32>
    %cst_6 = arith.constant 3.000000e+00 : f32
    %7 = vector.broadcast %cst_6 : f32 to vector<16x256xf32>
    %8 = arith.addf %6, %7 : vector<16x256xf32>
    %cst_7 = arith.constant 0.000000e+00 : f32
    %9 = vector.broadcast %cst_7 : f32 to vector<16x256xf32>
    %10 = arith.maximumf %8, %9 : vector<16x256xf32>
    %cst_8 = arith.constant 6.000000e+00 : f32
    %11 = vector.broadcast %cst_8 : f32 to vector<16x256xf32>
    %12 = arith.minimumf %10, %11 : vector<16x256xf32>
    %cst_9 = arith.constant 0.166666672 : f32
    %13 = vector.broadcast %cst_9 : f32 to vector<16x256xf32>
    %14 = arith.mulf %12, %13 : vector<16x256xf32>
    %15 = arith.mulf %6, %14 : vector<16x256xf32>
    %c0_10 = arith.constant 0 : index
    %c0_11 = arith.constant 0 : index
    %16 = vector.load %arg2[%c0_10, %c0_11] : memref<256x576xbf16, #tpu.memory_space<vmem>>, vector<256x576xbf16>
    %c0_12 = arith.constant 0 : index
    %c0_13 = arith.constant 0 : index
    %17 = vector.load %arg3[%c0_12, %c0_13] : memref<16x576xf32, #tpu.memory_space<vmem>>, vector<16x576xf32>
    %18 = arith.truncf %15 : vector<16x256xf32> to vector<16x256xbf16>
    %cst_14 = arith.constant dense<0.000000e+00> : vector<16x576xf32>
    %19 = tpu.matmul %18, %16, %cst_14 {dimension_numbers = #tpu.dot_dimension_numbers<[1], [0], [0], [1], [0, 0, 1, 1], [], []>} : vector<16x256xbf16>, vector<256x576xbf16>, vector<16x576xf32> -> vector<16x576xf32>
    %20 = arith.mulf %19, %17 : vector<16x576xf32>
    %21 = arith.truncf %20 : vector<16x576xf32> to vector<16x576xbf16>
    %c16 = arith.constant 16 : index
    %c0_15 = arith.constant 0 : index
    %22 = vector.load %arg5[%c16, %c0_15] : memref<3712x256xbf16, #tpu.memory_space<vmem>>, vector<576x64xbf16>
    %cst_16 = arith.constant dense<0.000000e+00> : vector<16x64xf32>
    %23 = tpu.matmul %21, %22, %cst_16 {dimension_numbers = #tpu.dot_dimension_numbers<[1], [0], [0], [1], [0, 0, 1, 1], [], []>} : vector<16x576xbf16>, vector<576x64xbf16>, vector<16x64xf32> -> vector<16x64xf32>
    %c0_17 = arith.constant 0 : index
    %c1 = arith.constant 1 : index
    %24 = vector.load %arg4[%c0_17, %c1] : memref<128x16xf32, #tpu.memory_space<vmem>>, vector<16x1xf32>
    %25 = vector.broadcast %24 : vector<16x1xf32> to vector<16x64xf32>
    %26 = arith.addf %23, %25 : vector<16x64xf32>
    %cst_18 = arith.constant 0.000000e+00 : f32
    %27 = vector.broadcast %cst_18 : f32 to vector<16x64xf32>
    %28 = arith.maximumf %26, %27 : vector<16x64xf32>
    %cst_19 = arith.constant dense<0.000000e+00> : vector<16xf32>
    %29 = vector.multi_reduction <add>, %28, %cst_19 [1] : vector<16x64xf32> to vector<16xf32>
    %30 = vector.shape_cast %29 : vector<16xf32> to vector<16x1xf32>
    %cst_20 = arith.constant 6.400000e+01 : f32
    %31 = vector.broadcast %cst_20 : f32 to vector<16x1xf32>
    %32 = arith.divf %30, %31 : vector<16x1xf32>
    %c592 = arith.constant 592 : index
    %c0_21 = arith.constant 0 : index
    %33 = vector.load %arg5[%c592, %c0_21] : memref<3712x256xbf16, #tpu.memory_space<vmem>>, vector<8x16xbf16>
    %34 = arith.truncf %32 : vector<16x1xf32> to vector<16x1xbf16>
    %cst_22 = arith.constant dense<0.000000e+00> : vector<8x1xf32>
    %35 = tpu.matmul %33, %34, %cst_22 {dimension_numbers = #tpu.dot_dimension_numbers<[1], [0], [0], [1], [0, 0, 1, 1], [], []>} : vector<8x16xbf16>, vector<16x1xbf16>, vector<8x1xf32> -> vector<8x1xf32>
    %c0_23 = arith.constant 0 : index
    %c2 = arith.constant 2 : index
    %36 = vector.load %arg4[%c0_23, %c2] : memref<128x16xf32, #tpu.memory_space<vmem>>, vector<8x1xf32>
    %37 = arith.addf %35, %36 : vector<8x1xf32>
    %cst_24 = arith.constant 0.000000e+00 : f32
    %38 = vector.broadcast %cst_24 : f32 to vector<8x1xf32>
    %39 = arith.maximumf %37, %38 : vector<8x1xf32>
    %c608 = arith.constant 608 : index
    %c0_25 = arith.constant 0 : index
    %40 = vector.load %arg5[%c608, %c0_25] : memref<3712x256xbf16, #tpu.memory_space<vmem>>, vector<16x8xbf16>
    %41 = arith.truncf %39 : vector<8x1xf32> to vector<8x1xbf16>
    %cst_26 = arith.constant dense<0.000000e+00> : vector<16x1xf32>
    %42 = tpu.matmul %40, %41, %cst_26 {dimension_numbers = #tpu.dot_dimension_numbers<[1], [0], [0], [1], [0, 0, 1, 1], [], []>} : vector<16x8xbf16>, vector<8x1xbf16>, vector<16x1xf32> -> vector<16x1xf32>
    %c0_27 = arith.constant 0 : index
    %c3 = arith.constant 3 : index
    %43 = vector.load %arg4[%c0_27, %c3] : memref<128x16xf32, #tpu.memory_space<vmem>>, vector<16x1xf32>
    %44 = arith.addf %42, %43 : vector<16x1xf32>
    %cst_28 = arith.constant 3.000000e+00 : f32
    %45 = vector.broadcast %cst_28 : f32 to vector<16x1xf32>
    %46 = arith.addf %44, %45 : vector<16x1xf32>
    %cst_29 = arith.constant 0.000000e+00 : f32
    %47 = vector.broadcast %cst_29 : f32 to vector<16x1xf32>
    %48 = arith.maximumf %46, %47 : vector<16x1xf32>
    %cst_30 = arith.constant 6.000000e+00 : f32
    %49 = vector.broadcast %cst_30 : f32 to vector<16x1xf32>
    %50 = arith.minimumf %48, %49 : vector<16x1xf32>
    %cst_31 = arith.constant 0.166666672 : f32
    %51 = vector.broadcast %cst_31 : f32 to vector<16x1xf32>
    %52 = arith.mulf %50, %51 : vector<16x1xf32>
    %53 = vector.broadcast %52 : vector<16x1xf32> to vector<16x64xf32>
    %54 = arith.mulf %28, %53 : vector<16x64xf32>
    %c624 = arith.constant 624 : index
    %c0_32 = arith.constant 0 : index
    %55 = vector.load %arg5[%c624, %c0_32] : memref<3712x256xbf16, #tpu.memory_space<vmem>>, vector<16x16xbf16>
    %56 = arith.truncf %54 : vector<16x64xf32> to vector<16x64xbf16>
    %cst_33 = arith.constant dense<0.000000e+00> : vector<16x64xf32>
    %57 = tpu.matmul %55, %56, %cst_33 {dimension_numbers = #tpu.dot_dimension_numbers<[1], [0], [0], [1], [0, 0, 1, 1], [], []>} : vector<16x16xbf16>, vector<16x64xbf16>, vector<16x64xf32> -> vector<16x64xf32>
    %c0_34 = arith.constant 0 : index
    %c4 = arith.constant 4 : index
    %58 = vector.load %arg4[%c0_34, %c4] : memref<128x16xf32, #tpu.memory_space<vmem>>, vector<16x1xf32>
    %59 = vector.broadcast %58 : vector<16x1xf32> to vector<16x64xf32>
    %60 = arith.addf %57, %59 : vector<16x64xf32>
    %c640 = arith.constant 640 : index
    %c0_35 = arith.constant 0 : index
    %61 = vector.load %arg5[%c640, %c0_35] : memref<3712x256xbf16, #tpu.memory_space<vmem>>, vector<72x16xbf16>
    %62 = arith.truncf %60 : vector<16x64xf32> to vector<16x64xbf16>
    %cst_36 = arith.constant dense<0.000000e+00> : vector<72x64xf32>
    %63 = tpu.matmul %61, %62, %cst_36 {dimension_numbers = #tpu.dot_dimension_numbers<[1], [0], [0], [1], [0, 0, 1, 1], [], []>} : vector<72x16xbf16>, vector<16x64xbf16>, vector<72x64xf32> -> vector<72x64xf32>
    %c0_37 = arith.constant 0 : index
    %c5 = arith.constant 5 : index
    %64 = vector.load %arg4[%c0_37, %c5] : memref<128x16xf32, #tpu.memory_space<vmem>>, vector<72x1xf32>
    %65 = vector.broadcast %64 : vector<72x1xf32> to vector<72x64xf32>
    %66 = arith.addf %63, %65 : vector<72x64xf32>
    %cst_38 = arith.constant 0.000000e+00 : f32
    %67 = vector.broadcast %cst_38 : f32 to vector<72x64xf32>
    %68 = arith.maximumf %66, %67 : vector<72x64xf32>
    %c720 = arith.constant 720 : index
    %c0_39 = arith.constant 0 : index
    %69 = vector.load %arg5[%c720, %c0_39] : memref<3712x256xbf16, #tpu.memory_space<vmem>>, vector<64x144xbf16>
    %c0_40 = arith.constant 0 : index
    %c0_41 = arith.constant 0 : index
    %70 = vector.load %arg6[%c0_40, %c0_41] : memref<576x256xf32, #tpu.memory_space<vmem>>, vector<72x144xf32>
    %71 = arith.truncf %68 : vector<72x64xf32> to vector<72x64xbf16>
    %cst_42 = arith.constant dense<0.000000e+00> : vector<72x144xf32>
    %72 = tpu.matmul %71, %69, %cst_42 {dimension_numbers = #tpu.dot_dimension_numbers<[1], [0], [0], [1], [0, 0, 1, 1], [], []>} : vector<72x64xbf16>, vector<64x144xbf16>, vector<72x144xf32> -> vector<72x144xf32>
    %73 = arith.mulf %72, %70 : vector<72x144xf32>
    %74 = arith.truncf %73 : vector<72x144xf32> to vector<72x144xbf16>
    %c784 = arith.constant 784 : index
    %c0_43 = arith.constant 0 : index
    %75 = vector.load %arg5[%c784, %c0_43] : memref<3712x256xbf16, #tpu.memory_space<vmem>>, vector<144x16xbf16>
    %cst_44 = arith.constant dense<0.000000e+00> : vector<72x16xf32>
    %76 = tpu.matmul %74, %75, %cst_44 {dimension_numbers = #tpu.dot_dimension_numbers<[1], [0], [0], [1], [0, 0, 1, 1], [], []>} : vector<72x144xbf16>, vector<144x16xbf16>, vector<72x16xf32> -> vector<72x16xf32>
    %c0_45 = arith.constant 0 : index
    %c6 = arith.constant 6 : index
    %77 = vector.load %arg4[%c0_45, %c6] : memref<128x16xf32, #tpu.memory_space<vmem>>, vector<72x1xf32>
    %78 = vector.broadcast %77 : vector<72x1xf32> to vector<72x16xf32>
    %79 = arith.addf %76, %78 : vector<72x16xf32>
    %cst_46 = arith.constant 0.000000e+00 : f32
    %80 = vector.broadcast %cst_46 : f32 to vector<72x16xf32>
    %81 = arith.maximumf %79, %80 : vector<72x16xf32>
    %c928 = arith.constant 928 : index
    %c0_47 = arith.constant 0 : index
    %82 = vector.load %arg5[%c928, %c0_47] : memref<3712x256xbf16, #tpu.memory_space<vmem>>, vector<24x72xbf16>
    %83 = arith.truncf %81 : vector<72x16xf32> to vector<72x16xbf16>
    %cst_48 = arith.constant dense<0.000000e+00> : vector<24x16xf32>
    %84 = tpu.matmul %82, %83, %cst_48 {dimension_numbers = #tpu.dot_dimension_numbers<[1], [0], [0], [1], [0, 0, 1, 1], [], []>} : vector<24x72xbf16>, vector<72x16xbf16>, vector<24x16xf32> -> vector<24x16xf32>
    %c0_49 = arith.constant 0 : index
    %c7 = arith.constant 7 : index
    %85 = vector.load %arg4[%c0_49, %c7] : memref<128x16xf32, #tpu.memory_space<vmem>>, vector<24x1xf32>
    %86 = vector.broadcast %85 : vector<24x1xf32> to vector<24x16xf32>
    %87 = arith.addf %84, %86 : vector<24x16xf32>
    %c960 = arith.constant 960 : index
    %c0_50 = arith.constant 0 : index
    %88 = vector.load %arg5[%c960, %c0_50] : memref<3712x256xbf16, #tpu.memory_space<vmem>>, vector<88x24xbf16>
    %89 = arith.truncf %87 : vector<24x16xf32> to vector<24x16xbf16>
    %cst_51 = arith.constant dense<0.000000e+00> : vector<88x16xf32>
    %90 = tpu.matmul %88, %89, %cst_51 {dimension_numbers = #tpu.dot_dimension_numbers<[1], [0], [0], [1], [0, 0, 1, 1], [], []>} : vector<88x24xbf16>, vector<24x16xbf16>, vector<88x16xf32> -> vector<88x16xf32>
    %c0_52 = arith.constant 0 : index
    %c8 = arith.constant 8 : index
    %91 = vector.load %arg4[%c0_52, %c8] : memref<128x16xf32, #tpu.memory_space<vmem>>, vector<88x1xf32>
    %92 = vector.broadcast %91 : vector<88x1xf32> to vector<88x16xf32>
    %93 = arith.addf %90, %92 : vector<88x16xf32>
    %cst_53 = arith.constant 0.000000e+00 : f32
    %94 = vector.broadcast %cst_53 : f32 to vector<88x16xf32>
    %95 = arith.maximumf %93, %94 : vector<88x16xf32>
    %c1056 = arith.constant 1056 : index
    %c0_54 = arith.constant 0 : index
    %96 = vector.load %arg5[%c1056, %c0_54] : memref<3712x256xbf16, #tpu.memory_space<vmem>>, vector<16x144xbf16>
    %c72 = arith.constant 72 : index
    %c0_55 = arith.constant 0 : index
    %97 = vector.load %arg6[%c72, %c0_55] : memref<576x256xf32, #tpu.memory_space<vmem>>, vector<88x144xf32>
    %98 = arith.truncf %95 : vector<88x16xf32> to vector<88x16xbf16>
    %cst_56 = arith.constant dense<0.000000e+00> : vector<88x144xf32>
    %99 = tpu.matmul %98, %96, %cst_56 {dimension_numbers = #tpu.dot_dimension_numbers<[1], [0], [0], [1], [0, 0, 1, 1], [], []>} : vector<88x16xbf16>, vector<16x144xbf16>, vector<88x144xf32> -> vector<88x144xf32>
    %100 = arith.mulf %99, %97 : vector<88x144xf32>
    %101 = arith.truncf %100 : vector<88x144xf32> to vector<88x144xbf16>
    %c1072 = arith.constant 1072 : index
    %c0_57 = arith.constant 0 : index
    %102 = vector.load %arg5[%c1072, %c0_57] : memref<3712x256xbf16, #tpu.memory_space<vmem>>, vector<144x16xbf16>
    %cst_58 = arith.constant dense<0.000000e+00> : vector<88x16xf32>
    %103 = tpu.matmul %101, %102, %cst_58 {dimension_numbers = #tpu.dot_dimension_numbers<[1], [0], [0], [1], [0, 0, 1, 1], [], []>} : vector<88x144xbf16>, vector<144x16xbf16>, vector<88x16xf32> -> vector<88x16xf32>
    %c0_59 = arith.constant 0 : index
    %c9 = arith.constant 9 : index
    %104 = vector.load %arg4[%c0_59, %c9] : memref<128x16xf32, #tpu.memory_space<vmem>>, vector<88x1xf32>
    %105 = vector.broadcast %104 : vector<88x1xf32> to vector<88x16xf32>
    %106 = arith.addf %103, %105 : vector<88x16xf32>
    %cst_60 = arith.constant 0.000000e+00 : f32
    %107 = vector.broadcast %cst_60 : f32 to vector<88x16xf32>
    %108 = arith.maximumf %106, %107 : vector<88x16xf32>
    %c1216 = arith.constant 1216 : index
    %c0_61 = arith.constant 0 : index
    %109 = vector.load %arg5[%c1216, %c0_61] : memref<3712x256xbf16, #tpu.memory_space<vmem>>, vector<24x88xbf16>
    %110 = arith.truncf %108 : vector<88x16xf32> to vector<88x16xbf16>
    %cst_62 = arith.constant dense<0.000000e+00> : vector<24x16xf32>
    %111 = tpu.matmul %109, %110, %cst_62 {dimension_numbers = #tpu.dot_dimension_numbers<[1], [0], [0], [1], [0, 0, 1, 1], [], []>} : vector<24x88xbf16>, vector<88x16xbf16>, vector<24x16xf32> -> vector<24x16xf32>
    %c0_63 = arith.constant 0 : index
    %c10 = arith.constant 10 : index
    %112 = vector.load %arg4[%c0_63, %c10] : memref<128x16xf32, #tpu.memory_space<vmem>>, vector<24x1xf32>
    %113 = vector.broadcast %112 : vector<24x1xf32> to vector<24x16xf32>
    %114 = arith.addf %111, %113 : vector<24x16xf32>
    %115 = arith.addf %114, %87 : vector<24x16xf32>
    %116 = tpu.transpose %115, [1, 0] : vector<24x16xf32> -> vector<16x24xf32>
    %117 = arith.truncf %116 : vector<16x24xf32> to vector<16x24xbf16>
    %c1248 = arith.constant 1248 : index
    %c0_64 = arith.constant 0 : index
    %118 = vector.load %arg5[%c1248, %c0_64] : memref<3712x256xbf16, #tpu.memory_space<vmem>>, vector<24x96xbf16>
    %cst_65 = arith.constant dense<0.000000e+00> : vector<16x96xf32>
    %119 = tpu.matmul %117, %118, %cst_65 {dimension_numbers = #tpu.dot_dimension_numbers<[1], [0], [0], [1], [0, 0, 1, 1], [], []>} : vector<16x24xbf16>, vector<24x96xbf16>, vector<16x96xf32> -> vector<16x96xf32>
    %c0_66 = arith.constant 0 : index
    %c0_67 = arith.constant 0 : index
    %120 = vector.load %arg7[%c0_66, %c0_67] : memref<22x256xf32, #tpu.memory_space<vmem>>, vector<1x96xf32>
    %121 = vector.broadcast %120 : vector<1x96xf32> to vector<16x96xf32>
    %122 = arith.addf %119, %121 : vector<16x96xf32>
    %cst_68 = arith.constant 3.000000e+00 : f32
    %123 = vector.broadcast %cst_68 : f32 to vector<16x96xf32>
    %124 = arith.addf %122, %123 : vector<16x96xf32>
    %cst_69 = arith.constant 0.000000e+00 : f32
    %125 = vector.broadcast %cst_69 : f32 to vector<16x96xf32>
    %126 = arith.maximumf %124, %125 : vector<16x96xf32>
    %cst_70 = arith.constant 6.000000e+00 : f32
    %127 = vector.broadcast %cst_70 : f32 to vector<16x96xf32>
    %128 = arith.minimumf %126, %127 : vector<16x96xf32>
    %cst_71 = arith.constant 0.166666672 : f32
    %129 = vector.broadcast %cst_71 : f32 to vector<16x96xf32>
    %130 = arith.mulf %128, %129 : vector<16x96xf32>
    %131 = arith.mulf %122, %130 : vector<16x96xf32>
    %c1280 = arith.constant 1280 : index
    %c0_72 = arith.constant 0 : index
    %132 = vector.load %arg5[%c1280, %c0_72] : memref<3712x256xbf16, #tpu.memory_space<vmem>>, vector<100x16xbf16>
    %133 = arith.truncf %131 : vector<16x96xf32> to vector<16x96xbf16>
    %cst_73 = arith.constant dense<0.000000e+00> : vector<100x96xf32>
    %134 = tpu.matmul %132, %133, %cst_73 {dimension_numbers = #tpu.dot_dimension_numbers<[1], [0], [0], [1], [0, 0, 1, 1], [], []>} : vector<100x16xbf16>, vector<16x96xbf16>, vector<100x96xf32> -> vector<100x96xf32>
    %c160 = arith.constant 160 : index
    %c0_74 = arith.constant 0 : index
    %135 = vector.load %arg6[%c160, %c0_74] : memref<576x256xf32, #tpu.memory_space<vmem>>, vector<100x96xf32>
    %136 = arith.mulf %134, %135 : vector<100x96xf32>
    %c1392 = arith.constant 1392 : index
    %c0_75 = arith.constant 0 : index
    %137 = vector.load %arg5[%c1392, %c0_75] : memref<3712x256xbf16, #tpu.memory_space<vmem>>, vector<4x100xbf16>
    %138 = arith.truncf %136 : vector<100x96xf32> to vector<100x96xbf16>
    %cst_76 = arith.constant dense<0.000000e+00> : vector<4x96xf32>
    %139 = tpu.matmul %137, %138, %cst_76 {dimension_numbers = #tpu.dot_dimension_numbers<[1], [0], [0], [1], [0, 0, 1, 1], [], []>} : vector<4x100xbf16>, vector<100x96xbf16>, vector<4x96xf32> -> vector<4x96xf32>
    %c1_77 = arith.constant 1 : index
    %c0_78 = arith.constant 0 : index
    %140 = vector.load %arg7[%c1_77, %c0_78] : memref<22x256xf32, #tpu.memory_space<vmem>>, vector<1x96xf32>
    %141 = vector.broadcast %140 : vector<1x96xf32> to vector<4x96xf32>
    %142 = arith.addf %139, %141 : vector<4x96xf32>
    %cst_79 = arith.constant 3.000000e+00 : f32
    %143 = vector.broadcast %cst_79 : f32 to vector<4x96xf32>
    %144 = arith.addf %142, %143 : vector<4x96xf32>
    %cst_80 = arith.constant 0.000000e+00 : f32
    %145 = vector.broadcast %cst_80 : f32 to vector<4x96xf32>
    %146 = arith.maximumf %144, %145 : vector<4x96xf32>
    %cst_81 = arith.constant 6.000000e+00 : f32
    %147 = vector.broadcast %cst_81 : f32 to vector<4x96xf32>
    %148 = arith.minimumf %146, %147 : vector<4x96xf32>
    %cst_82 = arith.constant 0.166666672 : f32
    %149 = vector.broadcast %cst_82 : f32 to vector<4x96xf32>
    %150 = arith.mulf %148, %149 : vector<4x96xf32>
    %151 = arith.mulf %142, %150 : vector<4x96xf32>
    %cst_83 = arith.constant dense<0.000000e+00> : vector<96xf32>
    %152 = vector.multi_reduction <add>, %151, %cst_83 [0] : vector<4x96xf32> to vector<96xf32>
    %153 = vector.shape_cast %152 : vector<96xf32> to vector<1x96xf32>
    %cst_84 = arith.constant 4.000000e+00 : f32
    %154 = vector.broadcast %cst_84 : f32 to vector<1x96xf32>
    %155 = arith.divf %153, %154 : vector<1x96xf32>
    %156 = arith.truncf %155 : vector<1x96xf32> to vector<1x96xbf16>
    %c1408 = arith.constant 1408 : index
    %c0_85 = arith.constant 0 : index
    %157 = vector.load %arg5[%c1408, %c0_85] : memref<3712x256xbf16, #tpu.memory_space<vmem>>, vector<96x24xbf16>
    %cst_86 = arith.constant dense<0.000000e+00> : vector<1x24xf32>
    %158 = tpu.matmul %156, %157, %cst_86 {dimension_numbers = #tpu.dot_dimension_numbers<[1], [0], [0], [1], [0, 0, 1, 1], [], []>} : vector<1x96xbf16>, vector<96x24xbf16>, vector<1x24xf32> -> vector<1x24xf32>
    %c2_87 = arith.constant 2 : index
    %c0_88 = arith.constant 0 : index
    %159 = vector.load %arg7[%c2_87, %c0_88] : memref<22x256xf32, #tpu.memory_space<vmem>>, vector<1x24xf32>
    %160 = arith.addf %158, %159 : vector<1x24xf32>
    %cst_89 = arith.constant 0.000000e+00 : f32
    %161 = vector.broadcast %cst_89 : f32 to vector<1x24xf32>
    %162 = arith.maximumf %160, %161 : vector<1x24xf32>
    %163 = arith.truncf %162 : vector<1x24xf32> to vector<1x24xbf16>
    %c1504 = arith.constant 1504 : index
    %c0_90 = arith.constant 0 : index
    %164 = vector.load %arg5[%c1504, %c0_90] : memref<3712x256xbf16, #tpu.memory_space<vmem>>, vector<24x96xbf16>
    %cst_91 = arith.constant dense<0.000000e+00> : vector<1x96xf32>
    %165 = tpu.matmul %163, %164, %cst_91 {dimension_numbers = #tpu.dot_dimension_numbers<[1], [0], [0], [1], [0, 0, 1, 1], [], []>} : vector<1x24xbf16>, vector<24x96xbf16>, vector<1x96xf32> -> vector<1x96xf32>
    %c3_92 = arith.constant 3 : index
    %c0_93 = arith.constant 0 : index
    %166 = vector.load %arg7[%c3_92, %c0_93] : memref<22x256xf32, #tpu.memory_space<vmem>>, vector<1x96xf32>
    %167 = arith.addf %165, %166 : vector<1x96xf32>
    %cst_94 = arith.constant 3.000000e+00 : f32
    %168 = vector.broadcast %cst_94 : f32 to vector<1x96xf32>
    %169 = arith.addf %167, %168 : vector<1x96xf32>
    %cst_95 = arith.constant 0.000000e+00 : f32
    %170 = vector.broadcast %cst_95 : f32 to vector<1x96xf32>
    %171 = arith.maximumf %169, %170 : vector<1x96xf32>
    %cst_96 = arith.constant 6.000000e+00 : f32
    %172 = vector.broadcast %cst_96 : f32 to vector<1x96xf32>
    %173 = arith.minimumf %171, %172 : vector<1x96xf32>
    %cst_97 = arith.constant 0.166666672 : f32
    %174 = vector.broadcast %cst_97 : f32 to vector<1x96xf32>
    %175 = arith.mulf %173, %174 : vector<1x96xf32>
    %176 = vector.broadcast %175 : vector<1x96xf32> to vector<4x96xf32>
    %177 = arith.mulf %151, %176 : vector<4x96xf32>
    %178 = arith.truncf %177 : vector<4x96xf32> to vector<4x96xbf16>
    %c1536 = arith.constant 1536 : index
    %c0_98 = arith.constant 0 : index
    %179 = vector.load %arg5[%c1536, %c0_98] : memref<3712x256xbf16, #tpu.memory_space<vmem>>, vector<96x40xbf16>
    %cst_99 = arith.constant dense<0.000000e+00> : vector<4x40xf32>
    %180 = tpu.matmul %178, %179, %cst_99 {dimension_numbers = #tpu.dot_dimension_numbers<[1], [0], [0], [1], [0, 0, 1, 1], [], []>} : vector<4x96xbf16>, vector<96x40xbf16>, vector<4x40xf32> -> vector<4x40xf32>
    %c4_100 = arith.constant 4 : index
    %c0_101 = arith.constant 0 : index
    %181 = vector.load %arg7[%c4_100, %c0_101] : memref<22x256xf32, #tpu.memory_space<vmem>>, vector<1x40xf32>
    %182 = vector.broadcast %181 : vector<1x40xf32> to vector<4x40xf32>
    %183 = arith.addf %180, %182 : vector<4x40xf32>
    %184 = arith.truncf %183 : vector<4x40xf32> to vector<4x40xbf16>
    %c1632 = arith.constant 1632 : index
    %c0_102 = arith.constant 0 : index
    %185 = vector.load %arg5[%c1632, %c0_102] : memref<3712x256xbf16, #tpu.memory_space<vmem>>, vector<40x240xbf16>
    %cst_103 = arith.constant dense<0.000000e+00> : vector<4x240xf32>
    %186 = tpu.matmul %184, %185, %cst_103 {dimension_numbers = #tpu.dot_dimension_numbers<[1], [0], [0], [1], [0, 0, 1, 1], [], []>} : vector<4x40xbf16>, vector<40x240xbf16>, vector<4x240xf32> -> vector<4x240xf32>
    %c5_104 = arith.constant 5 : index
    %c0_105 = arith.constant 0 : index
    %187 = vector.load %arg7[%c5_104, %c0_105] : memref<22x256xf32, #tpu.memory_space<vmem>>, vector<1x240xf32>
    %188 = vector.broadcast %187 : vector<1x240xf32> to vector<4x240xf32>
    %189 = arith.addf %186, %188 : vector<4x240xf32>
    %cst_106 = arith.constant 3.000000e+00 : f32
    %190 = vector.broadcast %cst_106 : f32 to vector<4x240xf32>
    %191 = arith.addf %189, %190 : vector<4x240xf32>
    %cst_107 = arith.constant 0.000000e+00 : f32
    %192 = vector.broadcast %cst_107 : f32 to vector<4x240xf32>
    %193 = arith.maximumf %191, %192 : vector<4x240xf32>
    %cst_108 = arith.constant 6.000000e+00 : f32
    %194 = vector.broadcast %cst_108 : f32 to vector<4x240xf32>
    %195 = arith.minimumf %193, %194 : vector<4x240xf32>
    %cst_109 = arith.constant 0.166666672 : f32
    %196 = vector.broadcast %cst_109 : f32 to vector<4x240xf32>
    %197 = arith.mulf %195, %196 : vector<4x240xf32>
    %198 = arith.mulf %189, %197 : vector<4x240xf32>
    %c1680 = arith.constant 1680 : index
    %c0_110 = arith.constant 0 : index
    %199 = vector.load %arg5[%c1680, %c0_110] : memref<3712x256xbf16, #tpu.memory_space<vmem>>, vector<100x4xbf16>
    %200 = arith.truncf %198 : vector<4x240xf32> to vector<4x240xbf16>
    %cst_111 = arith.constant dense<0.000000e+00> : vector<100x240xf32>
    %201 = tpu.matmul %199, %200, %cst_111 {dimension_numbers = #tpu.dot_dimension_numbers<[1], [0], [0], [1], [0, 0, 1, 1], [], []>} : vector<100x4xbf16>, vector<4x240xbf16>, vector<100x240xf32> -> vector<100x240xf32>
    %c264 = arith.constant 264 : index
    %c0_112 = arith.constant 0 : index
    %202 = vector.load %arg6[%c264, %c0_112] : memref<576x256xf32, #tpu.memory_space<vmem>>, vector<100x240xf32>
    %203 = arith.mulf %201, %202 : vector<100x240xf32>
    %c1792 = arith.constant 1792 : index
    %c0_113 = arith.constant 0 : index
    %204 = vector.load %arg5[%c1792, %c0_113] : memref<3712x256xbf16, #tpu.memory_space<vmem>>, vector<4x100xbf16>
    %205 = arith.truncf %203 : vector<100x240xf32> to vector<100x240xbf16>
    %cst_114 = arith.constant dense<0.000000e+00> : vector<4x240xf32>
    %206 = tpu.matmul %204, %205, %cst_114 {dimension_numbers = #tpu.dot_dimension_numbers<[1], [0], [0], [1], [0, 0, 1, 1], [], []>} : vector<4x100xbf16>, vector<100x240xbf16>, vector<4x240xf32> -> vector<4x240xf32>
    %c6_115 = arith.constant 6 : index
    %c0_116 = arith.constant 0 : index
    %207 = vector.load %arg7[%c6_115, %c0_116] : memref<22x256xf32, #tpu.memory_space<vmem>>, vector<1x240xf32>
    %208 = vector.broadcast %207 : vector<1x240xf32> to vector<4x240xf32>
    %209 = arith.addf %206, %208 : vector<4x240xf32>
    %cst_117 = arith.constant 3.000000e+00 : f32
    %210 = vector.broadcast %cst_117 : f32 to vector<4x240xf32>
    %211 = arith.addf %209, %210 : vector<4x240xf32>
    %cst_118 = arith.constant 0.000000e+00 : f32
    %212 = vector.broadcast %cst_118 : f32 to vector<4x240xf32>
    %213 = arith.maximumf %211, %212 : vector<4x240xf32>
    %cst_119 = arith.constant 6.000000e+00 : f32
    %214 = vector.broadcast %cst_119 : f32 to vector<4x240xf32>
    %215 = arith.minimumf %213, %214 : vector<4x240xf32>
    %cst_120 = arith.constant 0.166666672 : f32
    %216 = vector.broadcast %cst_120 : f32 to vector<4x240xf32>
    %217 = arith.mulf %215, %216 : vector<4x240xf32>
    %218 = arith.mulf %209, %217 : vector<4x240xf32>
    %cst_121 = arith.constant dense<0.000000e+00> : vector<240xf32>
    %219 = vector.multi_reduction <add>, %218, %cst_121 [0] : vector<4x240xf32> to vector<240xf32>
    %220 = vector.shape_cast %219 : vector<240xf32> to vector<1x240xf32>
    %cst_122 = arith.constant 4.000000e+00 : f32
    %221 = vector.broadcast %cst_122 : f32 to vector<1x240xf32>
    %222 = arith.divf %220, %221 : vector<1x240xf32>
    %223 = arith.truncf %222 : vector<1x240xf32> to vector<1x240xbf16>
    %c1808 = arith.constant 1808 : index
    %c0_123 = arith.constant 0 : index
    %224 = vector.load %arg5[%c1808, %c0_123] : memref<3712x256xbf16, #tpu.memory_space<vmem>>, vector<240x64xbf16>
    %cst_124 = arith.constant dense<0.000000e+00> : vector<1x64xf32>
    %225 = tpu.matmul %223, %224, %cst_124 {dimension_numbers = #tpu.dot_dimension_numbers<[1], [0], [0], [1], [0, 0, 1, 1], [], []>} : vector<1x240xbf16>, vector<240x64xbf16>, vector<1x64xf32> -> vector<1x64xf32>
    %c7_125 = arith.constant 7 : index
    %c0_126 = arith.constant 0 : index
    %226 = vector.load %arg7[%c7_125, %c0_126] : memref<22x256xf32, #tpu.memory_space<vmem>>, vector<1x64xf32>
    %227 = arith.addf %225, %226 : vector<1x64xf32>
    %cst_127 = arith.constant 0.000000e+00 : f32
    %228 = vector.broadcast %cst_127 : f32 to vector<1x64xf32>
    %229 = arith.maximumf %227, %228 : vector<1x64xf32>
    %230 = arith.truncf %229 : vector<1x64xf32> to vector<1x64xbf16>
    %c2048 = arith.constant 2048 : index
    %c0_128 = arith.constant 0 : index
    %231 = vector.load %arg5[%c2048, %c0_128] : memref<3712x256xbf16, #tpu.memory_space<vmem>>, vector<64x240xbf16>
    %cst_129 = arith.constant dense<0.000000e+00> : vector<1x240xf32>
    %232 = tpu.matmul %230, %231, %cst_129 {dimension_numbers = #tpu.dot_dimension_numbers<[1], [0], [0], [1], [0, 0, 1, 1], [], []>} : vector<1x64xbf16>, vector<64x240xbf16>, vector<1x240xf32> -> vector<1x240xf32>
    %c8_130 = arith.constant 8 : index
    %c0_131 = arith.constant 0 : index
    %233 = vector.load %arg7[%c8_130, %c0_131] : memref<22x256xf32, #tpu.memory_space<vmem>>, vector<1x240xf32>
    %234 = arith.addf %232, %233 : vector<1x240xf32>
    %cst_132 = arith.constant 3.000000e+00 : f32
    %235 = vector.broadcast %cst_132 : f32 to vector<1x240xf32>
    %236 = arith.addf %234, %235 : vector<1x240xf32>
    %cst_133 = arith.constant 0.000000e+00 : f32
    %237 = vector.broadcast %cst_133 : f32 to vector<1x240xf32>
    %238 = arith.maximumf %236, %237 : vector<1x240xf32>
    %cst_134 = arith.constant 6.000000e+00 : f32
    %239 = vector.broadcast %cst_134 : f32 to vector<1x240xf32>
    %240 = arith.minimumf %238, %239 : vector<1x240xf32>
    %cst_135 = arith.constant 0.166666672 : f32
    %241 = vector.broadcast %cst_135 : f32 to vector<1x240xf32>
    %242 = arith.mulf %240, %241 : vector<1x240xf32>
    %243 = vector.broadcast %242 : vector<1x240xf32> to vector<4x240xf32>
    %244 = arith.mulf %218, %243 : vector<4x240xf32>
    %245 = arith.truncf %244 : vector<4x240xf32> to vector<4x240xbf16>
    %c2112 = arith.constant 2112 : index
    %c0_136 = arith.constant 0 : index
    %246 = vector.load %arg5[%c2112, %c0_136] : memref<3712x256xbf16, #tpu.memory_space<vmem>>, vector<240x40xbf16>
    %cst_137 = arith.constant dense<0.000000e+00> : vector<4x40xf32>
    %247 = tpu.matmul %245, %246, %cst_137 {dimension_numbers = #tpu.dot_dimension_numbers<[1], [0], [0], [1], [0, 0, 1, 1], [], []>} : vector<4x240xbf16>, vector<240x40xbf16>, vector<4x40xf32> -> vector<4x40xf32>
    %c9_138 = arith.constant 9 : index
    %c0_139 = arith.constant 0 : index
    %248 = vector.load %arg7[%c9_138, %c0_139] : memref<22x256xf32, #tpu.memory_space<vmem>>, vector<1x40xf32>
    %249 = vector.broadcast %248 : vector<1x40xf32> to vector<4x40xf32>
    %250 = arith.addf %247, %249 : vector<4x40xf32>
    %251 = arith.addf %250, %183 : vector<4x40xf32>
    %252 = arith.truncf %251 : vector<4x40xf32> to vector<4x40xbf16>
    %c2352 = arith.constant 2352 : index
    %c0_140 = arith.constant 0 : index
    %253 = vector.load %arg5[%c2352, %c0_140] : memref<3712x256xbf16, #tpu.memory_space<vmem>>, vector<40x240xbf16>
    %cst_141 = arith.constant dense<0.000000e+00> : vector<4x240xf32>
    %254 = tpu.matmul %252, %253, %cst_141 {dimension_numbers = #tpu.dot_dimension_numbers<[1], [0], [0], [1], [0, 0, 1, 1], [], []>} : vector<4x40xbf16>, vector<40x240xbf16>, vector<4x240xf32> -> vector<4x240xf32>
    %c10_142 = arith.constant 10 : index
    %c0_143 = arith.constant 0 : index
    %255 = vector.load %arg7[%c10_142, %c0_143] : memref<22x256xf32, #tpu.memory_space<vmem>>, vector<1x240xf32>
    %256 = vector.broadcast %255 : vector<1x240xf32> to vector<4x240xf32>
    %257 = arith.addf %254, %256 : vector<4x240xf32>
    %cst_144 = arith.constant 3.000000e+00 : f32
    %258 = vector.broadcast %cst_144 : f32 to vector<4x240xf32>
    %259 = arith.addf %257, %258 : vector<4x240xf32>
    %cst_145 = arith.constant 0.000000e+00 : f32
    %260 = vector.broadcast %cst_145 : f32 to vector<4x240xf32>
    %261 = arith.maximumf %259, %260 : vector<4x240xf32>
    %cst_146 = arith.constant 6.000000e+00 : f32
    %262 = vector.broadcast %cst_146 : f32 to vector<4x240xf32>
    %263 = arith.minimumf %261, %262 : vector<4x240xf32>
    %cst_147 = arith.constant 0.166666672 : f32
    %264 = vector.broadcast %cst_147 : f32 to vector<4x240xf32>
    %265 = arith.mulf %263, %264 : vector<4x240xf32>
    %266 = arith.mulf %257, %265 : vector<4x240xf32>
    %c2400 = arith.constant 2400 : index
    %c0_148 = arith.constant 0 : index
    %267 = vector.load %arg5[%c2400, %c0_148] : memref<3712x256xbf16, #tpu.memory_space<vmem>>, vector<100x4xbf16>
    %268 = arith.truncf %266 : vector<4x240xf32> to vector<4x240xbf16>
    %cst_149 = arith.constant dense<0.000000e+00> : vector<100x240xf32>
    %269 = tpu.matmul %267, %268, %cst_149 {dimension_numbers = #tpu.dot_dimension_numbers<[1], [0], [0], [1], [0, 0, 1, 1], [], []>} : vector<100x4xbf16>, vector<4x240xbf16>, vector<100x240xf32> -> vector<100x240xf32>
    %c368 = arith.constant 368 : index
    %c0_150 = arith.constant 0 : index
    %270 = vector.load %arg6[%c368, %c0_150] : memref<576x256xf32, #tpu.memory_space<vmem>>, vector<100x240xf32>
    %271 = arith.mulf %269, %270 : vector<100x240xf32>
    %c2512 = arith.constant 2512 : index
    %c0_151 = arith.constant 0 : index
    %272 = vector.load %arg5[%c2512, %c0_151] : memref<3712x256xbf16, #tpu.memory_space<vmem>>, vector<4x100xbf16>
    %273 = arith.truncf %271 : vector<100x240xf32> to vector<100x240xbf16>
    %cst_152 = arith.constant dense<0.000000e+00> : vector<4x240xf32>
    %274 = tpu.matmul %272, %273, %cst_152 {dimension_numbers = #tpu.dot_dimension_numbers<[1], [0], [0], [1], [0, 0, 1, 1], [], []>} : vector<4x100xbf16>, vector<100x240xbf16>, vector<4x240xf32> -> vector<4x240xf32>
    %c11 = arith.constant 11 : index
    %c0_153 = arith.constant 0 : index
    %275 = vector.load %arg7[%c11, %c0_153] : memref<22x256xf32, #tpu.memory_space<vmem>>, vector<1x240xf32>
    %276 = vector.broadcast %275 : vector<1x240xf32> to vector<4x240xf32>
    %277 = arith.addf %274, %276 : vector<4x240xf32>
    %cst_154 = arith.constant 3.000000e+00 : f32
    %278 = vector.broadcast %cst_154 : f32 to vector<4x240xf32>
    %279 = arith.addf %277, %278 : vector<4x240xf32>
    %cst_155 = arith.constant 0.000000e+00 : f32
    %280 = vector.broadcast %cst_155 : f32 to vector<4x240xf32>
    %281 = arith.maximumf %279, %280 : vector<4x240xf32>
    %cst_156 = arith.constant 6.000000e+00 : f32
    %282 = vector.broadcast %cst_156 : f32 to vector<4x240xf32>
    %283 = arith.minimumf %281, %282 : vector<4x240xf32>
    %cst_157 = arith.constant 0.166666672 : f32
    %284 = vector.broadcast %cst_157 : f32 to vector<4x240xf32>
    %285 = arith.mulf %283, %284 : vector<4x240xf32>
    %286 = arith.mulf %277, %285 : vector<4x240xf32>
    %cst_158 = arith.constant dense<0.000000e+00> : vector<240xf32>
    %287 = vector.multi_reduction <add>, %286, %cst_158 [0] : vector<4x240xf32> to vector<240xf32>
    %288 = vector.shape_cast %287 : vector<240xf32> to vector<1x240xf32>
    %cst_159 = arith.constant 4.000000e+00 : f32
    %289 = vector.broadcast %cst_159 : f32 to vector<1x240xf32>
    %290 = arith.divf %288, %289 : vector<1x240xf32>
    %291 = arith.truncf %290 : vector<1x240xf32> to vector<1x240xbf16>
    %c2528 = arith.constant 2528 : index
    %c0_160 = arith.constant 0 : index
    %292 = vector.load %arg5[%c2528, %c0_160] : memref<3712x256xbf16, #tpu.memory_space<vmem>>, vector<240x64xbf16>
    %cst_161 = arith.constant dense<0.000000e+00> : vector<1x64xf32>
    %293 = tpu.matmul %291, %292, %cst_161 {dimension_numbers = #tpu.dot_dimension_numbers<[1], [0], [0], [1], [0, 0, 1, 1], [], []>} : vector<1x240xbf16>, vector<240x64xbf16>, vector<1x64xf32> -> vector<1x64xf32>
    %c12 = arith.constant 12 : index
    %c0_162 = arith.constant 0 : index
    %294 = vector.load %arg7[%c12, %c0_162] : memref<22x256xf32, #tpu.memory_space<vmem>>, vector<1x64xf32>
    %295 = arith.addf %293, %294 : vector<1x64xf32>
    %cst_163 = arith.constant 0.000000e+00 : f32
    %296 = vector.broadcast %cst_163 : f32 to vector<1x64xf32>
    %297 = arith.maximumf %295, %296 : vector<1x64xf32>
    %298 = arith.truncf %297 : vector<1x64xf32> to vector<1x64xbf16>
    %c2768 = arith.constant 2768 : index
    %c0_164 = arith.constant 0 : index
    %299 = vector.load %arg5[%c2768, %c0_164] : memref<3712x256xbf16, #tpu.memory_space<vmem>>, vector<64x240xbf16>
    %cst_165 = arith.constant dense<0.000000e+00> : vector<1x240xf32>
    %300 = tpu.matmul %298, %299, %cst_165 {dimension_numbers = #tpu.dot_dimension_numbers<[1], [0], [0], [1], [0, 0, 1, 1], [], []>} : vector<1x64xbf16>, vector<64x240xbf16>, vector<1x240xf32> -> vector<1x240xf32>
    %c13 = arith.constant 13 : index
    %c0_166 = arith.constant 0 : index
    %301 = vector.load %arg7[%c13, %c0_166] : memref<22x256xf32, #tpu.memory_space<vmem>>, vector<1x240xf32>
    %302 = arith.addf %300, %301 : vector<1x240xf32>
    %cst_167 = arith.constant 3.000000e+00 : f32
    %303 = vector.broadcast %cst_167 : f32 to vector<1x240xf32>
    %304 = arith.addf %302, %303 : vector<1x240xf32>
    %cst_168 = arith.constant 0.000000e+00 : f32
    %305 = vector.broadcast %cst_168 : f32 to vector<1x240xf32>
    %306 = arith.maximumf %304, %305 : vector<1x240xf32>
    %cst_169 = arith.constant 6.000000e+00 : f32
    %307 = vector.broadcast %cst_169 : f32 to vector<1x240xf32>
    %308 = arith.minimumf %306, %307 : vector<1x240xf32>
    %cst_170 = arith.constant 0.166666672 : f32
    %309 = vector.broadcast %cst_170 : f32 to vector<1x240xf32>
    %310 = arith.mulf %308, %309 : vector<1x240xf32>
    %311 = vector.broadcast %310 : vector<1x240xf32> to vector<4x240xf32>
    %312 = arith.mulf %286, %311 : vector<4x240xf32>
    %313 = arith.truncf %312 : vector<4x240xf32> to vector<4x240xbf16>
    %c2832 = arith.constant 2832 : index
    %c0_171 = arith.constant 0 : index
    %314 = vector.load %arg5[%c2832, %c0_171] : memref<3712x256xbf16, #tpu.memory_space<vmem>>, vector<240x40xbf16>
    %cst_172 = arith.constant dense<0.000000e+00> : vector<4x40xf32>
    %315 = tpu.matmul %313, %314, %cst_172 {dimension_numbers = #tpu.dot_dimension_numbers<[1], [0], [0], [1], [0, 0, 1, 1], [], []>} : vector<4x240xbf16>, vector<240x40xbf16>, vector<4x40xf32> -> vector<4x40xf32>
    %c14 = arith.constant 14 : index
    %c0_173 = arith.constant 0 : index
    %316 = vector.load %arg7[%c14, %c0_173] : memref<22x256xf32, #tpu.memory_space<vmem>>, vector<1x40xf32>
    %317 = vector.broadcast %316 : vector<1x40xf32> to vector<4x40xf32>
    %318 = arith.addf %315, %317 : vector<4x40xf32>
    %319 = arith.addf %318, %251 : vector<4x40xf32>
    %320 = arith.truncf %319 : vector<4x40xf32> to vector<4x40xbf16>
    %c3072 = arith.constant 3072 : index
    %c0_174 = arith.constant 0 : index
    %321 = vector.load %arg5[%c3072, %c0_174] : memref<3712x256xbf16, #tpu.memory_space<vmem>>, vector<40x120xbf16>
    %cst_175 = arith.constant dense<0.000000e+00> : vector<4x120xf32>
    %322 = tpu.matmul %320, %321, %cst_175 {dimension_numbers = #tpu.dot_dimension_numbers<[1], [0], [0], [1], [0, 0, 1, 1], [], []>} : vector<4x40xbf16>, vector<40x120xbf16>, vector<4x120xf32> -> vector<4x120xf32>
    %c15 = arith.constant 15 : index
    %c0_176 = arith.constant 0 : index
    %323 = vector.load %arg7[%c15, %c0_176] : memref<22x256xf32, #tpu.memory_space<vmem>>, vector<1x120xf32>
    %324 = vector.broadcast %323 : vector<1x120xf32> to vector<4x120xf32>
    %325 = arith.addf %322, %324 : vector<4x120xf32>
    %cst_177 = arith.constant 3.000000e+00 : f32
    %326 = vector.broadcast %cst_177 : f32 to vector<4x120xf32>
    %327 = arith.addf %325, %326 : vector<4x120xf32>
    %cst_178 = arith.constant 0.000000e+00 : f32
    %328 = vector.broadcast %cst_178 : f32 to vector<4x120xf32>
    %329 = arith.maximumf %327, %328 : vector<4x120xf32>
    %cst_179 = arith.constant 6.000000e+00 : f32
    %330 = vector.broadcast %cst_179 : f32 to vector<4x120xf32>
    %331 = arith.minimumf %329, %330 : vector<4x120xf32>
    %cst_180 = arith.constant 0.166666672 : f32
    %332 = vector.broadcast %cst_180 : f32 to vector<4x120xf32>
    %333 = arith.mulf %331, %332 : vector<4x120xf32>
    %334 = arith.mulf %325, %333 : vector<4x120xf32>
    %c3120 = arith.constant 3120 : index
    %c0_181 = arith.constant 0 : index
    %335 = vector.load %arg5[%c3120, %c0_181] : memref<3712x256xbf16, #tpu.memory_space<vmem>>, vector<100x4xbf16>
    %336 = arith.truncf %334 : vector<4x120xf32> to vector<4x120xbf16>
    %cst_182 = arith.constant dense<0.000000e+00> : vector<100x120xf32>
    %337 = tpu.matmul %335, %336, %cst_182 {dimension_numbers = #tpu.dot_dimension_numbers<[1], [0], [0], [1], [0, 0, 1, 1], [], []>} : vector<100x4xbf16>, vector<4x120xbf16>, vector<100x120xf32> -> vector<100x120xf32>
    %c472 = arith.constant 472 : index
    %c0_183 = arith.constant 0 : index
    %338 = vector.load %arg6[%c472, %c0_183] : memref<576x256xf32, #tpu.memory_space<vmem>>, vector<100x120xf32>
    %339 = arith.mulf %337, %338 : vector<100x120xf32>
    %c3232 = arith.constant 3232 : index
    %c0_184 = arith.constant 0 : index
    %340 = vector.load %arg5[%c3232, %c0_184] : memref<3712x256xbf16, #tpu.memory_space<vmem>>, vector<4x100xbf16>
    %341 = arith.truncf %339 : vector<100x120xf32> to vector<100x120xbf16>
    %cst_185 = arith.constant dense<0.000000e+00> : vector<4x120xf32>
    %342 = tpu.matmul %340, %341, %cst_185 {dimension_numbers = #tpu.dot_dimension_numbers<[1], [0], [0], [1], [0, 0, 1, 1], [], []>} : vector<4x100xbf16>, vector<100x120xbf16>, vector<4x120xf32> -> vector<4x120xf32>
    %c16_186 = arith.constant 16 : index
    %c0_187 = arith.constant 0 : index
    %343 = vector.load %arg7[%c16_186, %c0_187] : memref<22x256xf32, #tpu.memory_space<vmem>>, vector<1x120xf32>
    %344 = vector.broadcast %343 : vector<1x120xf32> to vector<4x120xf32>
    %345 = arith.addf %342, %344 : vector<4x120xf32>
    %cst_188 = arith.constant 3.000000e+00 : f32
    %346 = vector.broadcast %cst_188 : f32 to vector<4x120xf32>
    %347 = arith.addf %345, %346 : vector<4x120xf32>
    %cst_189 = arith.constant 0.000000e+00 : f32
    %348 = vector.broadcast %cst_189 : f32 to vector<4x120xf32>
    %349 = arith.maximumf %347, %348 : vector<4x120xf32>
    %cst_190 = arith.constant 6.000000e+00 : f32
    %350 = vector.broadcast %cst_190 : f32 to vector<4x120xf32>
    %351 = arith.minimumf %349, %350 : vector<4x120xf32>
    %cst_191 = arith.constant 0.166666672 : f32
    %352 = vector.broadcast %cst_191 : f32 to vector<4x120xf32>
    %353 = arith.mulf %351, %352 : vector<4x120xf32>
    %354 = arith.mulf %345, %353 : vector<4x120xf32>
    %cst_192 = arith.constant dense<0.000000e+00> : vector<120xf32>
    %355 = vector.multi_reduction <add>, %354, %cst_192 [0] : vector<4x120xf32> to vector<120xf32>
    %356 = vector.shape_cast %355 : vector<120xf32> to vector<1x120xf32>
    %cst_193 = arith.constant 4.000000e+00 : f32
    %357 = vector.broadcast %cst_193 : f32 to vector<1x120xf32>
    %358 = arith.divf %356, %357 : vector<1x120xf32>
    %359 = arith.truncf %358 : vector<1x120xf32> to vector<1x120xbf16>
    %c3248 = arith.constant 3248 : index
    %c0_194 = arith.constant 0 : index
    %360 = vector.load %arg5[%c3248, %c0_194] : memref<3712x256xbf16, #tpu.memory_space<vmem>>, vector<120x32xbf16>
    %cst_195 = arith.constant dense<0.000000e+00> : vector<1x32xf32>
    %361 = tpu.matmul %359, %360, %cst_195 {dimension_numbers = #tpu.dot_dimension_numbers<[1], [0], [0], [1], [0, 0, 1, 1], [], []>} : vector<1x120xbf16>, vector<120x32xbf16>, vector<1x32xf32> -> vector<1x32xf32>
    %c17 = arith.constant 17 : index
    %c0_196 = arith.constant 0 : index
    %362 = vector.load %arg7[%c17, %c0_196] : memref<22x256xf32, #tpu.memory_space<vmem>>, vector<1x32xf32>
    %363 = arith.addf %361, %362 : vector<1x32xf32>
    %cst_197 = arith.constant 0.000000e+00 : f32
    %364 = vector.broadcast %cst_197 : f32 to vector<1x32xf32>
    %365 = arith.maximumf %363, %364 : vector<1x32xf32>
    %366 = arith.truncf %365 : vector<1x32xf32> to vector<1x32xbf16>
    %c3376 = arith.constant 3376 : index
    %c0_198 = arith.constant 0 : index
    %367 = vector.load %arg5[%c3376, %c0_198] : memref<3712x256xbf16, #tpu.memory_space<vmem>>, vector<32x120xbf16>
    %cst_199 = arith.constant dense<0.000000e+00> : vector<1x120xf32>
    %368 = tpu.matmul %366, %367, %cst_199 {dimension_numbers = #tpu.dot_dimension_numbers<[1], [0], [0], [1], [0, 0, 1, 1], [], []>} : vector<1x32xbf16>, vector<32x120xbf16>, vector<1x120xf32> -> vector<1x120xf32>
    %c18 = arith.constant 18 : index
    %c0_200 = arith.constant 0 : index
    %369 = vector.load %arg7[%c18, %c0_200] : memref<22x256xf32, #tpu.memory_space<vmem>>, vector<1x120xf32>
    %370 = arith.addf %368, %369 : vector<1x120xf32>
    %cst_201 = arith.constant 3.000000e+00 : f32
    %371 = vector.broadcast %cst_201 : f32 to vector<1x120xf32>
    %372 = arith.addf %370, %371 : vector<1x120xf32>
    %cst_202 = arith.constant 0.000000e+00 : f32
    %373 = vector.broadcast %cst_202 : f32 to vector<1x120xf32>
    %374 = arith.maximumf %372, %373 : vector<1x120xf32>
    %cst_203 = arith.constant 6.000000e+00 : f32
    %375 = vector.broadcast %cst_203 : f32 to vector<1x120xf32>
    %376 = arith.minimumf %374, %375 : vector<1x120xf32>
    %cst_204 = arith.constant 0.166666672 : f32
    %377 = vector.broadcast %cst_204 : f32 to vector<1x120xf32>
    %378 = arith.mulf %376, %377 : vector<1x120xf32>
    %379 = vector.broadcast %378 : vector<1x120xf32> to vector<4x120xf32>
    %380 = arith.mulf %354, %379 : vector<4x120xf32>
    %381 = arith.truncf %380 : vector<4x120xf32> to vector<4x120xbf16>
    %c3408 = arith.constant 3408 : index
    %c0_205 = arith.constant 0 : index
    %382 = vector.load %arg5[%c3408, %c0_205] : memref<3712x256xbf16, #tpu.memory_space<vmem>>, vector<120x48xbf16>
    %cst_206 = arith.constant dense<0.000000e+00> : vector<4x48xf32>
    %383 = tpu.matmul %381, %382, %cst_206 {dimension_numbers = #tpu.dot_dimension_numbers<[1], [0], [0], [1], [0, 0, 1, 1], [], []>} : vector<4x120xbf16>, vector<120x48xbf16>, vector<4x48xf32> -> vector<4x48xf32>
    %c19 = arith.constant 19 : index
    %c0_207 = arith.constant 0 : index
    %384 = vector.load %arg7[%c19, %c0_207] : memref<22x256xf32, #tpu.memory_space<vmem>>, vector<1x48xf32>
    %385 = vector.broadcast %384 : vector<1x48xf32> to vector<4x48xf32>
    %386 = arith.addf %383, %385 : vector<4x48xf32>
    %cst_208 = arith.constant dense<0.000000e+00> : vector<48xf32>
    %387 = vector.multi_reduction <add>, %386, %cst_208 [0] : vector<4x48xf32> to vector<48xf32>
    %388 = vector.shape_cast %387 : vector<48xf32> to vector<1x48xf32>
    %cst_209 = arith.constant 4.000000e+00 : f32
    %389 = vector.broadcast %cst_209 : f32 to vector<1x48xf32>
    %390 = arith.divf %388, %389 : vector<1x48xf32>
    %391 = arith.truncf %390 : vector<1x48xf32> to vector<1x48xbf16>
    %c3536 = arith.constant 3536 : index
    %c0_210 = arith.constant 0 : index
    %392 = vector.load %arg5[%c3536, %c0_210] : memref<3712x256xbf16, #tpu.memory_space<vmem>>, vector<48x128xbf16>
    %cst_211 = arith.constant dense<0.000000e+00> : vector<1x128xf32>
    %393 = tpu.matmul %391, %392, %cst_211 {dimension_numbers = #tpu.dot_dimension_numbers<[1], [0], [0], [1], [0, 0, 1, 1], [], []>} : vector<1x48xbf16>, vector<48x128xbf16>, vector<1x128xf32> -> vector<1x128xf32>
    %c20 = arith.constant 20 : index
    %c0_212 = arith.constant 0 : index
    %394 = vector.load %arg7[%c20, %c0_212] : memref<22x256xf32, #tpu.memory_space<vmem>>, vector<1x128xf32>
    %395 = arith.addf %393, %394 : vector<1x128xf32>
    %cst_213 = arith.constant 0.000000e+00 : f32
    %396 = vector.broadcast %cst_213 : f32 to vector<1x128xf32>
    %397 = arith.maximumf %395, %396 : vector<1x128xf32>
    %398 = arith.truncf %397 : vector<1x128xf32> to vector<1x128xbf16>
    %c3584 = arith.constant 3584 : index
    %c0_214 = arith.constant 0 : index
    %399 = vector.load %arg5[%c3584, %c0_214] : memref<3712x256xbf16, #tpu.memory_space<vmem>>, vector<128x11xbf16>
    %cst_215 = arith.constant dense<0.000000e+00> : vector<1x11xf32>
    %400 = tpu.matmul %398, %399, %cst_215 {dimension_numbers = #tpu.dot_dimension_numbers<[1], [0], [0], [1], [0, 0, 1, 1], [], []>} : vector<1x128xbf16>, vector<128x11xbf16>, vector<1x11xf32> -> vector<1x11xf32>
    %c21 = arith.constant 21 : index
    %c0_216 = arith.constant 0 : index
    %401 = vector.load %arg7[%c21, %c0_216] : memref<22x256xf32, #tpu.memory_space<vmem>>, vector<1x11xf32>
    %402 = arith.addf %400, %401 : vector<1x11xf32>
    %403 = vector.shape_cast %402 : vector<1x11xf32> to vector<1x1x11xf32>
    %c0_217 = arith.constant 0 : index
    %c0_218 = arith.constant 0 : index
    %c0_219 = arith.constant 0 : index
    %404 = vector.load %arg8[%c0_217, %c0_218, %c0_219] : memref<1x1x11xf32, #tpu.memory_space<vmem>>, vector<1x1x11xf32>
    tpu.vector_store %arg8[%c0_217, %c0_218, %c0_219], %403 {strides = array<i32>} : memref<1x1x11xf32, #tpu.memory_space<vmem>>, vector<1x1x11xf32>,
    return
  }
  func.func @transform_0(%arg0: i32) -> (i32, i32, i32) {
    %c0_i32 = arith.constant 0 : i32
    %c0_i32_0 = arith.constant 0 : i32
    %c0_i32_1 = arith.constant 0 : i32
    return %arg0, %c0_i32, %c0_i32_0 : i32, i32, i32
  }
  func.func @transform_1(%arg0: i32) -> (i32, i32) {
    %c0_i32 = arith.constant 0 : i32
    %c0_i32_0 = arith.constant 0 : i32
    %c0_i32_1 = arith.constant 0 : i32
    return %c0_i32, %c0_i32_0 : i32, i32
  }
  func.func @transform_2(%arg0: i32) -> (i32, i32) {
    %c0_i32 = arith.constant 0 : i32
    %c0_i32_0 = arith.constant 0 : i32
    %c0_i32_1 = arith.constant 0 : i32
    return %c0_i32, %c0_i32_0 : i32, i32
  }
  func.func @transform_3(%arg0: i32) -> (i32, i32) {
    %c0_i32 = arith.constant 0 : i32
    %c0_i32_0 = arith.constant 0 : i32
    %c0_i32_1 = arith.constant 0 : i32
    return %c0_i32, %c0_i32_0 : i32, i32
  }
  func.func @transform_4(%arg0: i32) -> (i32, i32) {
    %c0_i32 = arith.constant 0 : i32
    %c0_i32_0 = arith.constant 0 : i32
    %c0_i32_1 = arith.constant 0 : i32
    return %c0_i32, %c0_i32_0 : i32, i32
  }
  func.func @transform_5(%arg0: i32) -> (i32, i32) {
    %c0_i32 = arith.constant 0 : i32
    %c0_i32_0 = arith.constant 0 : i32
    %c0_i32_1 = arith.constant 0 : i32
    return %c0_i32, %c0_i32_0 : i32, i32
  }
  func.func @transform_6(%arg0: i32) -> (i32, i32) {
    %c0_i32 = arith.constant 0 : i32
    %c0_i32_0 = arith.constant 0 : i32
    %c0_i32_1 = arith.constant 0 : i32
    return %c0_i32, %c0_i32_0 : i32, i32
  }
  func.func @transform_7(%arg0: i32) -> (i32, i32, i32) {
    %c0_i32 = arith.constant 0 : i32
    %c0_i32_0 = arith.constant 0 : i32
    %c0_i32_1 = arith.constant 0 : i32
    return %arg0, %c0_i32, %c0_i32_0 : i32, i32, i32
  }
}

</mosaic_0001>

<bundles_post_ra>
// kernel: forward.1
= control target key start
LH: loop header
LB: loop body
LE: loop exit
PB: predicated region body
PF: predicated region fallthrough
CT: control target
= control target key end

     0   :  { %s7779_s24 = smov 0   ;;  %s9828_s0 = inlined_call_operand.vmem [shape: bf16[2,9,256], index: 0, kind: input, shape index: {}]   ;;  %s9829_s1 = inlined_call_operand.vmem [shape: bf16[256,576], index: 1, kind: input, shape index: {}]   ;;  %s9830_s2 = inlined_call_operand.vmem [shape: f32[16,576], index: 2, kind: input, shape index: {}]   ;;  %s9831_s3 = inlined_call_operand.vmem [shape: f32[128,16], index: 3, kind: input, shape index: {}]   ;;  %s9832_s4 = inlined_call_operand.vmem [shape: bf16[3712,256], index: 4, kind: input, shape index: {}]   ;;  %s9833_s5 = inlined_call_operand.vmem [shape: f32[576,256], index: 5, kind: input, shape index: {}]   ;;  %s9834_s6 = inlined_call_operand.vmem [shape: f32[22,256], index: 6, kind: input, shape index: {}]   ;;  %s9835_s7 = inlined_call_operand.vmem [shape: f32[2,1,11], index: 7, kind: output, shape index: {}]  }
   0x1 LB: > { %s6325_s25 = sadd.s32 4294967295, %s7723_s24   ;;  %p6329_p0 = scmp.ge.s32.totalorder %s7723_s24, 1  ;;  %s7723_s24 = sphi %s7779_s24, %s17_s24  }
   0x2   : > { %p237_p1 = scmp.lt.s32.totalorder %s7723_s24, 3 }
   0x4   : > { %p238_p2 = pnand %p6329_p0, %p237_p1 }
   0x5   : > { %p267_p3 = scmp.lt.s32.totalorder (!%p238_p2), %s6325_s25, 1  ;;  %vm309_vm0 = vcmask (!%p238_p2), 1043456   ;;  %v280_v0 = vld [vmem:[%s9831_s3] sm:$0xff] (!%p238_p2)  ;;  %v7725_v1 = vmov (!%p238_p2), 0   ;;  %vm310_vm1 = vcmask (!%p238_p2), 1044480   ;;  %v7726_v2 = vmov (!%p238_p2), 65535  }
   0x6   : > { %241 = sbr.rel (%p238_p2) target bundleno = 9721 (0x25f9), region = 48  ;;  %351 = vmatprep.mubr.bf16.mxu0 (!%p238_p2), %v7725_v1  ;;  %7317 = vset.pattern.permute.xlu0 (!%p238_p2), %v7725_v1  ;;  %v311_v3 = vsel (!%p238_p2), %vm309_vm0, 4294967295, %v7726_v2  ;;  %v281_v4 = vld [vmem:[%s9831_s3 + $0x8] sm:$0xff] (!%p238_p2)  ;;  %v7338_v5 = vld [vmem:[%s9829_s1 + $0x4] ss:$20 sps:$4 sm:$0xff] (!%p238_p2)   ;;  %vm305_vm2 = vcmask (!%p238_p2), 72704  }
   0x7   : > { %284 = vperm.xlu0 (!%p238_p2), %7317, %v280_v0   ;;  %v7340_v6 = vld [vmem:[%s9829_s1] ss:$20 sps:$4 sm:$0xff] (!%p238_p2)   ;;  %v312_v7 = vsel (!%p238_p2), %vm310_vm1, %v311_v3, 0  ;;  %906 = vmatprep.subr.bf16.mxu1 (!%p238_p2), %v7338_v5  ;;  %v7346_v13 = vld [vmem:[%s9829_s1 + $0x28] ss:$20 sps:$4 sm:$0xff] (!%p238_p2)   ;;  %vm7729_vm3 = vmmov (!%p238_p2), 0  }
   0x8   : > { %907 = vmatpush1.bf16.msra.mxu1 (!%p238_p2), %v7340_v6  ;;  %v7344_v10 = vld [vmem:[%s9829_s1 + $0x2c] ss:$20 sps:$4 sm:$0xff] (!%p238_p2)   ;;  %v7350_v16 = vld [vmem:[%s9829_s1 + $0x54] ss:$20 sps:$4 sm:$0xff] (!%p238_p2)   ;;  %v7352_v17 = vld [vmem:[%s9829_s1 + $0x50] ss:$20 sps:$4 sm:$0xff] (!%p238_p2)  }
   0x9   : > { %v7343_v12 = vld [vmem:[%s9829_s1 + $0xc] ss:$20 sps:$4 sm:$0xff] (!%p238_p2)   ;;  %908 = vmatprep.subr.bf16.mxu1 (!%p238_p2), %v7344_v10  ;;  %v7341_v18 = vld [vmem:[%s9829_s1 + $0x8] ss:$20 sps:$4 sm:$0xff] (!%p238_p2)   ;;  %v7347_v22 = vld [vmem:[%s9829_s1 + $0x30] ss:$20 sps:$4 sm:$0xff] (!%p238_p2)  }
   0xa   : > { %v7337_v15 = vld [vmem:[%s9832_s4] ss:$8 sps:$4 sm:$0xff] (!%p238_p2)   ;;  %v7356_v20 = vld [vmem:[%s9829_s1 + $0x7c] ss:$20 sps:$4 sm:$0xff] (!%p238_p2)   ;;  %v7358_v21 = vld [vmem:[%s9829_s1 + $0x78] ss:$20 sps:$4 sm:$0xff] (!%p238_p2)  }
   0xb   : > { %289 = vperm.xlu0 (!%p238_p2), %7317, %v281_v4   ;;  %v7349_v19 = vld [vmem:[%s9829_s1 + $0x34] ss:$20 sps:$4 sm:$0xff] (!%p238_p2)   ;;  %v7362_v23 = vld [vmem:[%s9829_s1 + $0xa4] ss:$20 sps:$4 sm:$0xff] (!%p238_p2)   ;;  %v7355_v24 = vld [vmem:[%s9829_s1 + $0x5c] ss:$20 sps:$4 sm:$0xff] (!%p238_p2)  }
   0xc   : > { %909 = vmatpush1.bf16.msra.mxu1 (!%p238_p2), %v7346_v13  ;;  %v7364_v25 = vld [vmem:[%s9829_s1 + $0xa0] ss:$20 sps:$4 sm:$0xff] (!%p238_p2)   ;;  %v7353_v26 = vld [vmem:[%s9829_s1 + $0x58] ss:$20 sps:$4 sm:$0xff] (!%p238_p2)   ;;  %v7370_v29 = vld [vmem:[%s9829_s1 + $0xc8] ss:$20 sps:$4 sm:$0xff] (!%p238_p2)  }
   0xd   : > { %s9837_s25 = smov (!%p267_p3, %s6325_s25), 1  ;;  %910 = vmatprep.subr.bf16.mxu1 %v7350_v16  ;;  %v7368_v27 = vld [vmem:[%s9829_s1 + $0xcc] ss:$20 sps:$4 sm:$0xff]   ;;  %v7361_v28 = vld [vmem:[%s9829_s1 + $0x84] ss:$20 sps:$4 sm:$0xff]   ;;  %vm1344_vm4 = vcmask 523264  }
   0xe   : > { %s6765_s11 = sshll.u32 %s9837_s25, 4  ;;  %v7359_v30 = vld [vmem:[%s9829_s1 + $0x80] ss:$20 sps:$4 sm:$0xff]   ;;  %v7376_v33 = vld [vmem:[%s9829_s1 + $0xf0] ss:$20 sps:$4 sm:$0xff]   ;;  %s7730_s19 = smov 126  }
   0xf   : > { %s271_s14 = scalar_lea.vmem %s9828_s0, %s6765_s11  ;;  %v7374_v31 = vld [vmem:[%s9829_s1 + $0xf4] ss:$20 sps:$4 sm:$0xff]   ;;  %v7367_v32 = vld [vmem:[%s9829_s1 + $0xac] ss:$20 sps:$4 sm:$0xff]   ;;  %v7380_v35 = vld [vmem:[%s9829_s1 + $0x11c] ss:$20 sps:$4 sm:$0xff]   ;;  %s274_s18 = scalar_lea.vmem %s9835_s7, %s9837_s25 }
  0x10   : > { %v7334_v8 = vld [vmem:[%s271_s14 + $0x4] ss:$8 sps:$4 sm:$0x1f]   ;;  %v7336_v9 = vld [vmem:[%s271_s14] ss:$8 sps:$4 sm:$0x1f]   ;;  %911 = vmatpush1.bf16.msra.mxu1 %v7352_v17 }
  0x11   : > { %v317_v11 = vand.u32 %v7334_v8, %v312_v7  ;;  %v314_v14 = vand.u32 %v7336_v9, %v312_v7  ;;  %912 = vmatprep.subr.bf16.mxu1 %v7356_v20  ;;  %v7365_v34 = vld [vmem:[%s9829_s1 + $0xa8] ss:$20 sps:$4 sm:$0xff]   ;;  %v7382_v37 = vld [vmem:[%s9829_s1 + $0x118] ss:$20 sps:$4 sm:$0xff]   ;;  %v7371_v38 = vld [vmem:[%s9829_s1 + $0xd0] ss:$20 sps:$4 sm:$0xff]  }
  0x12   : > { %v7373_v36 = vld [vmem:[%s9829_s1 + $0xd4] ss:$20 sps:$4 sm:$0xff]   ;;  %v7386_v39 = vld [vmem:[%s9829_s1 + $0x144] ss:$20 sps:$4 sm:$0xff]   ;;  %v7379_v40 = vld [vmem:[%s9829_s1 + $0xfc] ss:$20 sps:$4 sm:$0xff]  }
  0x13   : > { %319 = vmatprep.subr.bf16.mxu0 %v317_v11  ;;  %v7377_v41 = vld [vmem:[%s9829_s1 + $0xf8] ss:$20 sps:$4 sm:$0xff]   ;;  %v7388_v42 = vld [vmem:[%s9829_s1 + $0x140] ss:$20 sps:$4 sm:$0xff]   ;;  %v7394_v45 = vld [vmem:[%s9829_s1 + $0x168] ss:$20 sps:$4 sm:$0xff]  }
  0x14   : > { %320 = vmatpush1.bf16.msra.mxu0 %v314_v14  ;;  %913 = vmatpush1.bf16.msra.mxu1 %v7358_v21  ;;  %v7385_v43 = vld [vmem:[%s9829_s1 + $0x124] ss:$20 sps:$4 sm:$0xff]   ;;  %v7392_v44 = vld [vmem:[%s9829_s1 + $0x16c] ss:$20 sps:$4 sm:$0xff]   ;;  %v7398_v47 = vld [vmem:[%s9829_s1 + $0x194] ss:$20 sps:$4 sm:$0xff]  }
  0x15   : > { %949 = vmatprep.subr.bf16.mxu0 %v7343_v12  ;;  %914 = vmatprep.subr.bf16.mxu1 %v7362_v23  ;;  %v7383_v46 = vld [vmem:[%s9829_s1 + $0x120] ss:$20 sps:$4 sm:$0xff]   ;;  %v7400_v49 = vld [vmem:[%s9829_s1 + $0x190] ss:$20 sps:$4 sm:$0xff]   ;;  %v7389_v50 = vld [vmem:[%s9829_s1 + $0x148] ss:$20 sps:$4 sm:$0xff]  }
  0x16   : > { %v7391_v48 = vld [vmem:[%s9829_s1 + $0x14c] ss:$20 sps:$4 sm:$0xff]   ;;  %v7404_v51 = vld [vmem:[%s9829_s1 + $0x1bc] ss:$20 sps:$4 sm:$0xff]   ;;  %v7397_v52 = vld [vmem:[%s9829_s1 + $0x174] ss:$20 sps:$4 sm:$0xff]  }
  0x17   : > { %6335 = vmatmul.mubr.msk.bf16.vlgmr.msra.gmra.mrb[0].mxu0 %vm305_vm2, %v7337_v15  ;;  %v7406_v53 = vld [vmem:[%s9829_s1 + $0x1b8] ss:$20 sps:$4 sm:$0xff]   ;;  %v7395_v54 = vld [vmem:[%s9829_s1 + $0x170] ss:$20 sps:$4 sm:$0xff]   ;;  %v7407_v58 = vld [vmem:[%s9829_s1 + $0x1c0] ss:$20 sps:$4 sm:$0xff]  }
  0x18   : > { %950 = vmatpush1.bf16.msra.mxu0 %v7341_v18  ;;  %915 = vmatpush1.bf16.msra.mxu1 %v7364_v25  ;;  %v7403_v55 = vld [vmem:[%s9829_s1 + $0x19c] ss:$20 sps:$4 sm:$0xff]   ;;  %v7401_v56 = vld [vmem:[%s9829_s1 + $0x198] ss:$20 sps:$4 sm:$0xff]   ;;  %v7412_v60 = vld [vmem:[%s9829_s1 + $0x1e0] ss:$20 sps:$4 sm:$0xff]  }
  0x19   : > { %951 = vmatprep.subr.bf16.mxu0 %v7349_v19  ;;  %916 = vmatprep.subr.bf16.mxu1 %v7368_v27  ;;  %v7409_v57 = vld [vmem:[%s9829_s1 + $0x1c4] ss:$20 sps:$4 sm:$0xff]   ;;  %v7415_v61 = vld [vmem:[%s9829_s1 + $0x1ec] ss:$20 sps:$4 sm:$0xff]   ;;  %v7413_v62 = vld [vmem:[%s9829_s1 + $0x1e8] ss:$20 sps:$4 sm:$0xff]  }
  0x1a   : > { %v7410_v59 = vld [vmem:[%s9829_s1 + $0x1e4] ss:$20 sps:$4 sm:$0xff]   ;;  %v7416_v63 = vld [vmem:[%s9829_s1 + $0x20c] ss:$20 sps:$4 sm:$0xff]   ;;  %v7418_v0 = vld [vmem:[%s9829_s1 + $0x208] ss:$20 sps:$4 sm:$0xff]  }
  0x1b   : > { %v7421_v2 = vld [vmem:[%s9829_s1 + $0x214] ss:$20 sps:$4 sm:$0xff]   ;;  %v7419_v3 = vld [vmem:[%s9829_s1 + $0x210] ss:$20 sps:$4 sm:$0xff]   ;;  %v7425_v7 = vld [vmem:[%s9829_s1 + $0x238] ss:$20 sps:$4 sm:$0xff]  }
  0x1c   : > { %952 = vmatpush1.bf16.msra.mxu0 %v7347_v22  ;;  %917 = vmatpush1.bf16.msra.mxu1 %v7370_v29  ;;  %v7422_v4 = vld [vmem:[%s9829_s1 + $0x234] ss:$20 sps:$4 sm:$0xff]   ;;  %v7424_v5 = vld [vmem:[%s9829_s1 + $0x230] ss:$20 sps:$4 sm:$0xff]   ;;  %v7430_v9 = vld [vmem:[%s9829_s1 + $0x258] ss:$20 sps:$4 sm:$0xff]  }
  0x1d   : > { %953 = vmatprep.subr.bf16.mxu0 %v7355_v24  ;;  %918 = vmatprep.subr.bf16.mxu1 %v7374_v31  ;;  %v7427_v6 = vld [vmem:[%s9829_s1 + $0x23c] ss:$20 sps:$4 sm:$0xff]   ;;  %v7433_v10 = vld [vmem:[%s9829_s1 + $0x264] ss:$20 sps:$4 sm:$0xff]   ;;  %v7431_v11 = vld [vmem:[%s9829_s1 + $0x260] ss:$20 sps:$4 sm:$0xff]  }
  0x1e   : > { %v7428_v8 = vld [vmem:[%s9829_s1 + $0x25c] ss:$20 sps:$4 sm:$0xff]   ;;  %vm1489_vm5 = vcmask 130048   ;;  %s7731_s22 = smov 125   ;;  %vm1548_vm6 = vcmask 64512   ;;  %vm2292_vm7 = vcmask 588800  }
  0x1f   : > { %v7434_v12 = vld [vmem:[%s9829_s1 + $0x150] ss:$20 sps:$4 sm:$0xff]   ;;  %vm2457_vm8 = vcmask 195584   ;;  %vm3007_vm9 = vcmask 719872   ;;  %vm3366_vm10 = vcmask 1041408   ;;  %vm3362_vm11 = vcmask 818176  }
  0x20   : > { %954 = vmatpush1.bf16.msra.mxu0 %v7353_v26  ;;  %919 = vmatpush1.bf16.msra.mxu1 %v7376_v33  ;;  %v7450_v13 = vld [vmem:[%s9832_s4 + $0x90] ss:$8 sps:$4 sm:$0xff]   ;;  %vm3415_vm12 = vcmask 781312   ;;  %vm3475_vm13 = vcmask 785408   ;;  %vm3726_vm14 = vcmask 326656   ;;  %vm3835_vm15 = vcmask 31744  }
  0x21   : > { %955 = vmatprep.subr.bf16.mxu0 %v7361_v28  ;;  %920 = vmatprep.subr.bf16.mxu1 %v7380_v35  ;;  %vm4111_vm1 = vcmask 912384   ;;  %vm4244_vm2 = vcmask 916480  }
  0x24   : > { %956 = vmatpush1.bf16.msra.mxu0 %v7359_v30  ;;  %921 = vmatpush1.bf16.msra.mxu1 %v7382_v37 }
  0x25   : > { %957 = vmatprep.subr.bf16.mxu0 %v7367_v32  ;;  %922 = vmatprep.subr.bf16.mxu1 %v7386_v39 }
  0x28   : > { %958 = vmatpush1.bf16.msra.mxu0 %v7365_v34  ;;  %923 = vmatpush1.bf16.msra.mxu1 %v7388_v42 }
  0x29   : > { %959 = vmatprep.subr.bf16.mxu0 %v7373_v36  ;;  %924 = vmatprep.subr.bf16.mxu1 %v7392_v44 }
  0x2c   : > { %960 = vmatpush1.bf16.msra.mxu0 %v7371_v38  ;;  %925 = vmatpush1.bf16.msra.mxu1 %v7394_v45 }
  0x2d   : > { %961 = vmatprep.subr.bf16.mxu0 %v7379_v40  ;;  %926 = vmatprep.subr.bf16.mxu1 %v7398_v47  ;;  %v7436_v47 = vld [vmem:[%s9829_s1 + $0x178] ss:$20 sps:$4 sm:$0xff]  }
  0x30   : > { %962 = vmatpush1.bf16.msra.mxu0 %v7377_v41  ;;  %927 = vmatpush1.bf16.msra.mxu1 %v7400_v49  ;;  %v7454_v49 = vld [vmem:[%s9832_s4 + $0xa0] ss:$8 sps:$4 sm:$0xff]  }
  0x31   : > { %963 = vmatprep.subr.bf16.mxu0 %v7385_v43  ;;  %928 = vmatprep.subr.bf16.mxu1 %v7404_v51  ;;  %v7438_v51 = vld [vmem:[%s9829_s1 + $0x1a0] ss:$20 sps:$4 sm:$0xff]  }
  0x34   : > { %964 = vmatpush1.bf16.msra.mxu0 %v7383_v46  ;;  %929 = vmatpush1.bf16.msra.mxu1 %v7406_v53  ;;  %v7435_v46 = vld [vmem:[%s9829_s1 + $0x10] ss:$20 sps:$4 sm:$0xff]  }
  0x35   : > { %965 = vmatprep.subr.bf16.mxu0 %v7391_v48  ;;  %930 = vmatprep.subr.bf16.mxu1 %v7410_v59  ;;  %v7452_v48 = vld [vmem:[%s9832_s4 + $0x10] ss:$8 sps:$4 sm:$0xff]  }
  0x36   : > { %v7458_v53 = vld [vmem:[%s9832_s4 + $0xb0] ss:$8 sps:$4 sm:$0xff]  }
  0x37   : > { %v7442_v59 = vld [vmem:[%s9829_s1 + $0x1f0] ss:$20 sps:$4 sm:$0xff]  }
  0x38   : > { %966 = vmatpush1.bf16.msra.mxu0 %v7389_v50  ;;  %931 = vmatpush1.bf16.msra.mxu1 %v7412_v60  ;;  %v7437_v50 = vld [vmem:[%s9829_s1 + $0x38] ss:$20 sps:$4 sm:$0xff]   ;;  %v7464_v60 = vld [vmem:[%s9832_s4 + $0x40] ss:$8 sps:$4 sm:$0xff]  }
  0x39   : > { %967 = vmatprep.subr.bf16.mxu0 %v7397_v52  ;;  %932 = vmatprep.subr.bf16.mxu1 %v7416_v63  ;;  %v7456_v52 = vld [vmem:[%s9832_s4 + $0x20] ss:$8 sps:$4 sm:$0xff]   ;;  %v7444_v63 = vld [vmem:[%s9829_s1 + $0x218] ss:$20 sps:$4 sm:$0xff]  }
  0x3c   : > { %968 = vmatpush1.bf16.msra.mxu0 %v7395_v54  ;;  %933 = vmatpush1.bf16.msra.mxu1 %v7418_v0  ;;  %v7439_v54 = vld [vmem:[%s9829_s1 + $0x60] ss:$20 sps:$4 sm:$0xff]   ;;  %v7468_v0 = vld [vmem:[%s9832_s4 + $0x50] ss:$8 sps:$4 sm:$0xff]  }
  0x3d   : > { %969 = vmatprep.subr.bf16.mxu0 %v7403_v55  ;;  %934 = vmatprep.subr.bf16.mxu1 %v7422_v4  ;;  %v7440_v55 = vld [vmem:[%s9829_s1 + $0x1c8] ss:$20 sps:$4 sm:$0xff]   ;;  %v7446_v4 = vld [vmem:[%s9829_s1 + $0x240] ss:$20 sps:$4 sm:$0xff]  }
  0x40   : > { %970 = vmatpush1.bf16.msra.mxu0 %v7401_v56  ;;  %935 = vmatpush1.bf16.msra.mxu1 %v7424_v5  ;;  %v7460_v56 = vld [vmem:[%s9832_s4 + $0x30] ss:$8 sps:$4 sm:$0xff]   ;;  %v7472_v5 = vld [vmem:[%s9832_s4 + $0x60] ss:$8 sps:$4 sm:$0xff]  }
  0x41   : > { %971 = vmatprep.subr.bf16.mxu0 %v7409_v57  ;;  %936 = vmatprep.subr.bf16.mxu1 %v7428_v8  ;;  %v7462_v57 = vld [vmem:[%s9832_s4 + $0xc0] ss:$8 sps:$4 sm:$0xff]  }
  0x42   : > { %v7449_v8 = vld [vmem:[%s9829_s1 + $0x128] ss:$20 sps:$4 sm:$0xff]  }
  0x44   : > { %972 = vmatpush1.bf16.msra.mxu0 %v7407_v58  ;;  %937 = vmatpush1.bf16.msra.mxu1 %v7430_v9  ;;  %v7441_v58 = vld [vmem:[%s9829_s1 + $0x88] ss:$20 sps:$4 sm:$0xff]   ;;  %v7451_v9 = vld [vmem:[%s9832_s4 + $0x190] ss:$8 sps:$4 sm:$0xff]  }
  0x45   : > { %973 = vmatprep.subr.bf16.mxu0 %v7415_v61  ;;  %6766 = vmatprep.subr.bf16.mxu1 %v7434_v12  ;;  %v7466_v61 = vld [vmem:[%s9832_s4 + $0xd0] ss:$8 sps:$4 sm:$0xff]   ;;  %v7457_v12 = vld [vmem:[%s9832_s4 + $0x120] ss:$8 sps:$4 sm:$0xff]  }
  0x48   : > { %974 = vmatpush1.bf16.msra.mxu0 %v7413_v62  ;;  %v7443_v62 = vld [vmem:[%s9829_s1 + $0xb0] ss:$20 sps:$4 sm:$0xff]  }
  0x49   : > { %975 = vmatprep.subr.bf16.mxu0 %v7421_v2  ;;  %v7470_v2 = vld [vmem:[%s9832_s4 + $0xe0] ss:$8 sps:$4 sm:$0xff]  }
  0x4c   : > { %976 = vmatpush1.bf16.msra.mxu0 %v7419_v3  ;;  %v7445_v3 = vld [vmem:[%s9829_s1 + $0xd8] ss:$20 sps:$4 sm:$0xff]  }
  0x4d   : > { %977 = vmatprep.subr.bf16.mxu0 %v7427_v6  ;;  %v7447_v6 = vld [vmem:[%s9829_s1 + $0x100] ss:$20 sps:$4 sm:$0xff]  }
  0x50   : > { %978 = vmatpush1.bf16.msra.mxu0 %v7425_v7  ;;  %v7448_v7 = vld [vmem:[%s9829_s1 + $0x268] ss:$20 sps:$4 sm:$0xff]  }
  0x51   : > { %979 = vmatprep.subr.bf16.mxu0 %v7433_v10  ;;  %v7453_v10 = vld [vmem:[%s9832_s4 + $0x110] ss:$8 sps:$4 sm:$0xff]  }
  0x54   : > { %980 = vmatpush1.bf16.msra.mxu0 %v7431_v11  ;;  %v7455_v11 = vld [vmem:[%s9832_s4 + $0x1a0] ss:$8 sps:$4 sm:$0xff]  }
  0x55   : > { %6788 = vmatprep.subr.bf16.mxu0 %v7450_v13  ;;  %v7459_v13 = vld [vmem:[%s9832_s4 + $0x1b0] ss:$8 sps:$4 sm:$0xff]  }
  0x86   : > { %v285_v14 = vpop.permute.xlu0 %284 }
  0x8a   : > { %v290_v18 = vpop.permute.xlu0 %289 }
  0xea   : > { %v353_v15 = vpop.f32.mrb[0].mxu0 }
  0xeb   : > { %v354_v16 = vadd.f32 %v353_v15, %v285_v14  ;;  %v355_v17 = vpop.f32.mrb[1].mxu0  ;;  %v7463_v15 = vld [vmem:[%s9832_s4 + $0x1c0] ss:$8 sps:$4 sm:$0xff]  }
  0xec   : > { %v356_v19 = vadd.f32 %v355_v17, %v285_v14  ;;  %v357_v20 = vpop.f32.mrb[2].mxu0  ;;  %v7461_v14 = vld [vmem:[%s9832_s4 + $0x130] ss:$8 sps:$4 sm:$0xff]  }
  0xed   : > { %v362_v21 = vadd.f32 3.0, %v354_v16  ;;  %v358_v22 = vadd.f32 %v357_v20, %v290_v18  ;;  %v359_v23 = vpop.f32.mrb[3].mxu0  ;;  %v7467_v17 = vld [vmem:[%s9832_s4 + $0x1d0] ss:$8 sps:$4 sm:$0xff]   ;;  %v7473_v20 = vld [vmem:[%s9832_s4 + $0x160] ss:$8 sps:$4 sm:$0xff]  }
  0xee   : > { %v363_v24 = vadd.f32 3.0, %v356_v19  ;;  %v360_v25 = vadd.f32 %v359_v23, %v290_v18  ;;  %v7469_v18 = vld [vmem:[%s9832_s4 + $0x150] ss:$8 sps:$4 sm:$0xff]  }
  0xef   : > { %v366_v26 = vmax.f32 %v362_v21, 0.0  ;;  %v364_v27 = vadd.f32 3.0, %v358_v22  ;;  %v7474_v21 = vld [vmem:[%s9832_s4 + $0xf0] ss:$8 sps:$4 sm:$0xff]  }
  0xf0   : > { %v367_v28 = vmax.f32 %v363_v24, 0.0  ;;  %v365_v29 = vadd.f32 3.0, %v360_v25  ;;  %v7476_v23 = vld [vmem:[%s9832_s4 + $0x70] ss:$8 sps:$4 sm:$0xff]  }
  0xf1   : > { %v370_v30 = vmin.f32 %v366_v26, 6.0  ;;  %v368_v31 = vmax.f32 %v364_v27, 0.0  ;;  %v7477_v24 = vld [vmem:[%s9832_s4 + $0x170] ss:$8 sps:$4 sm:$0xff]   ;;  %v7479_v26 = vld [vmem:[%s9832_s4 + $0x200] ss:$8 sps:$4 sm:$0xff]  }
  0xf2   : > { %v371_v32 = vmin.f32 %v367_v28, 6.0  ;;  %v369_v33 = vmax.f32 %v365_v29, 0.0  ;;  %v7480_v27 = vld [vmem:[%s9832_s4 + $0x80] ss:$8 sps:$4 sm:$0xff]   ;;  %v7727_v29 = vmov 0.0  }
  0xf3   : > { %v374_v34 = vmul.f32 0.16666667, %v370_v30  ;;  %v372_v35 = vmin.f32 %v368_v31, 6.0  ;;  %v7481_v28 = vld [vmem:[%s9832_s4 + $0x180] ss:$8 sps:$4 sm:$0xff]   ;;  %v7728_v30 = vmov 1  }
  0xf4   : > { %v375_v36 = vmul.f32 0.16666667, %v371_v32  ;;  %v373_v37 = vmin.f32 %v369_v33, 6.0  ;;  %7318 = vset.pattern.permute.xlu1 %v7728_v30  ;;  %v8146_v31 = vld [vmem:[%s9831_s3] sm:$0xff]  ;;  %v8152_v32 = vld [vmem:[%s9831_s3 + $0x8] sm:$0xff] }
  0xf5   : > { %v376_v38 = vmul.f32 0.16666667, %v372_v35  ;;  %v378_v40 = vmul.f32 %v374_v34, %v354_v16  ;;  %v7465_v16 = vld [vmem:[%s9832_s4 + $0x140] ss:$8 sps:$4 sm:$0xff]   ;;  %1121 = vperm.xlu1 %7318, %v8146_v31   ;;  %v480_v34 = vld [vmem:[%s9830_s2 + $0x10] sm:$0xff] }
  0xf6   : > { %v377_v39 = vmul.f32 0.16666667, %v373_v37  ;;  %v379_v42 = vmul.f32 %v375_v36, %v356_v19  ;;  %v7471_v19 = vld [vmem:[%s9832_s4 + $0x1e0] ss:$8 sps:$4 sm:$0xff]  }
  0xf7   : > { %v380_v41 = vmul.f32 %v376_v38, %v358_v22  ;;  %v7475_v22 = vld [vmem:[%s9832_s4 + $0x1f0] ss:$8 sps:$4 sm:$0xff]   ;;  %v478_v33 = vld [vmem:[%s9830_s2] sm:$0xff]  ;;  %v479_v37 = vld [vmem:[%s9830_s2 + $0x8] sm:$0xff] }
  0xf8   : > { %v381_v43 = vmul.f32 %v377_v39, %v360_v25  ;;  %v7478_v25 = vld [vmem:[%s9832_s4 + $0x100] ss:$8 sps:$4 sm:$0xff]   ;;  %v485_v39 = vld [vmem:[%s9830_s2 + $0x38] sm:$0xff] }
  0xf9   : > { %v488_v44 = vpack.c.bf16 %v380_v41, %v378_v40  ;;  %1125 = vperm.xlu1 %7318, %v8152_v32   ;;  %v483_v38 = vld [vmem:[%s9830_s2 + $0x28] sm:$0xff]  ;;  %v481_v41 = vld [vmem:[%s9830_s2 + $0x18] sm:$0xff] }
  0xfa   : > { %v489_v45 = vpack.c.bf16 %v381_v43, %v379_v42  ;;  %v484_v43 = vld [vmem:[%s9830_s2 + $0x30] sm:$0xff] }
  0xfc   : > { %938 = vmatprep.mubr.bf16.mxu1 %v489_v45  ;;  %981 = vmatprep.mubr.bf16.mxu0 %v489_v45 }
  0xfd   : > { %939 = vmatmul.mubr.bf16.vlgmr.msra.gmra.mrb[0].mxu1 %v488_v44  ;;  %982 = vmatmul.mubr.bf16.vlgmr.msra.gmra.mrb[4].mxu0 %v488_v44 }
  0xfe   : > { %6767 = vmatpush3.bf16.msra.mxu1 %v7435_v46  ;;  %1024 = vmatprep.mubr.bf16.mxu1 %v489_v45 }
  0xff   : > { %6768 = vmatprep.subr.bf16.mxu1 %v7436_v47  ;;  %6789 = vmatpush3.bf16.msra.mxu0 %v7452_v48 }
 0x100   : > { %6790 = vmatprep.subr.bf16.mxu0 %v7454_v49  ;;  %7319 = vset.pattern.permute.xlu1 %v7725_v1 }
 0x102   : > { %6769 = vmatpush3.bf16.msra.mxu1 %v7437_v50 }
 0x103   : > { %6770 = vmatprep.subr.bf16.mxu1 %v7438_v51  ;;  %6791 = vmatpush3.bf16.msra.mxu0 %v7456_v52 }
 0x104   : > { %6792 = vmatprep.subr.bf16.mxu0 %v7458_v53 }
 0x106   : > { %6771 = vmatpush3.bf16.msra.mxu1 %v7439_v54 }
 0x107   : > { %6772 = vmatprep.subr.bf16.mxu1 %v7440_v55  ;;  %6793 = vmatpush3.bf16.msra.mxu0 %v7460_v56 }
 0x108   : > { %6794 = vmatprep.subr.bf16.mxu0 %v7462_v57 }
 0x10a   : > { %6773 = vmatpush3.bf16.msra.mxu1 %v7441_v58 }
 0x10b   : > { %6774 = vmatprep.subr.bf16.mxu1 %v7442_v59  ;;  %6795 = vmatpush3.bf16.msra.mxu0 %v7464_v60 }
 0x10c   : > { %6796 = vmatprep.subr.bf16.mxu0 %v7466_v61  ;;  %v7482_v61 = vld [vmem:[%s9832_s4 + $0x210] ss:$8 sps:$4 sm:$0xff]  }
 0x10e   : > { %6775 = vmatpush3.bf16.msra.mxu1 %v7443_v62  ;;  %v7483_v62 = vld [vmem:[%s9832_s4 + $0x220] ss:$8 sps:$4 sm:$0xff]  }
 0x10f   : > { %6776 = vmatprep.subr.bf16.mxu1 %v7444_v63  ;;  %6797 = vmatpush3.bf16.msra.mxu0 %v7468_v0  ;;  %v7484_v63 = vld [vmem:[%s9832_s4 + $0x230] ss:$8 sps:$4 sm:$0xff]   ;;  %v7485_v0 = vld [vmem:[%s9832_s4 + $0x240] ss:$8 sps:$4 sm:$0xff]  }
 0x110   : > { %6798 = vmatprep.subr.bf16.mxu0 %v7470_v2 }
 0x112   : > { %6777 = vmatpush3.bf16.msra.mxu1 %v7445_v3 }
 0x113   : > { %6778 = vmatprep.subr.bf16.mxu1 %v7446_v4  ;;  %6799 = vmatpush3.bf16.msra.mxu0 %v7472_v5 }
 0x114   : > { %6800 = vmatprep.subr.bf16.mxu0 %v7474_v21 }
 0x116   : > { %6779 = vmatpush3.bf16.msra.mxu1 %v7447_v6  ;;  %v482_v6 = vld [vmem:[%s9830_s2 + $0x20] sm:$0xff] }
 0x117   : > { %6780 = vmatprep.subr.bf16.mxu1 %v7448_v7  ;;  %6801 = vmatpush3.bf16.msra.mxu0 %v7476_v23  ;;  %v487_v7 = vld [vmem:[%s9830_s2 + $0x48] sm:$0xff] }
 0x118   : > { %6802 = vmatprep.subr.bf16.mxu0 %v7478_v25 }
 0x11a   : > { %6781 = vmatpush3.bf16.msra.mxu1 %v7449_v8 }
 0x11b   : > { %6810 = vmatprep.subr.bf16.mxu1 %v7451_v9  ;;  %6803 = vmatpush3.bf16.msra.mxu0 %v7480_v27 }
 0x11c   : > { %6962 = vmatprep.subr.bf16.mxu0 %v7727_v29 }
 0x11d   : > { %1025 = vmatmul.mubr.bf16.vlgmr.msra.gmra.mrb[4].mxu1 %v488_v44  ;;  %v486_v44 = vld [vmem:[%s9830_s2 + $0x40] sm:$0xff] }
 0x11e   : > { %6811 = vmatpush3.bf16.msra.mxu1 %v7453_v10 }
 0x11f   : > { %6812 = vmatprep.subr.bf16.mxu1 %v7455_v11 }
 0x122   : > { %6813 = vmatpush3.bf16.msra.mxu1 %v7457_v12 }
 0x123   : > { %6814 = vmatprep.subr.bf16.mxu1 %v7459_v13 }
 0x126   : > { %6815 = vmatpush3.bf16.msra.mxu1 %v7461_v14 }
 0x127   : > { %6816 = vmatprep.subr.bf16.mxu1 %v7463_v15 }
 0x12a   : > { %6817 = vmatpush3.bf16.msra.mxu1 %v7465_v16 }
 0x12b   : > { %6818 = vmatprep.subr.bf16.mxu1 %v7467_v17 }
 0x12e   : > { %6819 = vmatpush3.bf16.msra.mxu1 %v7469_v18 }
 0x12f   : > { %6820 = vmatprep.subr.bf16.mxu1 %v7471_v19 }
 0x132   : > { %6821 = vmatpush3.bf16.msra.mxu1 %v7473_v20 }
 0x133   : > { %6822 = vmatprep.subr.bf16.mxu1 %v7475_v22 }
 0x136   : > { %6823 = vmatpush3.bf16.msra.mxu1 %v7477_v24 }
 0x137   : > { %6824 = vmatprep.subr.bf16.mxu1 %v7479_v26 }
 0x13a   : > { %6825 = vmatpush3.bf16.msra.mxu1 %v7481_v28 }
 0x13b   : > { %6974 = vmatprep.subr.bf16.mxu1 %v7727_v29 }
 0x174   : > { %v1122_v13 = vpop.permute.xlu1 %1121 }
 0x178   : > { %v1126_v14 = vpop.permute.xlu1 %1125 }
 0x1d0   : > { %v940_v35 = vpop.f32.mrb[0].mxu1  ;;  %v983_v36 = vpop.f32.mrb[4].mxu0 }
 0x1d1   : > { %v942_v40 = vpop.f32.mrb[1].mxu1  ;;  %v985_v42 = vpop.f32.mrb[5].mxu0  ;;  %v1033_v47 = vmul.f32 %v940_v35, %v478_v33  ;;  %v1035_v48 = vmul.f32 %v983_v36, %v480_v34 }
 0x1d2   : > { %v944_v45 = vpop.f32.mrb[2].mxu1  ;;  %v987_v46 = vpop.f32.mrb[6].mxu0  ;;  %v1034_v53 = vmul.f32 %v942_v40, %v479_v37  ;;  %v1036_v54 = vmul.f32 %v985_v42, %v481_v41 }
 0x1d3   : > { %v1038_v49 = vmul.f32 %v944_v45, %v483_v38  ;;  %v1040_v50 = vmul.f32 %v987_v46, %v485_v39  ;;  %v946_v51 = vpop.f32.mrb[3].mxu1  ;;  %v989_v52 = vpop.f32.mrb[7].mxu0 }
 0x1d4   : > { %v1039_v55 = vmul.f32 %v946_v51, %v484_v43  ;;  %v1041_v56 = vmul.f32 %v989_v52, %v486_v44  ;;  %v8224_v44 = vld [vmem:[%s9831_s3] sm:$0xff] }
 0x1d5   : > { %v1043_v57 = vpack.c.bf16 %v1038_v49, %v1033_v47  ;;  %v1045_v58 = vpack.c.bf16 %v1040_v50, %v1035_v48  ;;  %v1482_v50 = vld [vmem:[%s9832_s4 + $0x250] sm:$0xf] }
 0x1d6   : > { %v1044_v59 = vpack.c.bf16 %v1039_v55, %v1034_v53  ;;  %v1046_v60 = vpack.c.bf16 %v1041_v56, %v1036_v54 }
 0x1d8   : > { %1380 = vmatprep.mubr.bf16.mxu0 %v1044_v59  ;;  %1421 = vmatprep.mubr.bf16.mxu1 %v1046_v60  ;;  %v7486_v60 = vld [vmem:[%s9832_s4 + $0x260] ss:$8 sps:$4 sm:$0xff]  }
 0x1d9   : > { %1381 = vmatmul.mubr.bf16.vlgmr.msra.gmra.mrb[8].mxu0 %v1043_v57  ;;  %1422 = vmatmul.mubr.bf16.vlgmr.msra.gmra.mrb[8].mxu1 %v1045_v58 }
 0x1da   : > { %6963 = vmatpush3.bf16.msra.mxu0 %v7482_v61  ;;  %6970 = vmatprep.mubr.msk.bf16.mxu0 %vm7729_vm3, %v7727_v29 }
 0x1db   : > { %6964 = vmatprep.subr.bf16.mxu0 %v7727_v29  ;;  %6976 = vmatprep.mubr.msk.bf16.mxu1 %vm7729_vm3, %v7727_v29 }
 0x1de   : > { %6965 = vmatpush3.bf16.msra.mxu0 %v7483_v62 }
 0x1df   : > { %6966 = vmatprep.subr.bf16.mxu0 %v7727_v29 }
 0x1e2   : > { %6967 = vmatpush3.bf16.msra.mxu0 %v7484_v63 }
 0x1e3   : > { %6968 = vmatprep.subr.bf16.mxu0 %v7727_v29 }
 0x1e6   : > { %6969 = vmatpush3.bf16.msra.mxu0 %v7485_v0 }
 0x1e7   : > { %6980 = vmatprep.subr.bf16.mxu0 %v7727_v29 }
 0x1f0   : > { %v6782_v2 = vpop.f32.mrb[4].mxu1 }
 0x1f1   : > { %v6783_v3 = vpop.f32.mrb[5].mxu1 }
 0x1f2   : > { %v6784_v4 = vadd.f32 %v6783_v3, %v6782_v2  ;;  %v6785_v5 = vpop.f32.mrb[6].mxu1 }
 0x1f3   : > { %v6786_v8 = vpop.f32.mrb[7].mxu1 }
 0x1f4   : > { %v6787_v9 = vadd.f32 %v6786_v8, %v6785_v5  ;;  %v1037_v10 = vmul.f32 %v6784_v4, %v482_v6 }
 0x1f6   : > { %v1042_v11 = vmul.f32 %v6787_v9, %v487_v7 }
 0x1f8   : > { %v1047_v12 = vpack.c.bf16 %v1042_v11, %v1037_v10 }
 0x1fa   : > { %6971 = vmatmul.mubr.msk.bf16.vlgmr.msra.gmra.mrb[12].mxu0 %vm1344_vm4, %v1047_v12 }
 0x1fb   : > { %6982 = vmatprep.mubr.msk.bf16.mxu0 %vm7729_vm3, %v7727_v29 }
 0x2ac   : > { %v6804_v15 = vpop.f32.mrb[8].mxu0  ;;  %v6826_v16 = vpop.f32.mrb[8].mxu1 }
 0x2ad   : > { %v6805_v17 = vpop.f32.mrb[9].mxu0  ;;  %v6827_v18 = vpop.f32.mrb[9].mxu1 }
 0x2ae   : > { %v6806_v19 = vadd.f32 %v6805_v17, %v6804_v15  ;;  %v6828_v20 = vadd.f32 %v6827_v18, %v6826_v16  ;;  %v6807_v21 = vpop.f32.mrb[10].mxu0  ;;  %v6829_v22 = vpop.f32.mrb[10].mxu1 }
 0x2af   : > { %v6808_v23 = vpop.f32.mrb[11].mxu0  ;;  %v6830_v24 = vpop.f32.mrb[11].mxu1 }
 0x2b0   : > { %v1383_v25 = vadd.f32 %v6806_v19, %v1122_v13  ;;  %v6809_v26 = vadd.f32 %v6808_v23, %v6807_v21  ;;  %v6831_v27 = vadd.f32 %v6830_v24, %v6829_v22  ;;  %v8264_v21 = vld [vmem:[%s9831_s3 + $0x8] sm:$0xff]  ;;  %v8276_v23 = vld [vmem:[%s9831_s3 + $0x18] sm:$0xff] }
 0x2b1   : > { %v8269_v22 = vld [vmem:[%s9831_s3 + $0x28] sm:$0xff]  ;;  %v8281_v24 = vld [vmem:[%s9831_s3 + $0x38] sm:$0xff] }
 0x2b2   : > { %v1386_v28 = vadd.f32 %v6809_v26, %v1126_v14  ;;  %v1424_v30 = vadd.f32 %v6828_v20, %v1383_v25  ;;  %v7732_v14 = vmov 4   ;;  %v7487_v20 = vld [vmem:[%s9832_s4 + $0x270] ss:$8 sps:$4 sm:$0xff]   ;;  %v8288_v25 = vld [vmem:[%s9831_s3 + $0x20] sm:$0xff] }
 0x2b3   : > { %v7493_v26 = vld [vmem:[%s9832_s4 + $0x2d0] ss:$8 sps:$4 sm:$0xff]  }
 0x2b4   : > { %v1427_v33 = vadd.f32 %v6831_v27, %v1386_v28  ;;  %v7495_v27 = vld [vmem:[%s9832_s4 + $0x2d4] ss:$8 sps:$4 sm:$0xff]  }
 0x2b5   : > { %v8300_v28 = vld [vmem:[%s9831_s3 + $0x30] sm:$0xff] }
 0x2cd   : > { %v1464_v34 = vpop.f32.mrb[12].mxu0 }
 0x2ce   : > { %v8209_v35 = vadd.f32 %v1464_v34, %v1424_v30  ;;  %v6972_v36 = vpop.f32.mrb[13].mxu0  ;;  %v7496_v30 = vld [vmem:[%s9832_s4 + $0x2e0] ss:$8 sps:$4 sm:$0xff]  }
 0x2cf   : > { %v1467_v37 = vpop.f32.mrb[14].mxu0  ;;  %v8312_v34 = vld [vmem:[%s9831_s3 + $0x40] sm:$0xff] }
 0x2d0   : > { %v1471_v38 = vmax.f32 %v8209_v35, 0.0  ;;  %v8212_v39 = vadd.f32 %v1467_v37, %v1427_v33  ;;  %v6973_v40 = vpop.f32.mrb[15].mxu0  ;;  %v7498_v33 = vld [vmem:[%s9832_s4 + $0x2e4] ss:$8 sps:$4 sm:$0xff]  }
 0x2d2   : > { %v1472_v41 = vmax.f32 %v8212_v39, 0.0  ;;  %v1473_v42 = vsel %vm1344_vm4, %v1471_v38, 0.0 }
 0x2d3   : > { %1474 = vadd.xlane.f32.xlu0 %v1473_v42 }
 0x2d4   : > { %v1476_v43 = vsel %vm1344_vm4, %v1472_v41, 0.0 }
 0x2d5   : > { %1477 = vadd.xlane.f32.xlu1 %v1476_v43 }
 0x2e6   : > { %1542 = vrot.lane.b32.xlu1 %v8146_v31, %s7731_s22 }
 0x2e9   : > { %1486 = vrot.lane.b32.xlu0 %v8224_v44, %s7730_s19 }
 0x2ed   : > { %1544 = vrot.lane.b32.xlu0 %v8152_v32, %s7731_s22 }
 0x360   : > { %v1475_v45 = vpop.xlane.xlu0 %1474 }
 0x361   : > { %v1480_v47 = vmul.f32 0.015625, %v1475_v45  ;;  %v7488_v45 = vld [vmem:[%s9832_s4 + $0x280] ss:$8 sps:$4 sm:$0xff]  }
 0x362   : > { %v1478_v46 = vpop.xlane.xlu1 %1477 }
 0x363   : > { %v1481_v48 = vmul.f32 0.015625, %v1478_v46  ;;  %v7489_v46 = vld [vmem:[%s9832_s4 + $0x290] ss:$8 sps:$4 sm:$0xff]  }
 0x364   : > { %v1487_v51 = vpop.permute.xlu0 %1486 }
 0x365   : > { %v1483_v49 = vpack.c.bf16 %v1481_v48, %v1480_v47  ;;  %v7490_v47 = vld [vmem:[%s9832_s4 + $0x2a0] ss:$8 sps:$4 sm:$0xff]   ;;  %v7491_v48 = vld [vmem:[%s9832_s4 + $0x2b0] ss:$8 sps:$4 sm:$0xff]  }
 0x366   : > { %v1543_v61 = vpop.permute.xlu1 %1542 }
 0x367   : > { %6975 = vmatpush3.bf16.msra.mxu1 %v1483_v49  ;;  %v7492_v49 = vld [vmem:[%s9832_s4 + $0x2c0] ss:$0 sps:$4 sm:$0xff]  }
 0x368   : > { %6986 = vmatprep.subr.bf16.mxu1 %v7727_v29  ;;  %v1545_v63 = vpop.permute.xlu0 %1544 }
 0x36a   : > { %6977 = vmatmul.mubr.msk.bf16.vlgmr.msra.gmra.mrb[12].mxu1 %vm1489_vm5, %v1482_v50  ;;  %v7501_v50 = vld [vmem:[%s9832_s4 + $0x2f4] ss:$8 sps:$4 sm:$0xff]  }
 0x36b   : > { %6988 = vmatprep.mubr.msk.bf16.mxu1 %vm7729_vm3, %v7727_v29 }
 0x43d   : > { %v1527_v52 = vpop.f32.mrb[12].mxu1 }
 0x43e   : > { %v1528_v53 = vadd.f32 %v1527_v52, %v1487_v51  ;;  %v6978_v54 = vpop.f32.mrb[13].mxu1  ;;  %v7499_v51 = vld [vmem:[%s9832_s4 + $0x2f0] ss:$8 sps:$4 sm:$0xff]   ;;  %v7504_v52 = vld [vmem:[%s9832_s4 + $0x304] ss:$8 sps:$4 sm:$0xff]  }
 0x43f   : > { %v1530_v55 = vpop.f32.mrb[14].mxu1  ;;  %v7505_v54 = vld [vmem:[%s9832_s4 + $0x310] ss:$8 sps:$4 sm:$0xff]  }
 0x440   : > { %v1533_v56 = vmax.f32 %v1528_v53, 0.0  ;;  %v6979_v57 = vpop.f32.mrb[15].mxu1  ;;  %v7502_v53 = vld [vmem:[%s9832_s4 + $0x300] ss:$8 sps:$4 sm:$0xff]  }
 0x441   : > { %v7506_v55 = vld [vmem:[%s9832_s4 + $0x320] ss:$8 sps:$4 sm:$0xff]  }
 0x442   : > { %v1536_v58 = vpack.c.bf16 %v1533_v56, %v1533_v56  ;;  %v7507_v56 = vld [vmem:[%s9832_s4 + $0x330] ss:$8 sps:$4 sm:$0xff]   ;;  %v7508_v57 = vld [vmem:[%s9832_s4 + $0x340] ss:$8 sps:$4 sm:$0xff]  }
 0x444   : > { %v1553_v59 = vsel %vm309_vm0, %v1536_v58, 0  ;;  %v7509_v58 = vld [vmem:[%s9832_s4 + $0x350] ss:$8 sps:$4 sm:$0xff]  }
 0x445   : > { %6981 = vmatpush3.bf16.msra.mxu0 %v1553_v59  ;;  %v7510_v59 = vld [vmem:[%s9832_s4 + $0x360] ss:$8 sps:$4 sm:$0xff]  }
 0x446   : > { %6992 = vmatprep.subr.bf16.mxu0 %v7727_v29 }
 0x448   : > { %6983 = vmatmul.mubr.msk.bf16.vlgmr.msra.gmra.mrb[16].mxu0 %vm1548_vm6, %v7486_v60  ;;  %v7511_v60 = vld [vmem:[%s9832_s4 + $0x370] ss:$8 sps:$4 sm:$0xff]   ;;  %vm5929_vm6 = vcmask 261120  }
 0x449   : > { %6994 = vmatprep.mubr.msk.bf16.mxu0 %vm7729_vm3, %v7727_v29 }
 0x51b   : > { %v1589_v62 = vpop.f32.mrb[16].mxu0 }
 0x51c   : > { %v1590_v0 = vadd.f32 %v1589_v62, %v1543_v61  ;;  %v6984_v2 = vpop.f32.mrb[17].mxu0 }
 0x51d   : > { %v1592_v3 = vpop.f32.mrb[18].mxu0 }
 0x51e   : > { %v1596_v4 = vadd.f32 3.0, %v1590_v0  ;;  %v1593_v5 = vadd.f32 %v1592_v3, %v1545_v63  ;;  %v6985_v6 = vpop.f32.mrb[19].mxu0 }
 0x520   : > { %v1598_v7 = vmax.f32 %v1596_v4, 0.0  ;;  %v1597_v8 = vadd.f32 3.0, %v1593_v5 }
 0x522   : > { %v1600_v9 = vmin.f32 %v1598_v7, 6.0  ;;  %v1599_v10 = vmax.f32 %v1597_v8, 0.0 }
 0x524   : > { %v1602_v11 = vmul.f32 0.16666667, %v1600_v9  ;;  %v1601_v12 = vmin.f32 %v1599_v10, 6.0 }
 0x526   : > { %v1603_v13 = vmul.f32 0.16666667, %v1601_v12  ;;  %1606 = vperm.xlu1 %7319, %v1602_v11  }
 0x528   : > { %1611 = vperm.xlu0 %7317, %v1603_v13  }
 0x52a   : > { %7320 = vset.pattern.permute.xlu1 %v7732_v14 }
 0x52b   : > { %1620 = vperm.xlu1 %7320, %v8146_v31   ;;  %v7733_v31 = vmov 5  }
 0x52c   : > { %7321 = vset.pattern.permute.xlu0 %v7732_v14 }
 0x52d   : > { %1624 = vperm.xlu0 %7321, %v8152_v32   ;;  %v8257_v32 = vld [vmem:[%s9831_s3 + $0x10] sm:$0xff] }
 0x52f   : > { %7322 = vset.pattern.permute.xlu1 %v7733_v31 }
 0x530   : > { %1697 = vperm.xlu1 %7322, %v8224_v44  }
 0x531   : > { %7323 = vset.pattern.permute.xlu0 %v7733_v31 }
 0x532   : > { %1707 = vperm.xlu0 %7323, %v8257_v32  }
 0x534   : > { %1702 = vperm.xlu1 %7322, %v8264_v21  }
 0x536   : > { %1722 = vperm.xlu0 %7323, %v8269_v22  }
 0x538   : > { %1712 = vperm.xlu1 %7322, %v8276_v23  }
 0x53a   : > { %1732 = vperm.xlu0 %7323, %v8281_v24  }
 0x53c   : > { %1717 = vperm.xlu1 %7322, %v8288_v25  }
 0x540   : > { %1727 = vperm.xlu1 %7322, %v8300_v28  }
 0x544   : > { %1737 = vperm.xlu1 %7322, %v8312_v34  }
 0x5a5   : > { %v1607_v15 = vpop.permute.xlu1 %1606 }
 0x5a6   : > { %v1614_v17 = vmul.f32 %v1607_v15, %v1471_v38 }
 0x5a7   : > { %v1612_v16 = vpop.permute.xlu0 %1611 }
 0x5a8   : > { %v1615_v18 = vmul.f32 %v1612_v16, %v1472_v41 }
 0x5aa   : > { %v1618_v19 = vpack.c.bf16 %v1615_v18, %v1614_v17  ;;  %v1621_v35 = vpop.permute.xlu1 %1620 }
 0x5ac   : > { %6987 = vmatpush3.bf16.msra.mxu1 %v1618_v19  ;;  %v1625_v37 = vpop.permute.xlu0 %1624 }
 0x5ad   : > { %1945 = vmatprep.subr.bf16.mxu1 %v7495_v27 }
 0x5af   : > { %6989 = vmatmul.mubr.msk.bf16.vlgmr.msra.gmra.mrb[16].mxu1 %vm1489_vm5, %v7487_v20  ;;  %v1698_v61 = vpop.permute.xlu1 %1697 }
 0x5b0   : > { %1977 = vmatprep.mubr.bf16.mxu1 %v7725_v1  ;;  %1946 = vmatpush1.bf16.msra.mxu1 %v7493_v26 }
 0x5b1   : > { %1947 = vmatprep.subr.bf16.mxu1 %v7498_v33  ;;  %v1708_v9 = vpop.permute.xlu0 %1707 }
 0x5b3   : > { %v1703_v2 = vpop.permute.xlu1 %1702 }
 0x5b4   : > { %1948 = vmatpush1.bf16.msra.mxu1 %v7496_v30 }
 0x5b5   : > { %1949 = vmatprep.subr.bf16.mxu1 %v7501_v50  ;;  %v1723_v30 = vpop.permute.xlu0 %1722 }
 0x5b7   : > { %v1713_v13 = vpop.permute.xlu1 %1712 }
 0x5b8   : > { %1950 = vmatpush1.bf16.msra.mxu1 %v7499_v51 }
 0x5b9   : > { %1951 = vmatprep.subr.bf16.mxu1 %v7504_v52 }
 0x5bb   : > { %v1718_v20 = vpop.permute.xlu1 %1717 }
 0x5bc   : > { %1952 = vmatpush1.bf16.msra.mxu1 %v7502_v53 }
 0x682   : > { %v1669_v36 = vpop.f32.mrb[16].mxu1 }
 0x683   : > { %v6990_v38 = vpop.f32.mrb[17].mxu1  ;;  %v1670_v40 = vadd.f32 %v1669_v36, %v1621_v35 }
 0x684   : > { %v1672_v39 = vpop.f32.mrb[18].mxu1 }
 0x685   : > { %v1673_v41 = vadd.f32 %v1672_v39, %v1625_v37  ;;  %v6991_v42 = vpop.f32.mrb[19].mxu1 }
 0x687   : > { %v1685_v43 = vpack.c.bf16 %v1673_v41, %v1670_v40  ;;  %v1728_v40 = vpop.permute.xlu1 %1727 }
 0x689   : > { %6993 = vmatpush3.bf16.msra.mxu0 %v1685_v43 }
 0x68a   : > { %2177 = vmatprep.subr.bf16.mxu0 %v7725_v1 }
 0x68b   : > { %v1738_v52 = vpop.permute.xlu1 %1737 }
 0x68c   : > { %6995 = vmatmul.mubr.msk.bf16.vlgmr.msra.gmra.mrb[20].mxu0 %vm1489_vm5, %v7488_v45  ;;  %v1733_v45 = vpop.permute.xlu0 %1732 }
 0x68d   : > { %6998 = vmatprep.mubr.msk.bf16.mxu0 %vm7729_vm3, %v7727_v29  ;;  %2178 = vmatpush1.bf16.msra.mxu0 %v7505_v54 }
 0x68e   : > { %2179 = vmatprep.subr.bf16.mxu0 %v7725_v1 }
 0x691   : > { %2180 = vmatpush1.bf16.msra.mxu0 %v7506_v55 }
 0x692   : > { %2181 = vmatprep.subr.bf16.mxu0 %v7725_v1 }
 0x694   : > { %6999 = vmatmul.mubr.msk.bf16.gmra.mrb[24].mxu0 %vm1489_vm5, %v7489_v46 }
 0x695   : > { %7002 = vmatprep.mubr.msk.bf16.mxu0 %vm7729_vm3, %v7727_v29  ;;  %2182 = vmatpush1.bf16.msra.mxu0 %v7507_v56 }
 0x696   : > { %2183 = vmatprep.subr.bf16.mxu0 %v7725_v1 }
 0x699   : > { %2184 = vmatpush1.bf16.msra.mxu0 %v7508_v57 }
 0x69a   : > { %2185 = vmatprep.subr.bf16.mxu0 %v7725_v1 }
 0x69c   : > { %7003 = vmatmul.mubr.msk.bf16.gmra.mrb[28].mxu0 %vm1489_vm5, %v7490_v47 }
 0x69d   : > { %7006 = vmatprep.mubr.msk.bf16.mxu0 %vm7729_vm3, %v7727_v29  ;;  %2186 = vmatpush1.bf16.msra.mxu0 %v7509_v58 }
 0x69e   : > { %2187 = vmatprep.subr.bf16.mxu0 %v7725_v1 }
 0x6a1   : > { %2188 = vmatpush1.bf16.msra.mxu0 %v7510_v59 }
 0x6a2   : > { %2189 = vmatprep.subr.bf16.mxu0 %v7725_v1 }
 0x6a4   : > { %7007 = vmatmul.mubr.msk.bf16.gmra.mrb[32].mxu0 %vm1489_vm5, %v7491_v48 }
 0x6a5   : > { %7010 = vmatprep.mubr.msk.bf16.mxu0 %vm7729_vm3, %v7727_v29  ;;  %2190 = vmatpush1.bf16.msra.mxu0 %v7511_v60  ;;  %v7512_v60 = vld [vmem:[%s9832_s4 + $0x380] ss:$8 sps:$4 sm:$0xff]  }
 0x6a6   : > { %2191 = vmatprep.subr.bf16.mxu0 %v7725_v1 }
 0x6a9   : > { %2192 = vmatpush1.bf16.msra.mxu0 %v7512_v60 }
 0x6aa   : > { %2193 = vmatprep.subr.bf16.mxu0 %v7725_v1 }
 0x6ac   : > { %7011 = vmatmul.mubr.msk.bf16.gmra.mrb[36].mxu0 %vm1489_vm5, %v7492_v49 }
 0x75f   : > { %v1812_v62 = vpop.f32.mrb[20].mxu0 }
 0x760   : > { %v1813_v63 = vadd.f32 %v1812_v62, %v1698_v61  ;;  %v6996_v0 = vpop.f32.mrb[21].mxu0  ;;  %v7513_v61 = vld [vmem:[%s9832_s4 + $0x390] ss:$8 sps:$4 sm:$0xff]   ;;  %v7734_v62 = vmov 6  }
 0x761   : > { %v1815_v3 = vpop.f32.mrb[22].mxu0  ;;  %2194 = vmatpush1.bf16.msra.mxu0 %v7513_v61  ;;  %7325 = vset.pattern.permute.xlu1 %v7734_v62 }
 0x762   : > { %v1816_v4 = vadd.f32 %v1815_v3, %v1703_v2  ;;  %v6997_v5 = vpop.f32.mrb[23].mxu0  ;;  %v1850_v6 = vmax.f32 %v1813_v63, 0.0  ;;  %7324 = vset.pattern.permute.xlu0 %v7734_v62  ;;  %2077 = vperm.xlu1 %7325, %v8264_v21   ;;  %v1867_v63 = vld [vmem:[%s9833_s5] sm:$0xff]  ;;  %v1869_v2 = vld [vmem:[%s9833_s5 + $0x10] sm:$0xff]  ;;  %v1868_v3 = vld [vmem:[%s9833_s5 + $0x8] sm:$0xff] }
 0x763   : > { %2073 = vperm.xlu0 %7324, %v8224_v44   ;;  %v1870_v5 = vld [vmem:[%s9833_s5 + $0x18] sm:$0xff] }
 0x764   : > { %v1851_v7 = vmax.f32 %v1816_v4, 0.0 }
 0x766   : > { %v1885_v8 = vpack.c.bf16 %v1851_v7, %v1850_v6  ;;  %2081 = vperm.xlu1 %7325, %v8257_v32  }
 0x767   : > { %v1820_v10 = vpop.f32.mrb[24].mxu0  ;;  %2085 = vperm.xlu0 %7324, %v8276_v23  }
 0x768   : > { %v1821_v11 = vadd.f32 %v1820_v10, %v1708_v9  ;;  %v7000_v12 = vpop.f32.mrb[25].mxu0  ;;  %6476 = vmatmul.mubr.msk.bf16.vlgmr.msra.gmra.mrb[20].mxu1 %vm1344_vm4, %v1885_v8 }
 0x769   : > { %v1823_v14 = vpop.f32.mrb[26].mxu0  ;;  %1987 = vmatprep.mubr.bf16.mxu1 %v7725_v1 }
 0x76a   : > { %v1824_v15 = vadd.f32 %v1823_v14, %v1713_v13  ;;  %v7001_v16 = vpop.f32.mrb[27].mxu0  ;;  %v1852_v17 = vmax.f32 %v1821_v11, 0.0  ;;  %2089 = vperm.xlu1 %7325, %v8288_v25   ;;  %v1871_v14 = vld [vmem:[%s9833_s5 + $0x20] sm:$0xff] }
 0x76b   : > { %2093 = vperm.xlu0 %7324, %v8269_v22   ;;  %v1873_v16 = vld [vmem:[%s9833_s5 + $0x30] sm:$0xff] }
 0x76c   : > { %v1853_v18 = vmax.f32 %v1824_v15, 0.0 }
 0x76e   : > { %v1886_v19 = vpack.c.bf16 %v1853_v18, %v1852_v17  ;;  %2097 = vperm.xlu1 %7325, %v8300_v28   ;;  %v1872_v17 = vld [vmem:[%s9833_s5 + $0x28] sm:$0xff] }
 0x76f   : > { %v1828_v31 = vpop.f32.mrb[28].mxu0  ;;  %2101 = vperm.xlu0 %7324, %v8281_v24  }
 0x770   : > { %v1829_v26 = vadd.f32 %v1828_v31, %v1718_v20  ;;  %v7004_v27 = vpop.f32.mrb[29].mxu0  ;;  %6477 = vmatmul.mubr.msk.bf16.gmra.mrb[24].mxu1 %vm1344_vm4, %v1886_v19  ;;  %v1874_v19 = vld [vmem:[%s9833_s5 + $0x38] sm:$0xff] }
 0x771   : > { %v1831_v33 = vpop.f32.mrb[30].mxu0  ;;  %1997 = vmatprep.mubr.bf16.mxu1 %v7725_v1 }
 0x772   : > { %v1832_v35 = vadd.f32 %v1831_v33, %v1723_v30  ;;  %v7005_v36 = vpop.f32.mrb[31].mxu0  ;;  %v1854_v37 = vmax.f32 %v1829_v26, 0.0  ;;  %2105 = vperm.xlu1 %7325, %v8312_v34  }
 0x774   : > { %v1855_v38 = vmax.f32 %v1832_v35, 0.0 }
 0x776   : > { %v1887_v39 = vpack.c.bf16 %v1855_v38, %v1854_v37  ;;  %v1875_v37 = vld [vmem:[%s9833_s5 + $0x40] sm:$0xff] }
 0x777   : > { %v1836_v41 = vpop.f32.mrb[32].mxu0 }
 0x778   : > { %v1837_v42 = vadd.f32 %v1836_v41, %v1728_v40  ;;  %v7008_v43 = vpop.f32.mrb[33].mxu0  ;;  %6478 = vmatmul.mubr.msk.bf16.gmra.mrb[28].mxu1 %vm1344_vm4, %v1887_v39  ;;  %v1877_v39 = vld [vmem:[%s9833_s5 + $0x50] sm:$0xff]  ;;  %v1876_v40 = vld [vmem:[%s9833_s5 + $0x48] sm:$0xff] }
 0x779   : > { %v1839_v46 = vpop.f32.mrb[34].mxu0  ;;  %2007 = vmatprep.mubr.bf16.mxu1 %v7725_v1 }
 0x77a   : > { %v1840_v47 = vadd.f32 %v1839_v46, %v1733_v45  ;;  %v7009_v48 = vpop.f32.mrb[35].mxu0  ;;  %v1856_v49 = vmax.f32 %v1837_v42, 0.0  ;;  %v1878_v42 = vld [vmem:[%s9833_s5 + $0x58] sm:$0xff] }
 0x77c   : > { %v1857_v50 = vmax.f32 %v1840_v47, 0.0 }
 0x77e   : > { %v1888_v51 = vpack.c.bf16 %v1857_v50, %v1856_v49 }
 0x77f   : > { %v1844_v53 = vpop.f32.mrb[36].mxu0 }
 0x780   : > { %v1845_v54 = vadd.f32 %v1844_v53, %v1738_v52  ;;  %6479 = vmatmul.mubr.msk.bf16.gmra.mrb[32].mxu1 %vm1344_vm4, %v1888_v51  ;;  %v7012_v55 = vpop.f32.mrb[37].mxu0  ;;  %v1879_v52 = vld [vmem:[%s9833_s5 + $0x60] sm:$0xff] }
 0x781   : > { %v1847_v56 = vpop.f32.mrb[38].mxu0  ;;  %2017 = vmatprep.mubr.bf16.mxu1 %v7725_v1  ;;  %v1880_v55 = vld [vmem:[%s9833_s5 + $0x68] sm:$0xff] }
 0x782   : > { %v1858_v57 = vmax.f32 %v1845_v54, 0.0  ;;  %v7013_v58 = vpop.f32.mrb[39].mxu0  ;;  %v1881_v54 = vld [vmem:[%s9833_s5 + $0x70] sm:$0xff] }
 0x784   : > { %v1889_v59 = vpack.c.bf16 %v1858_v57, %v1858_v57  ;;  %v1882_v57 = vld [vmem:[%s9833_s5 + $0x78] sm:$0xff] }
 0x788   : > { %6480 = vmatmul.mubr.msk.bf16.gmra.mrb[36].mxu1 %vm1344_vm4, %v1889_v59 }
 0x83b   : > { %v1979_v0 = vpop.f32.mrb[20].mxu1 }
 0x83c   : > { %v1981_v4 = vpop.f32.mrb[21].mxu1  ;;  %v2026_v7 = vmul.f32 %v1979_v0, %v1867_v63 }
 0x83d   : > { %v1983_v6 = vpop.f32.mrb[22].mxu1  ;;  %v2027_v10 = vmul.f32 %v1981_v4, %v1868_v3  ;;  %v1884_v3 = vld [vmem:[%s9833_s5 + $0x88] sm:$0xff]  ;;  %v1883_v4 = vld [vmem:[%s9833_s5 + $0x80] sm:$0xff] }
 0x83e   : > { %v2028_v8 = vmul.f32 %v1983_v6, %v1869_v2  ;;  %v1985_v9 = vpop.f32.mrb[23].mxu1 }
 0x83f   : > { %v2029_v11 = vmul.f32 %v1985_v9, %v1870_v5 }
 0x840   : > { %v2044_v12 = vpack.c.bf16 %v2028_v8, %v2026_v7 }
 0x841   : > { %v2045_v13 = vpack.c.bf16 %v2029_v11, %v2027_v10 }
 0x843   : > { %v1989_v15 = vpop.f32.mrb[24].mxu1  ;;  %6490 = vmatprep.mubr.msk.bf16.mxu0 %vm1489_vm5, %v2045_v13  ;;  %v7514_v13 = vld [vmem:[%s9832_s4 + $0x3a0] ss:$8 sps:$4 sm:$0xff]  }
 0x844   : > { %v1991_v18 = vpop.f32.mrb[25].mxu1  ;;  %2210 = vmatmul.mubr.bf16.vlgmr.msra.gmra.mrb[40].mxu0 %v2044_v12  ;;  %v2030_v31 = vmul.f32 %v1989_v15, %v1871_v14  ;;  %7024 = vmatprep.mubr.msk.bf16.mxu1 %vm2292_vm7, %v7514_v13  ;;  %v7735_v14 = vmov 7   ;;  %v2074_v15 = vpop.permute.xlu0 %2073 }
 0x845   : > { %v1993_v20 = vpop.f32.mrb[26].mxu1  ;;  %v2031_v30 = vmul.f32 %v1991_v18, %v1872_v17  ;;  %7327 = vset.pattern.permute.xlu1 %v7735_v14  ;;  %7326 = vset.pattern.permute.xlu0 %v7735_v14 }
 0x846   : > { %v2032_v26 = vmul.f32 %v1993_v20, %v1873_v16  ;;  %v1995_v27 = vpop.f32.mrb[27].mxu1  ;;  %2276 = vperm.xlu1 %7327, %v8264_v21   ;;  %2271 = vperm.xlu0 %7326, %v8224_v44  }
 0x847   : > { %v2033_v33 = vmul.f32 %v1995_v27, %v1874_v19  ;;  %v2078_v19 = vpop.permute.xlu1 %2077 }
 0x848   : > { %v2046_v35 = vpack.c.bf16 %v2032_v26, %v2030_v31 }
 0x849   : > { %v2047_v36 = vpack.c.bf16 %v2033_v33, %v2031_v30 }
 0x84a   : > { %2281 = vperm.xlu1 %7327, %v8257_v32  }
 0x84b   : > { %v1999_v38 = vpop.f32.mrb[28].mxu1  ;;  %6491 = vmatprep.mubr.msk.bf16.mxu0 %vm1489_vm5, %v2047_v36 }
 0x84c   : > { %v2001_v41 = vpop.f32.mrb[29].mxu1  ;;  %2218 = vmatmul.mubr.bf16.gmra.mrb[44].mxu0 %v2046_v35  ;;  %v2034_v45 = vmul.f32 %v1999_v38, %v1875_v37  ;;  %v2082_v35 = vpop.permute.xlu1 %2081 }
 0x84d   : > { %v2003_v43 = vpop.f32.mrb[30].mxu1  ;;  %v2035_v48 = vmul.f32 %v2001_v41, %v1876_v40 }
 0x84e   : > { %v2036_v46 = vmul.f32 %v2003_v43, %v1877_v39  ;;  %v2005_v47 = vpop.f32.mrb[31].mxu1  ;;  %v2086_v39 = vpop.permute.xlu0 %2085 }
 0x84f   : > { %v2037_v49 = vmul.f32 %v2005_v47, %v1878_v42 }
 0x850   : > { %v2048_v50 = vpack.c.bf16 %v2036_v46, %v2034_v45  ;;  %v2090_v47 = vpop.permute.xlu1 %2089 }
 0x851   : > { %v2049_v51 = vpack.c.bf16 %v2037_v49, %v2035_v48 }
 0x853   : > { %v2009_v53 = vpop.f32.mrb[32].mxu1  ;;  %6492 = vmatprep.mubr.msk.bf16.mxu0 %vm1489_vm5, %v2049_v51  ;;  %v2094_v51 = vpop.permute.xlu0 %2093 }
 0x854   : > { %v2011_v56 = vpop.f32.mrb[33].mxu1  ;;  %2226 = vmatmul.mubr.bf16.gmra.mrb[48].mxu0 %v2048_v50  ;;  %v2038_v59 = vmul.f32 %v2009_v53, %v1879_v52 }
 0x855   : > { %v2013_v58 = vpop.f32.mrb[34].mxu1  ;;  %v2039_v62 = vmul.f32 %v2011_v56, %v1880_v55 }
 0x856   : > { %v2040_v60 = vmul.f32 %v2013_v58, %v1881_v54  ;;  %v2015_v61 = vpop.f32.mrb[35].mxu1  ;;  %v2098_v58 = vpop.permute.xlu1 %2097 }
 0x857   : > { %v2041_v63 = vmul.f32 %v2015_v61, %v1882_v57 }
 0x858   : > { %v2050_v0 = vpack.c.bf16 %v2040_v60, %v2038_v59 }
 0x859   : > { %v2051_v2 = vpack.c.bf16 %v2041_v63, %v2039_v62  ;;  %v2102_v62 = vpop.permute.xlu0 %2101 }
 0x85b   : > { %v2019_v5 = vpop.f32.mrb[36].mxu1  ;;  %6493 = vmatprep.mubr.msk.bf16.mxu0 %vm1489_vm5, %v2051_v2 }
 0x85c   : > { %v2021_v6 = vpop.f32.mrb[37].mxu1  ;;  %2234 = vmatmul.mubr.bf16.gmra.mrb[52].mxu0 %v2050_v0  ;;  %v2042_v9 = vmul.f32 %v2019_v5, %v1883_v4 }
 0x85d   : > { %v2043_v7 = vmul.f32 %v2021_v6, %v1884_v3  ;;  %v2023_v8 = vpop.f32.mrb[38].mxu1  ;;  %v2106_v6 = vpop.permute.xlu1 %2105 }
 0x85e   : > { %v2024_v10 = vpop.f32.mrb[39].mxu1  ;;  %v2052_v12 = vpack.c.bf16 %v2042_v9, %v2042_v9 }
 0x85f   : > { %v2053_v11 = vpack.c.bf16 %v2043_v7, %v2043_v7 }
 0x861   : > { %6494 = vmatprep.mubr.msk.bf16.mxu0 %vm1489_vm5, %v2053_v11 }
 0x864   : > { %2242 = vmatmul.mubr.bf16.gmra.mrb[56].mxu0 %v2052_v12 }
 0x865   : > { %2660 = vmatprep.mubr.bf16.mxu0 %v7725_v1 }
 0x917   : > { %v2211_v16 = vpop.f32.mrb[40].mxu0 }
 0x918   : > { %v2212_v17 = vadd.f32 %v2211_v16, %v2074_v15  ;;  %v2213_v18 = vpop.f32.mrb[41].mxu0  ;;  %v7515_v15 = vld [vmem:[%s9832_s4 + $0x3b0] ss:$0 sps:$4 sm:$0xff]   ;;  %v7516_v16 = vld [vmem:[%s9832_s4 + $0x3c0] ss:$8 sps:$4 sm:$0xff]  }
 0x919   : > { %v2214_v20 = vpop.f32.mrb[42].mxu0  ;;  %v7736_v18 = vmov 8  }
 0x91a   : > { %v2215_v31 = vadd.f32 %v2214_v20, %v2078_v19  ;;  %v2216_v26 = vpop.f32.mrb[43].mxu0  ;;  %v2249_v27 = vmax.f32 %v2212_v17, 0.0  ;;  %v7522_v17 = vld [vmem:[%s9832_s4 + $0x420] ss:$8 sps:$4 sm:$0xff]   ;;  %7329 = vset.pattern.permute.xlu1 %v7736_v18  ;;  %7328 = vset.pattern.permute.xlu0 %v7736_v18  ;;  %v7524_v19 = vld [vmem:[%s9832_s4 + $0x424] ss:$8 sps:$4 sm:$0xff]  }
 0x91b   : > { %2381 = vperm.xlu1 %7329, %v8264_v21   ;;  %2376 = vperm.xlu0 %7328, %v8224_v44   ;;  %v8503_v20 = vld [vmem:[%s9831_s3 + $0x48] sm:$0xff]  ;;  %v8510_v44 = vld [vmem:[%s9831_s3 + $0x50] sm:$0xff] }
 0x91c   : > { %v2250_v30 = vmax.f32 %v2215_v31, 0.0  ;;  %2628 = vmatprep.subr.bf16.mxu0 %v7524_v19  ;;  %v2277_v31 = vpop.permute.xlu1 %2276 }
 0x91d   : > { %2629 = vmatpush1.bf16.msra.mxu0 %v7522_v17 }
 0x91e   : > { %v2261_v33 = vpack.c.bf16 %v2250_v30, %v2249_v27  ;;  %v2272_v30 = vpop.permute.xlu0 %2271 }
 0x91f   : > { %v2219_v36 = vpop.f32.mrb[44].mxu0  ;;  %2386 = vperm.xlu1 %7329, %v8257_v32   ;;  %2391 = vperm.xlu0 %7328, %v8276_v23  }
 0x920   : > { %v2220_v37 = vadd.f32 %v2219_v36, %v2082_v35  ;;  %v2221_v38 = vpop.f32.mrb[45].mxu0  ;;  %7014 = vmatprep.subr.bf16.mxu1 %v2261_v33  ;;  %v2282_v26 = vpop.permute.xlu1 %2281 }
 0x921   : > { %v2222_v40 = vpop.f32.mrb[46].mxu0  ;;  %7015 = vmatpush3.bf16.msra.mxu1 %v2261_v33 }
 0x922   : > { %v2223_v41 = vadd.f32 %v2222_v40, %v2086_v39  ;;  %v2224_v42 = vpop.f32.mrb[47].mxu0  ;;  %v2251_v43 = vmax.f32 %v2220_v37, 0.0 }
 0x923   : > { %2396 = vperm.xlu1 %7329, %v8288_v25   ;;  %2401 = vperm.xlu0 %7328, %v8269_v22  }
 0x924   : > { %v2252_v45 = vmax.f32 %v2223_v41, 0.0 }
 0x926   : > { %v2262_v46 = vpack.c.bf16 %v2252_v45, %v2251_v43  ;;  %v7517_v43 = vld [vmem:[%s9832_s4 + $0x3d0] ss:$8 sps:$4 sm:$0xff]   ;;  %v7518_v45 = vld [vmem:[%s9832_s4 + $0x3e0] ss:$8 sps:$4 sm:$0xff]  }
 0x927   : > { %v2227_v48 = vpop.f32.mrb[48].mxu0  ;;  %2406 = vperm.xlu1 %7329, %v8300_v28   ;;  %2411 = vperm.xlu0 %7328, %v8281_v24  }
 0x928   : > { %v2228_v49 = vadd.f32 %v2227_v48, %v2090_v47  ;;  %v2229_v50 = vpop.f32.mrb[49].mxu0  ;;  %7016 = vmatprep.subr.bf16.mxu1 %v2262_v46  ;;  %v7520_v47 = vld [vmem:[%s9832_s4 + $0x400] ss:$8 sps:$4 sm:$0xff]   ;;  %v7521_v48 = vld [vmem:[%s9832_s4 + $0x410] ss:$0 sps:$4 sm:$0xff]  }
 0x929   : > { %v2230_v52 = vpop.f32.mrb[50].mxu0  ;;  %7017 = vmatpush3.bf16.msra.mxu1 %v2262_v46  ;;  %v7519_v46 = vld [vmem:[%s9832_s4 + $0x3f0] ss:$8 sps:$4 sm:$0xff]   ;;  %v7526_v50 = vld [vmem:[%s9832_s4 + $0x440] ss:$8 sps:$4 sm:$0xff]  }
 0x92a   : > { %v2231_v53 = vadd.f32 %v2230_v52, %v2094_v51  ;;  %v2232_v54 = vpop.f32.mrb[51].mxu0  ;;  %v2253_v55 = vmax.f32 %v2228_v49, 0.0  ;;  %v7525_v49 = vld [vmem:[%s9832_s4 + $0x430] ss:$8 sps:$4 sm:$0xff]   ;;  %v7528_v52 = vld [vmem:[%s9832_s4 + $0x460] ss:$8 sps:$4 sm:$0xff]  }
 0x92b   : > { %2416 = vperm.xlu1 %7329, %v8312_v34   ;;  %2421 = vperm.xlu0 %7328, %v8503_v20   ;;  %v7527_v51 = vld [vmem:[%s9832_s4 + $0x450] ss:$8 sps:$4 sm:$0xff]   ;;  %v7530_v54 = vld [vmem:[%s9832_s4 + $0x480] ss:$8 sps:$4 sm:$0xff]  }
 0x92c   : > { %v2254_v56 = vmax.f32 %v2231_v53, 0.0  ;;  %v7529_v53 = vld [vmem:[%s9832_s4 + $0x470] ss:$8 sps:$4 sm:$0xff]  }
 0x92e   : > { %v2263_v57 = vpack.c.bf16 %v2254_v56, %v2253_v55  ;;  %v7531_v55 = vld [vmem:[%s9832_s4 + $0x490] ss:$8 sps:$4 sm:$0xff]  }
 0x92f   : > { %v2235_v59 = vpop.f32.mrb[52].mxu0  ;;  %2426 = vperm.xlu1 %7329, %v8510_v44  }
 0x930   : > { %v2236_v60 = vadd.f32 %v2235_v59, %v2098_v58  ;;  %v2237_v61 = vpop.f32.mrb[53].mxu0  ;;  %7018 = vmatprep.subr.bf16.mxu1 %v2263_v57 }
 0x931   : > { %v2238_v63 = vpop.f32.mrb[54].mxu0  ;;  %7019 = vmatpush3.bf16.msra.mxu1 %v2263_v57 }
 0x932   : > { %v2239_v0 = vadd.f32 %v2238_v63, %v2102_v62  ;;  %v2240_v2 = vpop.f32.mrb[55].mxu0  ;;  %v2255_v3 = vmax.f32 %v2236_v60, 0.0 }
 0x934   : > { %v2256_v4 = vmax.f32 %v2239_v0, 0.0 }
 0x936   : > { %v2264_v5 = vpack.c.bf16 %v2256_v4, %v2255_v3 }
 0x937   : > { %v2243_v7 = vpop.f32.mrb[56].mxu0 }
 0x938   : > { %v2244_v8 = vadd.f32 %v2243_v7, %v2106_v6  ;;  %v2245_v9 = vpop.f32.mrb[57].mxu0  ;;  %7020 = vmatprep.subr.bf16.mxu1 %v2264_v5 }
 0x939   : > { %v2246_v10 = vpop.f32.mrb[58].mxu0  ;;  %7021 = vmatpush3.bf16.msra.mxu1 %v2264_v5 }
 0x93a   : > { %v2257_v11 = vmax.f32 %v2244_v8, 0.0  ;;  %v2247_v12 = vpop.f32.mrb[59].mxu0 }
 0x93c   : > { %v2265_v13 = vpack.c.bf16 %v2257_v11, %v2257_v11 }
 0x93e   : > { %7292 = vmatprep.subr.msk.bf16.mxu1 %vm309_vm0, %v2265_v13  ;;  %v2300_v14 = vsel %vm309_vm0, %v2265_v13, 0 }
 0x93f   : > { %7023 = vmatpush3.bf16.msra.mxu1 %v2300_v14 }
 0x942   : > { %7025 = vmatmul.mubr.msk.bf16.vlgmr.msra.gmra.mrb[40].mxu1 %vm2292_vm7, %v7515_v15  ;;  %vm6125_vm7 = vcmask 392192  }
 0x943   : > { %7032 = vmatprep.mubr.msk.bf16.mxu1 %vm2457_vm8, %v7516_v16 }
 0x99a   : > { %v2382_v56 = vpop.permute.xlu1 %2381  ;;  %v2377_v57 = vpop.permute.xlu0 %2376 }
 0x99e   : > { %v2387_v58 = vpop.permute.xlu1 %2386  ;;  %v2392_v59 = vpop.permute.xlu0 %2391 }
 0x9a2   : > { %v2397_v63 = vpop.permute.xlu1 %2396  ;;  %v2402_v5 = vpop.permute.xlu0 %2401 }
 0x9a6   : > { %v2407_v12 = vpop.permute.xlu1 %2406  ;;  %v2412_v17 = vpop.permute.xlu0 %2411 }
 0xa15   : > { %v7026_v27 = vpop.f32.mrb[40].mxu1 }
 0xa16   : > { %v2336_v33 = vpop.f32.mrb[41].mxu1  ;;  %v8513_v37 = vadd.f32 %v7026_v27, %v2282_v26 }
 0xa17   : > { %v7027_v35 = vpop.f32.mrb[42].mxu1  ;;  %v8515_v38 = vadd.f32 %v2336_v33, %v2272_v30 }
 0xa18   : > { %v2339_v36 = vpop.f32.mrb[43].mxu1  ;;  %v2362_v41 = vpack.c.bf16 %v8513_v37, %v8513_v37 }
 0xa19   : > { %v8517_v39 = vadd.f32 %v2339_v36, %v2277_v31 }
 0xa1a   : > { %v2477_v42 = vsel %vm309_vm0, %v2362_v41, 0 }
 0xa1b   : > { %v2361_v40 = vpack.c.bf16 %v8517_v39, %v8515_v38 }
 0xa1d   : > { %7028 = vmatprep.subr.bf16.mxu1 %v2361_v40 }
 0xa1e   : > { %7029 = vmatpush3.bf16.msra.mxu1 %v2361_v40 }
 0xa1f   : > { %7293 = vmatprep.subr.msk.bf16.mxu1 %vm309_vm0, %v2362_v41 }
 0xa22   : > { %7031 = vmatpush3.bf16.msra.mxu1 %v2477_v42 }
 0xa23   : > { %2887 = vmatprep.subr.bf16.mxu1 %v7725_v1 }
 0xa25   : > { %7033 = vmatmul.mubr.msk.bf16.vlgmr.msra.gmra.mrb[44].mxu1 %vm2457_vm8, %v7517_v43  ;;  %v2417_v43 = vpop.permute.xlu1 %2416 }
 0xa26   : > { %7036 = vmatprep.mubr.msk.bf16.mxu1 %vm2457_vm8, %v7518_v45  ;;  %2888 = vmatpush1.bf16.msra.mxu1 %v7525_v49 }
 0xa27   : > { %2889 = vmatprep.subr.bf16.mxu1 %v7725_v1 }
 0xa2a   : > { %2890 = vmatpush1.bf16.msra.mxu1 %v7526_v50 }
 0xa2b   : > { %2891 = vmatprep.subr.bf16.mxu1 %v7725_v1 }
 0xa2d   : > { %7037 = vmatmul.mubr.msk.bf16.gmra.mrb[48].mxu1 %vm2457_vm8, %v7519_v46 }
 0xa2e   : > { %7040 = vmatprep.mubr.msk.bf16.mxu1 %vm2457_vm8, %v7520_v47  ;;  %2892 = vmatpush1.bf16.msra.mxu1 %v7527_v51 }
 0xa2f   : > { %2893 = vmatprep.subr.bf16.mxu1 %v7725_v1 }
 0xa32   : > { %2894 = vmatpush1.bf16.msra.mxu1 %v7528_v52 }
 0xa33   : > { %2895 = vmatprep.subr.bf16.mxu1 %v7725_v1 }
 0xa35   : > { %7041 = vmatmul.mubr.msk.bf16.gmra.mrb[52].mxu1 %vm2457_vm8, %v7521_v48  ;;  %v2422_v48 = vpop.permute.xlu0 %2421 }
 0xa36   : > { %2896 = vmatpush1.bf16.msra.mxu1 %v7529_v53 }
 0xa37   : > { %2897 = vmatprep.subr.bf16.mxu1 %v7725_v1 }
 0xa3a   : > { %2898 = vmatpush1.bf16.msra.mxu1 %v7530_v54  ;;  %v2427_v54 = vpop.permute.xlu1 %2426 }
 0xa3b   : > { %2899 = vmatprep.subr.bf16.mxu1 %v7725_v1 }
 0xa3e   : > { %2900 = vmatpush1.bf16.msra.mxu1 %v7531_v55 }
 0xa3f   : > { %2901 = vmatprep.subr.bf16.mxu1 %v7725_v1 }
 0xaf8   : > { %v7034_v60 = vpop.f32.mrb[44].mxu1 }
 0xaf9   : > { %v2522_v61 = vadd.f32 %v7034_v60, %v2387_v58  ;;  %v2513_v62 = vpop.f32.mrb[45].mxu1  ;;  %v7532_v58 = vld [vmem:[%s9832_s4 + $0x4a0] ss:$8 sps:$4 sm:$0xff]   ;;  %v7737_v60 = vmov 9  }
 0xafa   : > { %v2514_v0 = vadd.f32 %v2513_v62, %v2377_v57  ;;  %v7035_v2 = vpop.f32.mrb[46].mxu1  ;;  %2902 = vmatpush1.bf16.msra.mxu1 %v7532_v58  ;;  %7331 = vset.pattern.permute.xlu1 %v7737_v60 }
 0xafb   : > { %v2525_v3 = vadd.f32 %v7035_v2, %v2392_v59  ;;  %v2516_v4 = vpop.f32.mrb[47].mxu1  ;;  %v2561_v7 = vmax.f32 %v2522_v61, 0.0  ;;  %2903 = vmatprep.subr.bf16.mxu1 %v7725_v1  ;;  %v7533_v59 = vld [vmem:[%s9832_s4 + $0x4b0] ss:$8 sps:$4 sm:$0xff]   ;;  %7330 = vset.pattern.permute.xlu0 %v7737_v60  ;;  %v8597_v61 = vld [vmem:[%s9831_s3] sm:$0xff] }
 0xafc   : > { %v2517_v6 = vadd.f32 %v2516_v4, %v2382_v56  ;;  %v2559_v9 = vmax.f32 %v2514_v0, 0.0  ;;  %2776 = vperm.xlu1 %7331, %v8264_v21   ;;  %2772 = vperm.xlu0 %7330, %v8597_v61  }
 0xafd   : > { %v2562_v8 = vmax.f32 %v2525_v3, 0.0  ;;  %v2576_v3 = vld [vmem:[%s9833_s5 + $0xb0] sm:$0xff] }
 0xafe   : > { %v2560_v10 = vmax.f32 %v2517_v6, 0.0  ;;  %2904 = vmatpush1.bf16.msra.mxu1 %v7533_v59  ;;  %v2577_v6 = vld [vmem:[%s9833_s5 + $0xb8] sm:$0xff]  ;;  %v2588_v59 = vld [vmem:[%s9833_s5 + $0x110] sm:$0xff] }
 0xaff   : > { %v2595_v11 = vpack.c.bf16 %v2562_v8, %v2561_v7  ;;  %7098 = vmatprep.subr.bf16.mxu1 %v7727_v29  ;;  %v2579_v8 = vld [vmem:[%s9833_s5 + $0xc8] sm:$0xff] }
 0xb00   : > { %v2594_v13 = vpack.c.bf16 %v2560_v10, %v2559_v9  ;;  %v7038_v14 = vpop.f32.mrb[48].mxu1  ;;  %2780 = vperm.xlu1 %7331, %v8257_v32   ;;  %2784 = vperm.xlu0 %7330, %v8276_v23   ;;  %v2572_v32 = vld [vmem:[%s9833_s5 + $0x90] sm:$0xff]  ;;  %v2574_v23 = vld [vmem:[%s9833_s5 + $0xa0] sm:$0xff] }
 0xb01   : > { %v2538_v15 = vadd.f32 %v7038_v14, %v2407_v12  ;;  %v2529_v16 = vpop.f32.mrb[49].mxu1 }
 0xb02   : > { %v2530_v18 = vadd.f32 %v2529_v16, %v2397_v63  ;;  %v7039_v19 = vpop.f32.mrb[50].mxu1  ;;  %6513 = vmatmul.mubr.msk.bf16.vlgmr.msra.gmra.mrb[60].mxu0 %vm1489_vm5, %v2594_v13 }
 0xb03   : > { %v2541_v31 = vadd.f32 %v7039_v19, %v2412_v17  ;;  %v2532_v26 = vpop.f32.mrb[51].mxu1  ;;  %2670 = vmatprep.mubr.bf16.mxu0 %v7725_v1  ;;  %v2565_v30 = vmax.f32 %v2538_v15, 0.0  ;;  %v2580_v17 = vld [vmem:[%s9833_s5 + $0xd0] sm:$0xff]  ;;  %v2582_v19 = vld [vmem:[%s9833_s5 + $0xe0] sm:$0xff] }
 0xb04   : > { %v2533_v27 = vadd.f32 %v2532_v26, %v2402_v5  ;;  %v2563_v35 = vmax.f32 %v2530_v18, 0.0  ;;  %2788 = vperm.xlu1 %7331, %v8288_v25   ;;  %2792 = vperm.xlu0 %7330, %v8269_v22   ;;  %v2573_v22 = vld [vmem:[%s9833_s5 + $0x98] sm:$0xff]  ;;  %v2575_v25 = vld [vmem:[%s9833_s5 + $0xa8] sm:$0xff]  ;;  %v2578_v5 = vld [vmem:[%s9833_s5 + $0xc0] sm:$0xff] }
 0xb05   : > { %v2566_v33 = vmax.f32 %v2541_v31, 0.0  ;;  %v2581_v31 = vld [vmem:[%s9833_s5 + $0xd8] sm:$0xff] }
 0xb06   : > { %v2564_v36 = vmax.f32 %v2533_v27, 0.0  ;;  %v2583_v27 = vld [vmem:[%s9833_s5 + $0xe8] sm:$0xff] }
 0xb07   : > { %v2597_v40 = vpack.c.bf16 %v2566_v33, %v2565_v30 }
 0xb08   : > { %v2596_v41 = vpack.c.bf16 %v2564_v36, %v2563_v35  ;;  %v7042_v42 = vpop.f32.mrb[52].mxu1  ;;  %2796 = vperm.xlu1 %7331, %v8300_v28   ;;  %2800 = vperm.xlu0 %7330, %v8281_v24  }
 0xb09   : > { %v2545_v45 = vpop.f32.mrb[53].mxu1  ;;  %v2554_v55 = vadd.f32 %v7042_v42, %v2427_v54 }
 0xb0a   : > { %v2546_v46 = vadd.f32 %v2545_v45, %v2417_v43  ;;  %v7043_v47 = vpop.f32.mrb[54].mxu1  ;;  %6514 = vmatmul.mubr.msk.bf16.gmra.mrb[64].mxu0 %vm1489_vm5, %v2595_v11  ;;  %v2584_v45 = vld [vmem:[%s9833_s5 + $0xf0] sm:$0xff] }
 0xb0b   : > { %v2548_v49 = vpop.f32.mrb[55].mxu1  ;;  %2680 = vmatprep.mubr.bf16.mxu0 %v7725_v1  ;;  %v2569_v56 = vmax.f32 %v2554_v55, 0.0  ;;  %v2586_v47 = vld [vmem:[%s9833_s5 + $0x100] sm:$0xff] }
 0xb0c   : > { %v2549_v50 = vadd.f32 %v2548_v49, %v2422_v48  ;;  %v2567_v51 = vmax.f32 %v2546_v46, 0.0  ;;  %2804 = vperm.xlu1 %7331, %v8312_v34   ;;  %2808 = vperm.xlu0 %7330, %v8503_v20   ;;  %v2585_v48 = vld [vmem:[%s9833_s5 + $0xf8] sm:$0xff] }
 0xb0d   : > { %v2599_v57 = vpack.c.bf16 %v2569_v56, %v2569_v56 }
 0xb0e   : > { %v2568_v52 = vmax.f32 %v2549_v50, 0.0  ;;  %v2587_v50 = vld [vmem:[%s9833_s5 + $0x108] sm:$0xff] }
 0xb10   : > { %v2598_v53 = vpack.c.bf16 %v2568_v52, %v2567_v51  ;;  %2812 = vperm.xlu1 %7331, %v8510_v44  }
 0xb12   : > { %6515 = vmatmul.mubr.msk.bf16.gmra.mrb[68].mxu0 %vm1489_vm5, %v2596_v41 }
 0xb13   : > { %2690 = vmatprep.mubr.bf16.mxu0 %v7725_v1 }
 0xb1a   : > { %6516 = vmatmul.mubr.msk.bf16.gmra.mrb[72].mxu0 %vm1489_vm5, %v2597_v40 }
 0xb1b   : > { %2700 = vmatprep.mubr.bf16.mxu0 %v7725_v1 }
 0xb22   : > { %6517 = vmatmul.mubr.msk.bf16.gmra.mrb[76].mxu0 %vm1489_vm5, %v2598_v53 }
 0xb23   : > { %2710 = vmatprep.mubr.bf16.mxu0 %v7725_v1 }
 0xb2a   : > { %6518 = vmatmul.mubr.msk.bf16.gmra.mrb[80].mxu0 %vm1489_vm5, %v2599_v57 }
 0xbd5   : > { %v2662_v21 = vpop.f32.mrb[60].mxu0 }
 0xbd6   : > { %v2664_v24 = vpop.f32.mrb[61].mxu0  ;;  %v2719_v34 = vmul.f32 %v2662_v21, %v2572_v32  ;;  %v2590_v32 = vld [vmem:[%s9833_s5 + $0x120] sm:$0xff]  ;;  %v2589_v21 = vld [vmem:[%s9833_s5 + $0x118] sm:$0xff] }
 0xbd7   : > { %v2666_v28 = vpop.f32.mrb[62].mxu0  ;;  %v2720_v62 = vmul.f32 %v2664_v24, %v2573_v22  ;;  %v2591_v22 = vld [vmem:[%s9833_s5 + $0x128] sm:$0xff] }
 0xbd8   : > { %v2721_v20 = vmul.f32 %v2666_v28, %v2574_v23  ;;  %v2668_v44 = vpop.f32.mrb[63].mxu0 }
 0xbd9   : > { %v2722_v63 = vmul.f32 %v2668_v44, %v2575_v25 }
 0xbda   : > { %v2741_v0 = vpack.c.bf16 %v2721_v20, %v2719_v34 }
 0xbdb   : > { %v2742_v2 = vpack.c.bf16 %v2722_v63, %v2720_v62 }
 0xbdd   : > { %v2672_v4 = vpop.f32.mrb[64].mxu0  ;;  %6528 = vmatprep.mubr.msk.bf16.mxu1 %vm1489_vm5, %v2742_v2  ;;  %v2592_v2 = vld [vmem:[%s9833_s5 + $0x130] sm:$0xff] }
 0xbde   : > { %v2674_v7 = vpop.f32.mrb[65].mxu0  ;;  %2920 = vmatmul.mubr.bf16.vlgmr.msra.gmra.mrb[56].mxu1 %v2741_v0  ;;  %v2723_v10 = vmul.f32 %v2672_v4, %v2576_v3  ;;  %v2593_v0 = vld [vmem:[%s9833_s5 + $0x138] sm:$0xff] }
 0xbdf   : > { %v2676_v9 = vpop.f32.mrb[66].mxu0  ;;  %v2724_v13 = vmul.f32 %v2674_v7, %v2577_v6 }
 0xbe0   : > { %v2725_v11 = vmul.f32 %v2676_v9, %v2578_v5  ;;  %v2678_v12 = vpop.f32.mrb[67].mxu0 }
 0xbe1   : > { %v2726_v14 = vmul.f32 %v2678_v12, %v2579_v8  ;;  %v7738_v12 = vmov 10  }
 0xbe2   : > { %v2743_v15 = vpack.c.bf16 %v2725_v11, %v2723_v10  ;;  %v7534_v11 = vld [vmem:[%s9832_s4 + $0x4c0] ss:$8 sps:$4 sm:$0xff]   ;;  %7333 = vset.pattern.permute.xlu1 %v7738_v12  ;;  %7332 = vset.pattern.permute.xlu0 %v7738_v12 }
 0xbe3   : > { %v2744_v16 = vpack.c.bf16 %v2726_v14, %v2724_v13  ;;  %7056 = vmatprep.mubr.msk.bf16.mxu0 %vm3007_vm9, %v7534_v11  ;;  %v7715_v13 = vld [vmem:[%s9831_s3 + $0x8] sm:$0xff]  ;;  %2988 = vperm.xlu0 %7332, %v8597_v61   ;;  %v7716_v14 = vld [vmem:[%s9831_s3 + $0x10] sm:$0xff] }
 0xbe4   : > { %2992 = vperm.xlu1 %7333, %v7715_v13  }
 0xbe5   : > { %v2682_v18 = vpop.f32.mrb[68].mxu0  ;;  %6529 = vmatprep.mubr.msk.bf16.mxu1 %vm1489_vm5, %v2744_v16 }
 0xbe6   : > { %v2684_v26 = vpop.f32.mrb[69].mxu0  ;;  %2928 = vmatmul.mubr.bf16.gmra.mrb[60].mxu1 %v2743_v15  ;;  %v2727_v33 = vmul.f32 %v2682_v18, %v2580_v17  ;;  %v2773_v15 = vpop.permute.xlu0 %2772 }
 0xbe7   : > { %v2686_v30 = vpop.f32.mrb[70].mxu0  ;;  %v2728_v40 = vmul.f32 %v2684_v26, %v2581_v31 }
 0xbe8   : > { %v2729_v35 = vmul.f32 %v2686_v30, %v2582_v19  ;;  %v2688_v36 = vpop.f32.mrb[71].mxu0  ;;  %2996 = vperm.xlu1 %7333, %v7716_v14   ;;  %v2777_v19 = vpop.permute.xlu1 %2776 }
 0xbe9   : > { %v2730_v41 = vmul.f32 %v2688_v36, %v2583_v27 }
 0xbea   : > { %v2745_v42 = vpack.c.bf16 %v2729_v35, %v2727_v33 }
 0xbeb   : > { %v2746_v43 = vpack.c.bf16 %v2730_v41, %v2728_v40 }
 0xbec   : > { %v2781_v36 = vpop.permute.xlu1 %2780 }
 0xbed   : > { %v2692_v46 = vpop.f32.mrb[72].mxu0  ;;  %6530 = vmatprep.mubr.msk.bf16.mxu1 %vm1489_vm5, %v2746_v43 }
 0xbee   : > { %v2694_v49 = vpop.f32.mrb[73].mxu0  ;;  %2936 = vmatmul.mubr.bf16.gmra.mrb[64].mxu1 %v2745_v42  ;;  %v2731_v52 = vmul.f32 %v2692_v46, %v2584_v45  ;;  %v2785_v42 = vpop.permute.xlu0 %2784 }
 0xbef   : > { %v2696_v51 = vpop.f32.mrb[74].mxu0  ;;  %v2732_v55 = vmul.f32 %v2694_v49, %v2585_v48 }
 0xbf0   : > { %v2733_v53 = vmul.f32 %v2696_v51, %v2586_v47  ;;  %v2698_v54 = vpop.f32.mrb[75].mxu0 }
 0xbf1   : > { %v2734_v56 = vmul.f32 %v2698_v54, %v2587_v50  ;;  %v2789_v50 = vpop.permute.xlu1 %2788 }
 0xbf2   : > { %v2747_v57 = vpack.c.bf16 %v2733_v53, %v2731_v52  ;;  %v2793_v54 = vpop.permute.xlu0 %2792 }
 0xbf3   : > { %v2748_v58 = vpack.c.bf16 %v2734_v56, %v2732_v55 }
 0xbf5   : > { %v2702_v60 = vpop.f32.mrb[76].mxu0  ;;  %6531 = vmatprep.mubr.msk.bf16.mxu1 %vm1489_vm5, %v2748_v58 }
 0xbf6   : > { %v2704_v23 = vpop.f32.mrb[77].mxu0  ;;  %2944 = vmatmul.mubr.bf16.gmra.mrb[68].mxu1 %v2747_v57  ;;  %v2735_v25 = vmul.f32 %v2702_v60, %v2588_v59 }
 0xbf7   : > { %v2706_v24 = vpop.f32.mrb[78].mxu0  ;;  %v2736_v20 = vmul.f32 %v2704_v23, %v2589_v21 }
 0xbf8   : > { %v2737_v28 = vmul.f32 %v2706_v24, %v2590_v32  ;;  %v2708_v34 = vpop.f32.mrb[79].mxu0  ;;  %v2797_v32 = vpop.permute.xlu1 %2796 }
 0xbf9   : > { %v2738_v44 = vmul.f32 %v2708_v34, %v2591_v22  ;;  %v2801_v24 = vpop.permute.xlu0 %2800 }
 0xbfa   : > { %v2749_v62 = vpack.c.bf16 %v2737_v28, %v2735_v25 }
 0xbfb   : > { %v2750_v63 = vpack.c.bf16 %v2738_v44, %v2736_v20 }
 0xbfd   : > { %v2712_v3 = vpop.f32.mrb[80].mxu0  ;;  %6532 = vmatprep.mubr.msk.bf16.mxu1 %vm1489_vm5, %v2750_v63  ;;  %v2805_v63 = vpop.permute.xlu1 %2804 }
 0xbfe   : > { %v2714_v4 = vpop.f32.mrb[81].mxu0  ;;  %2952 = vmatmul.mubr.bf16.gmra.mrb[72].mxu1 %v2749_v62  ;;  %v2739_v7 = vmul.f32 %v2712_v3, %v2592_v2 }
 0xbff   : > { %v2740_v5 = vmul.f32 %v2714_v4, %v2593_v0  ;;  %v2716_v6 = vpop.f32.mrb[82].mxu0  ;;  %v2809_v4 = vpop.permute.xlu0 %2808 }
 0xc00   : > { %v2717_v8 = vpop.f32.mrb[83].mxu0  ;;  %v2751_v10 = vpack.c.bf16 %v2739_v7, %v2739_v7 }
 0xc01   : > { %v2752_v9 = vpack.c.bf16 %v2740_v5, %v2740_v5  ;;  %v2813_v11 = vpop.permute.xlu1 %2812 }
 0xc03   : > { %6533 = vmatprep.mubr.msk.bf16.mxu1 %vm1489_vm5, %v2752_v9 }
 0xc06   : > { %2960 = vmatmul.mubr.bf16.gmra.mrb[76].mxu1 %v2751_v10 }
 0xc07   : > { %7112 = vmatprep.mubr.msk.bf16.mxu1 %vm7729_vm3, %v7727_v29 }
 0xcb1   : > { %v2921_v16 = vpop.f32.mrb[56].mxu1 }
 0xcb2   : > { %v2922_v17 = vadd.f32 %v2921_v16, %v2773_v15  ;;  %v2923_v18 = vpop.f32.mrb[57].mxu1 }
 0xcb3   : > { %v2924_v31 = vpop.f32.mrb[58].mxu1 }
 0xcb4   : > { %v2925_v26 = vadd.f32 %v2924_v31, %v2777_v19  ;;  %v2926_v27 = vpop.f32.mrb[59].mxu1  ;;  %v2967_v30 = vmax.f32 %v2922_v17, 0.0  ;;  %v7535_v31 = vld [vmem:[%s9832_s4 + $0x4d0] ss:$0 sps:$4 sm:$0xff]  }
 0xcb5   : > { %v2993_v27 = vpop.permute.xlu1 %2992 }
 0xcb6   : > { %v2968_v33 = vmax.f32 %v2925_v26, 0.0  ;;  %v7536_v26 = vld [vmem:[%s9832_s4 + $0x4e0] ss:$8 sps:$4 sm:$0xff]  }
 0xcb8   : > { %v2981_v35 = vpack.c.bf16 %v2968_v33, %v2967_v30  ;;  %v2989_v30 = vpop.permute.xlu0 %2988 }
 0xcb9   : > { %v2929_v40 = vpop.f32.mrb[60].mxu1 }
 0xcba   : > { %v2930_v41 = vadd.f32 %v2929_v40, %v2781_v36  ;;  %v2931_v61 = vpop.f32.mrb[61].mxu1  ;;  %7044 = vmatprep.subr.bf16.mxu0 %v2981_v35 }
 0xcbb   : > { %v2932_v43 = vpop.f32.mrb[62].mxu1  ;;  %7045 = vmatpush3.bf16.msra.mxu0 %v2981_v35 }
 0xcbc   : > { %v2933_v45 = vadd.f32 %v2932_v43, %v2785_v42  ;;  %v2934_v46 = vpop.f32.mrb[63].mxu1  ;;  %v2969_v47 = vmax.f32 %v2930_v41, 0.0  ;;  %v2997_v43 = vpop.permute.xlu1 %2996 }
 0xcbe   : > { %v2970_v48 = vmax.f32 %v2933_v45, 0.0  ;;  %v7537_v45 = vld [vmem:[%s9832_s4 + $0x4f0] ss:$0 sps:$4 sm:$0xff]  }
 0xcc0   : > { %v2982_v49 = vpack.c.bf16 %v2970_v48, %v2969_v47  ;;  %v3118_v48 = vsel %vm309_vm0, %v7537_v45, 0  ;;  %v3334_v45 = vld [vmem:[%s9833_s5 + $0x1b0] sm:$0xff] }
 0xcc1   : > { %v2937_v51 = vpop.f32.mrb[64].mxu1 }
 0xcc2   : > { %v2938_v52 = vadd.f32 %v2937_v51, %v2789_v50  ;;  %v2939_v53 = vpop.f32.mrb[65].mxu1  ;;  %7046 = vmatprep.subr.bf16.mxu0 %v2982_v49 }
 0xcc3   : > { %v2940_v55 = vpop.f32.mrb[66].mxu1  ;;  %7047 = vmatpush3.bf16.msra.mxu0 %v2982_v49 }
 0xcc4   : > { %v2941_v56 = vadd.f32 %v2940_v55, %v2793_v54  ;;  %v2942_v57 = vpop.f32.mrb[67].mxu1  ;;  %v2971_v58 = vmax.f32 %v2938_v52, 0.0 }
 0xcc6   : > { %v2972_v59 = vmax.f32 %v2941_v56, 0.0 }
 0xcc8   : > { %v2983_v60 = vpack.c.bf16 %v2972_v59, %v2971_v58 }
 0xcc9   : > { %v2945_v21 = vpop.f32.mrb[68].mxu1 }
 0xcca   : > { %v2946_v23 = vadd.f32 %v2945_v21, %v2797_v32  ;;  %v2947_v22 = vpop.f32.mrb[69].mxu1  ;;  %7048 = vmatprep.subr.bf16.mxu0 %v2983_v60 }
 0xccb   : > { %v2948_v25 = vpop.f32.mrb[70].mxu1  ;;  %7049 = vmatpush3.bf16.msra.mxu0 %v2983_v60 }
 0xccc   : > { %v2949_v28 = vadd.f32 %v2948_v25, %v2801_v24  ;;  %v2950_v34 = vpop.f32.mrb[71].mxu1  ;;  %v2973_v20 = vmax.f32 %v2946_v23, 0.0 }
 0xccd   : > { %v7538_v34 = vld [vmem:[%s9832_s4 + $0x500] ss:$8 sps:$4 sm:$0xff]  }
 0xcce   : > { %v2974_v44 = vmax.f32 %v2949_v28, 0.0 }
 0xcd0   : > { %v2984_v62 = vpack.c.bf16 %v2974_v44, %v2973_v20  ;;  %v7539_v20 = vld [vmem:[%s9832_s4 + $0x510] ss:$8 sps:$4 sm:$0xff]   ;;  %v7540_v44 = vld [vmem:[%s9832_s4 + $0x520] ss:$8 sps:$4 sm:$0xff]  }
 0xcd1   : > { %v2953_v0 = vpop.f32.mrb[72].mxu1 }
 0xcd2   : > { %v2954_v2 = vadd.f32 %v2953_v0, %v2805_v63  ;;  %v2955_v3 = vpop.f32.mrb[73].mxu1  ;;  %7050 = vmatprep.subr.bf16.mxu0 %v2984_v62  ;;  %v7542_v63 = vld [vmem:[%s9832_s4 + $0x540] ss:$8 sps:$4 sm:$0xff]   ;;  %v7543_v0 = vld [vmem:[%s9832_s4 + $0x550] ss:$8 sps:$4 sm:$0xff]  }
 0xcd3   : > { %v2956_v5 = vpop.f32.mrb[74].mxu1  ;;  %7051 = vmatpush3.bf16.msra.mxu0 %v2984_v62  ;;  %v7541_v62 = vld [vmem:[%s9832_s4 + $0x530] ss:$8 sps:$4 sm:$0xff]  }
 0xcd4   : > { %v2957_v6 = vadd.f32 %v2956_v5, %v2809_v4  ;;  %v2958_v7 = vpop.f32.mrb[75].mxu1  ;;  %v2975_v8 = vmax.f32 %v2954_v2, 0.0  ;;  %v7544_v2 = vld [vmem:[%s9832_s4 + $0x560] ss:$0 sps:$4 sm:$0x33]   ;;  %v3328_v5 = vld [vmem:[%s9833_s5 + $0x150] sm:$0xff] }
 0xcd5   : > { %v3327_v4 = vld [vmem:[%s9833_s5 + $0x140] sm:$0xff] }
 0xcd6   : > { %v2976_v9 = vmax.f32 %v2957_v6, 0.0 }
 0xcd8   : > { %v2985_v10 = vpack.c.bf16 %v2976_v9, %v2975_v8 }
 0xcd9   : > { %v2961_v12 = vpop.f32.mrb[76].mxu1 }
 0xcda   : > { %v2962_v13 = vadd.f32 %v2961_v12, %v2813_v11  ;;  %v2963_v14 = vpop.f32.mrb[77].mxu1  ;;  %7052 = vmatprep.subr.bf16.mxu0 %v2985_v10 }
 0xcdb   : > { %v2964_v15 = vpop.f32.mrb[78].mxu1  ;;  %7053 = vmatpush3.bf16.msra.mxu0 %v2985_v10  ;;  %v3330_v14 = vld [vmem:[%s9833_s5 + $0x170] sm:$0xff] }
 0xcdc   : > { %v2977_v16 = vmax.f32 %v2962_v13, 0.0  ;;  %v2965_v17 = vpop.f32.mrb[79].mxu1  ;;  %v3329_v13 = vld [vmem:[%s9833_s5 + $0x160] sm:$0xff] }
 0xcde   : > { %v2986_v18 = vpack.c.bf16 %v2977_v16, %v2977_v16 }
 0xce0   : > { %7294 = vmatprep.subr.msk.bf16.mxu0 %vm309_vm0, %v2986_v18  ;;  %v3015_v19 = vsel %vm309_vm0, %v2986_v18, 0 }
 0xce1   : > { %7055 = vmatpush3.bf16.msra.mxu0 %v3015_v19 }
 0xce2   : > { %7060 = vmatprep.subr.bf16.mxu0 %v7727_v29 }
 0xce4   : > { %7057 = vmatmul.mubr.msk.bf16.vlgmr.msra.gmra.mrb[84].mxu0 %vm3007_vm9, %v7535_v31 }
 0xce5   : > { %7064 = vmatprep.mubr.msk.bf16.mxu0 %vm7729_vm3, %v7727_v29  ;;  %7061 = vmatpush3.bf16.msra.mxu0 %v7536_v26 }
 0xce6   : > { %7062 = vmatprep.subr.bf16.mxu0 %v7727_v29 }
 0xce9   : > { %7063 = vmatpush3.bf16.msra.mxu0 %v3118_v48 }
 0xcea   : > { %7068 = vmatprep.subr.bf16.mxu0 %v7727_v29 }
 0xdb7   : > { %v7058_v33 = vpop.f32.mrb[84].mxu0 }
 0xdb8   : > { %v3051_v35 = vpop.f32.mrb[85].mxu0  ;;  %v3060_v46 = vadd.f32 %v7058_v33, %v2997_v43  ;;  %v3333_v43 = vld [vmem:[%s9833_s5 + $0x1a0] sm:$0xff] }
 0xdb9   : > { %v3052_v36 = vadd.f32 %v3051_v35, %v2989_v30  ;;  %v7059_v40 = vpop.f32.mrb[86].mxu0  ;;  %v3332_v30 = vld [vmem:[%s9833_s5 + $0x190] sm:$0xff] }
 0xdba   : > { %v3054_v41 = vpop.f32.mrb[87].mxu0  ;;  %v3067_v49 = vadd.f32 %v3060_v46, %v8513_v37 }
 0xdbb   : > { %v3065_v61 = vadd.f32 %v3052_v36, %v8515_v38  ;;  %v3055_v42 = vadd.f32 %v3054_v41, %v2993_v27  ;;  %v3331_v27 = vld [vmem:[%s9833_s5 + $0x180] sm:$0xff] }
 0xdbd   : > { %3068 = vxpose.xlu0.b32.start [1/3] (short) (narrow) %v3065_v61, 16  ;;  %v3066_v47 = vadd.f32 %v3055_v42, %v8517_v39  ;;  %v3104_v39 = vld [vmem:[%s9834_s6] ss:$0 sm:$0xff] }
 0xdc1   : > { %3069 = vxpose.xlu0.b32.cont [2/3] (short) (narrow) %v3066_v47, 16 }
 0xdc5   : > { %3070 = vxpose.xlu0.b32.end [3/3] (short) (narrow) %v3067_v49, 16 }
 0xe3d   : > { %v3084_v38 = vpop.trf.xlu0 }
 0xe41   : > { %v3085_v50 = vpop.trf.xlu0 }
 0xe42   : > { %v3100_v51 = vpack.c.bf16 %v3085_v50, %v3084_v38 }
 0xe44   : > { %7065 = vmatmul.mubr.msk.bf16.vlgmr.msra.gmra.mrb[88].mxu0 %vm2457_vm8, %v3100_v51 }
 0xe45   : > { %7070 = vmatprep.mubr.msk.bf16.mxu0 %vm7729_vm3, %v7727_v29 }
 0xf17   : > { %v3154_v52 = vpop.f32.mrb[88].mxu0 }
 0xf18   : > { %v3155_v53 = vadd.f32 %v3154_v52, %v3104_v39  ;;  %v7066_v54 = vpop.f32.mrb[89].mxu0  ;;  %v3336_v52 = vld [vmem:[%s9833_s5 + $0x1d0] sm:$0xff] }
 0xf19   : > { %v3157_v55 = vpop.f32.mrb[90].mxu0 }
 0xf1a   : > { %v3161_v56 = vadd.f32 3.0, %v3155_v53  ;;  %v3158_v57 = vadd.f32 %v3157_v55, %v3104_v39  ;;  %v7067_v37 = vpop.f32.mrb[91].mxu0  ;;  %v3335_v39 = vld [vmem:[%s9833_s5 + $0x1c0] sm:$0xff] }
 0xf1c   : > { %v3163_v58 = vmax.f32 %v3161_v56, 0.0  ;;  %v3162_v59 = vadd.f32 3.0, %v3158_v57 }
 0xf1e   : > { %v3165_v60 = vmin.f32 %v3163_v58, 6.0  ;;  %v3164_v32 = vmax.f32 %v3162_v59, 0.0  ;;  %v3337_v59 = vld [vmem:[%s9833_s5 + $0x1e0] sm:$0xff] }
 0xf20   : > { %v3167_v21 = vmul.f32 0.16666667, %v3165_v60  ;;  %v3166_v23 = vmin.f32 %v3164_v32, 6.0  ;;  %v3338_v60 = vld [vmem:[%s9833_s5 + $0x1f0] sm:$0xff] }
 0xf22   : > { %v3168_v22 = vmul.f32 0.16666667, %v3166_v23  ;;  %v3169_v24 = vmul.f32 %v3167_v21, %v3155_v53 }
 0xf24   : > { %v3170_v25 = vmul.f32 %v3168_v22, %v3158_v57 }
 0xf26   : > { %v3184_v28 = vpack.c.bf16 %v3170_v25, %v3169_v24 }
 0xf28   : > { %7069 = vmatpush3.bf16.msra.mxu0 %v3184_v28  ;;  %v3339_v28 = vld [vmem:[%s9833_s5 + $0x200] sm:$0xf] }
 0xf29   : > { %7140 = vmatprep.subr.bf16.mxu0 %v7727_v29 }
 0xf2b   : > { %7071 = vmatmul.mubr.msk.bf16.vlgmr.msra.gmra.mrb[92].mxu0 %vm1489_vm5, %v7538_v34 }
 0xf2c   : > { %7074 = vmatprep.mubr.msk.bf16.mxu0 %vm7729_vm3, %v7727_v29 }
 0xf33   : > { %7075 = vmatmul.mubr.msk.bf16.gmra.mrb[96].mxu0 %vm1489_vm5, %v7539_v20 }
 0xf34   : > { %7078 = vmatprep.mubr.msk.bf16.mxu0 %vm7729_vm3, %v7727_v29 }
 0xf3b   : > { %7079 = vmatmul.mubr.msk.bf16.gmra.mrb[100].mxu0 %vm1489_vm5, %v7540_v44 }
 0xf3c   : > { %7082 = vmatprep.mubr.msk.bf16.mxu0 %vm7729_vm3, %v7727_v29 }
 0xf43   : > { %7083 = vmatmul.mubr.msk.bf16.gmra.mrb[104].mxu0 %vm1489_vm5, %v7541_v62 }
 0xf44   : > { %7086 = vmatprep.mubr.msk.bf16.mxu0 %vm7729_vm3, %v7727_v29 }
 0xf4b   : > { %7087 = vmatmul.mubr.msk.bf16.gmra.mrb[108].mxu0 %vm1489_vm5, %v7542_v63 }
 0xf4c   : > { %7090 = vmatprep.mubr.msk.bf16.mxu0 %vm7729_vm3, %v7727_v29 }
 0xf53   : > { %7091 = vmatmul.mubr.msk.bf16.gmra.mrb[112].mxu0 %vm1489_vm5, %v7543_v0 }
 0xf54   : > { %7094 = vmatprep.mubr.msk.bf16.mxu0 %vm7729_vm3, %v7727_v29 }
 0xf5b   : > { %7095 = vmatmul.mubr.msk.bf16.gmra.mrb[116].mxu0 %vm1489_vm5, %v7544_v2  ;;  %vm5863_vm5 = vcmask 982016  }
 0xf5c   : > { %7152 = vmatprep.mubr.msk.bf16.mxu0 %vm7729_vm3, %v7727_v29 }
 0xffe   : > { %v3273_v3 = vpop.f32.mrb[92].mxu0 }
 0xfff   : > { %v7072_v6 = vpop.f32.mrb[93].mxu0  ;;  %v3340_v8 = vmul.f32 %v3327_v4, %v3273_v3  ;;  %v3353_v3 = vld [vmem:[%s9832_s4 + $0x570] sm:$0x3]  ;;  %v7545_v4 = vld [vmem:[%s9832_s4 + $0x580] ss:$8 sps:$4 sm:$0xff]  }
0x1000   : > { %v3276_v7 = vpop.f32.mrb[94].mxu0  ;;  %v7547_v6 = vld [vmem:[%s9832_s4 + $0x5a0] ss:$8 sps:$4 sm:$0xff]  }
0x1001   : > { %v3341_v9 = vmul.f32 %v3328_v5, %v3276_v7  ;;  %v7073_v10 = vpop.f32.mrb[95].mxu0  ;;  %v7546_v5 = vld [vmem:[%s9832_s4 + $0x590] ss:$8 sps:$4 sm:$0xff]  }
0x1002   : > { %v7548_v7 = vld [vmem:[%s9832_s4 + $0x5b0] ss:$8 sps:$4 sm:$0xff]   ;;  %v3361_v10 = vld [vmem:[%s9834_s6 + $0x1] ss:$0 sm:$0xff] }
0x1003   : > { %v3354_v11 = vpack.c.bf16 %v3341_v9, %v3340_v8  ;;  %v7549_v8 = vld [vmem:[%s9832_s4 + $0x5c0] ss:$8 sps:$4 sm:$0xff]   ;;  %v7550_v9 = vld [vmem:[%s9832_s4 + $0x5d0] ss:$8 sps:$4 sm:$0xff]  }
0x1005   : > { %7099 = vmatpush3.bf16.msra.mxu1 %v3354_v11 }
0x1006   : > { %v3281_v12 = vpop.f32.mrb[96].mxu0  ;;  %7100 = vmatprep.subr.bf16.mxu1 %v7727_v29 }
0x1007   : > { %v7076_v15 = vpop.f32.mrb[97].mxu0  ;;  %v3342_v17 = vmul.f32 %v3329_v13, %v3281_v12 }
0x1008   : > { %v3284_v16 = vpop.f32.mrb[98].mxu0 }
0x1009   : > { %v3343_v18 = vmul.f32 %v3330_v14, %v3284_v16  ;;  %v7077_v19 = vpop.f32.mrb[99].mxu0 }
0x100b   : > { %v3355_v31 = vpack.c.bf16 %v3343_v18, %v3342_v17 }
0x100d   : > { %7101 = vmatpush3.bf16.msra.mxu1 %v3355_v31 }
0x100e   : > { %v3289_v26 = vpop.f32.mrb[100].mxu0  ;;  %7102 = vmatprep.subr.bf16.mxu1 %v7727_v29 }
0x100f   : > { %v7080_v33 = vpop.f32.mrb[101].mxu0  ;;  %v3344_v36 = vmul.f32 %v3331_v27, %v3289_v26 }
0x1010   : > { %v3292_v35 = vpop.f32.mrb[102].mxu0 }
0x1011   : > { %v3345_v40 = vmul.f32 %v3332_v30, %v3292_v35  ;;  %v7081_v41 = vpop.f32.mrb[103].mxu0 }
0x1013   : > { %v3356_v61 = vpack.c.bf16 %v3345_v40, %v3344_v36 }
0x1015   : > { %7103 = vmatpush3.bf16.msra.mxu1 %v3356_v61 }
0x1016   : > { %v3297_v42 = vpop.f32.mrb[104].mxu0  ;;  %7104 = vmatprep.subr.bf16.mxu1 %v7727_v29 }
0x1017   : > { %v7084_v46 = vpop.f32.mrb[105].mxu0  ;;  %v3346_v48 = vmul.f32 %v3333_v43, %v3297_v42  ;;  %v7551_v42 = vld [vmem:[%s9832_s4 + $0x5e0] ss:$8 sps:$4 sm:$0xff]   ;;  %v7552_v43 = vld [vmem:[%s9832_s4 + $0x5f0] ss:$0 sps:$4 sm:$0xff]  }
0x1018   : > { %v3300_v47 = vpop.f32.mrb[106].mxu0  ;;  %v7553_v46 = vld [vmem:[%s9832_s4 + $0x600] ss:$8 sps:$4 sm:$0xff]  }
0x1019   : > { %v3347_v49 = vmul.f32 %v3334_v45, %v3300_v47  ;;  %v7085_v38 = vpop.f32.mrb[107].mxu0  ;;  %v3538_v45 = vsel %vm309_vm0, %v7552_v43, 0  ;;  %7141 = vmatpush3.bf16.msra.mxu0 %v7553_v46  ;;  %v7554_v47 = vld [vmem:[%s9832_s4 + $0x610] ss:$8 sps:$4 sm:$0xff]  }
0x101a   : > { %7142 = vmatprep.subr.bf16.mxu0 %v7727_v29  ;;  %v3438_v38 = vld [vmem:[%s9834_s6 + $0x2] ss:$0 sm:$0xff] }
0x101b   : > { %v3357_v50 = vpack.c.bf16 %v3347_v49, %v3346_v48  ;;  %v7555_v48 = vld [vmem:[%s9832_s4 + $0x620] ss:$8 sps:$4 sm:$0xff]   ;;  %v7556_v49 = vld [vmem:[%s9832_s4 + $0x630] ss:$8 sps:$4 sm:$0xff]  }
0x101d   : > { %7105 = vmatpush3.bf16.msra.mxu1 %v3357_v50  ;;  %7143 = vmatpush3.bf16.msra.mxu0 %v7554_v47 }
0x101e   : > { %v3305_v51 = vpop.f32.mrb[108].mxu0  ;;  %7106 = vmatprep.subr.bf16.mxu1 %v7727_v29  ;;  %7144 = vmatprep.subr.bf16.mxu0 %v7727_v29 }
0x101f   : > { %v7088_v53 = vpop.f32.mrb[109].mxu0  ;;  %v3348_v55 = vmul.f32 %v3335_v39, %v3305_v51 }
0x1020   : > { %v3308_v54 = vpop.f32.mrb[110].mxu0 }
0x1021   : > { %v3349_v56 = vmul.f32 %v3336_v52, %v3308_v54  ;;  %v7089_v57 = vpop.f32.mrb[111].mxu0  ;;  %7145 = vmatpush3.bf16.msra.mxu0 %v7555_v48 }
0x1022   : > { %7146 = vmatprep.subr.bf16.mxu0 %v7727_v29  ;;  %v7558_v57 = vld [vmem:[%s9832_s4 + $0x650] ss:$8 sps:$4 sm:$0xff]  }
0x1023   : > { %v3358_v37 = vpack.c.bf16 %v3349_v56, %v3348_v55  ;;  %v7557_v56 = vld [vmem:[%s9832_s4 + $0x640] ss:$8 sps:$4 sm:$0xff]  }
0x1025   : > { %7107 = vmatpush3.bf16.msra.mxu1 %v3358_v37  ;;  %7147 = vmatpush3.bf16.msra.mxu0 %v7556_v49  ;;  %v7559_v37 = vld [vmem:[%s9832_s4 + $0x660] ss:$8 sps:$4 sm:$0xff]  }
0x1026   : > { %v3313_v58 = vpop.f32.mrb[112].mxu0  ;;  %7108 = vmatprep.subr.bf16.mxu1 %v7727_v29  ;;  %7148 = vmatprep.subr.bf16.mxu0 %v7727_v29 }
0x1027   : > { %v7092_v32 = vpop.f32.mrb[113].mxu0  ;;  %v3350_v23 = vmul.f32 %v3337_v59, %v3313_v58  ;;  %v7561_v58 = vld [vmem:[%s9832_s4 + $0x664] ss:$8 sps:$4 sm:$0xff]   ;;  %v7564_v59 = vld [vmem:[%s9832_s4 + $0x674] ss:$8 sps:$4 sm:$0xff]  }
0x1028   : > { %v3316_v21 = vpop.f32.mrb[114].mxu0  ;;  %v3524_v32 = vld [vmem:[%s9834_s6 + $0x3] ss:$0 sm:$0xff] }
0x1029   : > { %v3351_v22 = vmul.f32 %v3338_v60, %v3316_v21  ;;  %v7093_v24 = vpop.f32.mrb[115].mxu0  ;;  %7149 = vmatpush3.bf16.msra.mxu0 %v7557_v56  ;;  %v7562_v60 = vld [vmem:[%s9832_s4 + $0x670] ss:$8 sps:$4 sm:$0xff]   ;;  %v3584_v21 = vlaneseq }
0x102a   : > { %7150 = vmatprep.subr.bf16.mxu0 %v7727_v29  ;;  %v7573_v56 = vld [vmem:[%s9832_s4 + $0x6f0] ss:$0 sps:$4 sm:$0x33]  }
0x102b   : > { %v3359_v25 = vpack.c.bf16 %v3351_v22, %v3350_v23 }
0x102d   : > { %7109 = vmatpush3.bf16.msra.mxu1 %v3359_v25  ;;  %7151 = vmatpush3.bf16.msra.mxu0 %v7558_v57  ;;  %v7574_v57 = vld [vmem:[%s9832_s4 + $0x710] ss:$8 sps:$4 sm:$0xff]  }
0x102e   : > { %v3321_v34 = vpop.f32.mrb[116].mxu0  ;;  %7110 = vmatprep.subr.bf16.mxu1 %v7727_v29 }
0x102f   : > { %v3352_v20 = vmul.f32 %v3339_v28, %v3321_v34  ;;  %v7096_v44 = vpop.f32.mrb[117].mxu0  ;;  %v3585_v34 = vshrl.u32 %v3584_v21, 7  ;;  %v7580_v21 = vld [vmem:[%s9832_s4 + $0x770] ss:$8 sps:$4 sm:$0xff]  }
0x1030   : > { %v3324_v62 = vpop.f32.mrb[118].mxu0 }
0x1031   : > { %v3360_v63 = vpack.c.bf16 %v3352_v20, %v3352_v20  ;;  %v7097_v0 = vpop.f32.mrb[119].mxu0 }
0x1033   : > { %v3368_v2 = vsel %vm3366_vm10, %v3360_v63, 0  ;;  %v8901_v63 = vsub.s32 0, %v3585_v34 }
0x1034   : > { %7111 = vmatpush3.bf16.msra.mxu1 %v3368_v2 }
0x1035   : > { %7116 = vmatprep.subr.bf16.mxu1 %v7727_v29 }
0x1037   : > { %7113 = vmatmul.mubr.msk.bf16.vlgmr.msra.gmra.mrb[80].mxu1 %vm3362_vm11, %v3353_v3 }
0x1038   : > { %7128 = vmatprep.mubr.msk.bf16.mxu1 %vm7729_vm3, %v7727_v29  ;;  %7117 = vmatpush3.bf16.msra.mxu1 %v7545_v4 }
0x1039   : > { %7118 = vmatprep.subr.bf16.mxu1 %v7727_v29 }
0x103c   : > { %7119 = vmatpush3.bf16.msra.mxu1 %v7546_v5  ;;  %v3687_v5 = vld [vmem:[%s9832_s4 + $0x680] sm:$0xff] }
0x103d   : > { %7120 = vmatprep.subr.bf16.mxu1 %v7727_v29 }
0x1040   : > { %7121 = vmatpush3.bf16.msra.mxu1 %v7547_v6  ;;  %v6579_v6 = vcombine.high %v3687_v5, %v3687_v5 }
0x1041   : > { %7122 = vmatprep.subr.bf16.mxu1 %v7727_v29 }
0x1044   : > { %7123 = vmatpush3.bf16.msra.mxu1 %v7548_v7  ;;  %v6578_v7 = vcombine.low %v3687_v5, %v3687_v5 }
0x1045   : > { %7124 = vmatprep.subr.bf16.mxu1 %v7727_v29 }
0x1048   : > { %7125 = vmatpush3.bf16.msra.mxu1 %v7549_v8  ;;  %v3731_v8 = vsel %vm309_vm0, %v6578_v7, 0  ;;  %v3968_v7 = vld [vmem:[%s9833_s5 + $0x230] sm:$0xff] }
0x1049   : > { %7126 = vmatprep.subr.bf16.mxu1 %v7727_v29 }
0x104c   : > { %7127 = vmatpush3.bf16.msra.mxu1 %v7550_v9  ;;  %v3602_v9 = vld [vmem:[%s9834_s6 + $0x4] ss:$0 sm:$0xff] }
0x104d   : > { %7132 = vmatprep.subr.bf16.mxu1 %v7727_v29 }
0x110a   : > { %v3404_v11 = vpop.f32.mrb[80].mxu1 }
0x110b   : > { %v3405_v12 = vadd.f32 %v3404_v11, %v3361_v10  ;;  %v7114_v13 = vpop.f32.mrb[81].mxu1 }
0x110c   : > { %v3407_v14 = vpop.f32.mrb[82].mxu1 }
0x110d   : > { %v3410_v15 = vadd.f32 3.0, %v3405_v12  ;;  %v7115_v16 = vpop.f32.mrb[83].mxu1 }
0x110e   : > { %v6573_v16 = vld [vmem:[%s9834_s6 + $0x5] ss:$8 sm:$0x3] }
0x110f   : > { %v3411_v17 = vmax.f32 %v3410_v15, 0.0 }
0x1111   : > { %v3412_v18 = vmin.f32 %v3411_v17, 6.0  ;;  %v8924_v17 = vsub.s32 1, %v3585_v34  ;;  %v3967_v34 = vld [vmem:[%s9833_s5 + $0x228] sm:$0xff] }
0x1113   : > { %v3413_v19 = vmul.f32 0.16666667, %v3412_v18  ;;  %v3694_v18 = vrot.slane %v6573_v16, %v8901_v63 }
0x1115   : > { %v8844_v31 = vmul.f32 %v3413_v19, %v3405_v12  ;;  %v3698_v19 = vrot.slane %v6573_v16, %v8924_v17 }
0x1117   : > { %v3416_v26 = vsel %vm3415_vm12, %v8844_v31, 0.0 }
0x1118   : > { %v3417_v27 = vrot.slane %v3416_v26, 4 }
0x111a   : > { %v3418_v30 = vadd.f32 %v3417_v27, %v3416_v26 }
0x111c   : > { %v3419_v33 = vrot.slane %v3418_v30, 2 }
0x111e   : > { %v3420_v35 = vadd.f32 %v3419_v33, %v3418_v30 }
0x1120   : > { %v3421_v36 = vrot.slane %v3420_v35, 1 }
0x1122   : > { %v3422_v40 = vadd.f32 %v3421_v36, %v3420_v35 }
0x1124   : > { %v3424_v41 = vmul.f32 0.25, %v3422_v40 }
0x1126   : > { %v3425_v61 = vpack.c.bf16 %v3424_v41, %v3424_v41 }
0x1128   : > { %7129 = vmatmul.mubr.msk.bf16.vlgmr.msra.gmra.mrb[84].mxu1 %vm3475_vm13, %v3425_v61 }
0x1129   : > { %7136 = vmatprep.mubr.msk.bf16.mxu1 %vm7729_vm3, %v7727_v29  ;;  %7133 = vmatpush3.bf16.msra.mxu1 %v7551_v42 }
0x112a   : > { %7134 = vmatprep.subr.bf16.mxu1 %v7727_v29 }
0x112d   : > { %7135 = vmatpush3.bf16.msra.mxu1 %v3538_v45 }
0x112e   : > { %3736 = vmatprep.subr.bf16.mxu1 %v7561_v58  ;;  %v7576_v58 = vld [vmem:[%s9832_s4 + $0x730] ss:$8 sps:$4 sm:$0xff]  }
0x11fb   : > { %v3513_v50 = vpop.f32.mrb[84].mxu1 }
0x11fc   : > { %v3514_v51 = vadd.f32 %v3513_v50, %v3438_v38  ;;  %v7130_v39 = vpop.f32.mrb[85].mxu1 }
0x11fd   : > { %v3516_v52 = vpop.f32.mrb[86].mxu1  ;;  %v7568_v39 = vld [vmem:[%s9832_s4 + $0x6a0] ss:$8 sps:$4 sm:$0xff]  }
0x11fe   : > { %v3519_v53 = vmax.f32 %v3514_v51, 0.0  ;;  %v7131_v54 = vpop.f32.mrb[87].mxu1  ;;  %v7567_v51 = vld [vmem:[%s9832_s4 + $0x690] ss:$8 sps:$4 sm:$0xff]  }
0x11ff   : > { %v7569_v52 = vld [vmem:[%s9832_s4 + $0x6b0] ss:$8 sps:$4 sm:$0xff]  }
0x1200   : > { %v3520_v55 = vpack.c.bf16 %v3519_v53, %v3519_v53  ;;  %v7570_v53 = vld [vmem:[%s9832_s4 + $0x6c0] ss:$8 sps:$4 sm:$0xff]   ;;  %v7571_v54 = vld [vmem:[%s9832_s4 + $0x6d0] ss:$8 sps:$4 sm:$0xff]  }
0x1202   : > { %7137 = vmatmul.mubr.msk.bf16.vlgmr.msra.gmra.mrb[88].mxu1 %vm2457_vm8, %v3520_v55  ;;  %v7572_v55 = vld [vmem:[%s9832_s4 + $0x6e0] ss:$8 sps:$4 sm:$0xff]  }
0x1203   : > { %3768 = vmatprep.mubr.bf16.mxu1 %v7725_v1  ;;  %3737 = vmatpush1.bf16.msra.mxu1 %v7559_v37  ;;  %v7575_v37 = vld [vmem:[%s9832_s4 + $0x720] ss:$8 sps:$4 sm:$0xff]  }
0x1204   : > { %3738 = vmatprep.subr.bf16.mxu1 %v7564_v59  ;;  %v7577_v59 = vld [vmem:[%s9832_s4 + $0x740] ss:$8 sps:$4 sm:$0xff]  }
0x1207   : > { %3739 = vmatpush1.bf16.msra.mxu1 %v7562_v60  ;;  %v7578_v60 = vld [vmem:[%s9832_s4 + $0x750] ss:$8 sps:$4 sm:$0xff]  }
0x1208   : > { %6580 = vmatprep.subr.msk.bf16.mxu1 %vm309_vm0, %v6579_v6 }
0x120b   : > { %3741 = vmatpush1.bf16.msra.mxu1 %v3731_v8  ;;  %v3970_v8 = vld [vmem:[%s9833_s5 + $0x240] sm:$0xff] }
0x12d5   : > { %v3574_v23 = vpop.f32.mrb[88].mxu1 }
0x12d6   : > { %v3575_v22 = vadd.f32 %v3574_v23, %v3524_v32  ;;  %v7138_v24 = vpop.f32.mrb[89].mxu1  ;;  %v7579_v32 = vld [vmem:[%s9832_s4 + $0x760] ss:$8 sps:$4 sm:$0xff]  }
0x12d7   : > { %v3577_v25 = vpop.f32.mrb[90].mxu1  ;;  %v3966_v24 = vld [vmem:[%s9833_s5 + $0x220] sm:$0xff] }
0x12d8   : > { %v3580_v28 = vadd.f32 3.0, %v3575_v22  ;;  %v7139_v20 = vpop.f32.mrb[91].mxu1  ;;  %v3964_v22 = vld [vmem:[%s9833_s5 + $0x210] sm:$0xff] }
0x12da   : > { %v3581_v44 = vmax.f32 %v3580_v28, 0.0  ;;  %v3965_v28 = vld [vmem:[%s9833_s5 + $0x218] sm:$0xff] }
0x12dc   : > { %v3582_v62 = vmin.f32 %v3581_v44, 6.0 }
0x12de   : > { %v3583_v0 = vmul.f32 0.16666667, %v3582_v62 }
0x12e0   : > { %v3587_v2 = vrot.slane %v3583_v0, %v8901_v63 }
0x12e2   : > { %v3588_v3 = vmul.f32 %v3587_v2, %v8844_v31 }
0x12e4   : > { %v3589_v4 = vpack.c.bf16 %v3588_v3, %v3588_v3 }
0x12e6   : > { %7153 = vmatmul.mubr.msk.bf16.vlgmr.msra.gmra.mrb[120].mxu0 %vm3475_vm13, %v3589_v4 }
0x12e7   : > { %4085 = vmatprep.mubr.bf16.mxu0 %v7725_v1 }
0x13b9   : > { %v3676_v10 = vpop.f32.mrb[120].mxu0 }
0x13ba   : > { %v8915_v11 = vadd.f32 %v3676_v10, %v3602_v9  ;;  %v7154_v12 = vpop.f32.mrb[121].mxu0  ;;  %v3969_v10 = vld [vmem:[%s9833_s5 + $0x238] sm:$0xff] }
0x13bb   : > { %v3679_v13 = vpop.f32.mrb[122].mxu0  ;;  %v3971_v12 = vld [vmem:[%s9833_s5 + $0x248] sm:$0xff] }
0x13bc   : > { %v3682_v14 = vpack.c.bf16 %v8915_v11, %v8915_v11  ;;  %v7155_v15 = vpop.f32.mrb[123].mxu0 }
0x13be   : > { %6581 = vmatmul.mubr.msk.bf16.vlgmr.msra.gmra.mrb[92].mxu1 %vm3726_vm14, %v3682_v14 }
0x13bf   : > { %3895 = vmatprep.mubr.bf16.mxu1 %v7725_v1 }
0x1491   : > { %v3770_v31 = vpop.f32.mrb[92].mxu1 }
0x1492   : > { %v3771_v26 = vadd.f32 %v3770_v31, %v3694_v18  ;;  %v3772_v27 = vpop.f32.mrb[93].mxu1 }
0x1493   : > { %v3773_v30 = vadd.f32 %v3772_v27, %v3698_v19  ;;  %v3774_v33 = vpop.f32.mrb[94].mxu1 }
0x1494   : > { %v3777_v35 = vadd.f32 3.0, %v3771_v26  ;;  %v3775_v36 = vpop.f32.mrb[95].mxu1  ;;  %v3974_v33 = vld [vmem:[%s9833_s5 + $0x260] sm:$0xff] }
0x1495   : > { %v3778_v40 = vadd.f32 3.0, %v3773_v30  ;;  %v3973_v36 = vld [vmem:[%s9833_s5 + $0x258] sm:$0xff] }
0x1496   : > { %v3779_v41 = vmax.f32 %v3777_v35, 0.0 }
0x1497   : > { %v3780_v61 = vmax.f32 %v3778_v40, 0.0  ;;  %v3975_v40 = vld [vmem:[%s9833_s5 + $0x268] sm:$0xff] }
0x1498   : > { %v3781_v42 = vmin.f32 %v3779_v41, 6.0 }
0x1499   : > { %v3782_v43 = vmin.f32 %v3780_v61, 6.0 }
0x149a   : > { %v3783_v45 = vmul.f32 0.16666667, %v3781_v42 }
0x149b   : > { %v3784_v46 = vmul.f32 0.16666667, %v3782_v43 }
0x149c   : > { %v3785_v47 = vmul.f32 %v3783_v45, %v3771_v26 }
0x149d   : > { %v3786_v48 = vmul.f32 %v3784_v46, %v3773_v30  ;;  %v3972_v30 = vld [vmem:[%s9833_s5 + $0x250] sm:$0xff] }
0x149e   : > { %v3800_v49 = vpack.c.bf16 %v3785_v47, %v3785_v47 }
0x149f   : > { %v3801_v38 = vpack.c.bf16 %v3786_v48, %v3786_v48 }
0x14a0   : > { %v3858_v50 = vsel %vm3366_vm10, %v3800_v49, 0 }
0x14a1   : > { %6589 = vmatprep.subr.msk.bf16.mxu1 %vm3366_vm10, %v3801_v38  ;;  %v3976_v38 = vld [vmem:[%s9833_s5 + $0x270] sm:$0xff] }
0x14a2   : > { %3864 = vmatpush1.bf16.msra.mxu1 %v3858_v50  ;;  %v3978_v50 = vld [vmem:[%s9833_s5 + $0x280] sm:$0xff] }
0x14a3   : > { %4248 = vmatprep.subr.bf16.mxu1 %v7725_v1 }
0x14a5   : > { %6590 = vmatmul.mubr.msk.bf16.vlgmr.msra.gmra.mrb[96].mxu1 %vm3835_vm15, %v7567_v51 }
0x14a6   : > { %3905 = vmatprep.mubr.bf16.mxu1 %v7725_v1  ;;  %4249 = vmatpush1.bf16.msra.mxu1 %v7574_v57 }
0x14a7   : > { %4250 = vmatprep.subr.bf16.mxu1 %v7725_v1 }
0x14aa   : > { %4251 = vmatpush1.bf16.msra.mxu1 %v7575_v37 }
0x14ab   : > { %4252 = vmatprep.subr.bf16.mxu1 %v7725_v1 }
0x14ad   : > { %6591 = vmatmul.mubr.msk.bf16.gmra.mrb[100].mxu1 %vm3835_vm15, %v7568_v39  ;;  %v3977_v39 = vld [vmem:[%s9833_s5 + $0x278] sm:$0xff] }
0x14ae   : > { %3915 = vmatprep.mubr.bf16.mxu1 %v7725_v1  ;;  %4253 = vmatpush1.bf16.msra.mxu1 %v7576_v58 }
0x14af   : > { %4254 = vmatprep.subr.bf16.mxu1 %v7725_v1 }
0x14b2   : > { %4255 = vmatpush1.bf16.msra.mxu1 %v7577_v59 }
0x14b3   : > { %4256 = vmatprep.subr.bf16.mxu1 %v7725_v1 }
0x14b5   : > { %6592 = vmatmul.mubr.msk.bf16.gmra.mrb[104].mxu1 %vm3835_vm15, %v7569_v52  ;;  %v3979_v52 = vld [vmem:[%s9833_s5 + $0x288] sm:$0xff] }
0x14b6   : > { %3925 = vmatprep.mubr.bf16.mxu1 %v7725_v1  ;;  %4257 = vmatpush1.bf16.msra.mxu1 %v7578_v60 }
0x14b7   : > { %4258 = vmatprep.subr.bf16.mxu1 %v7725_v1 }
0x14ba   : > { %4259 = vmatpush1.bf16.msra.mxu1 %v7579_v32  ;;  %v3980_v32 = vld [vmem:[%s9833_s5 + $0x290] sm:$0xff] }
0x14bb   : > { %4260 = vmatprep.subr.bf16.mxu1 %v7725_v1 }
0x14bd   : > { %6593 = vmatmul.mubr.msk.bf16.gmra.mrb[108].mxu1 %vm3835_vm15, %v7570_v53 }
0x14be   : > { %3935 = vmatprep.mubr.bf16.mxu1 %v7725_v1  ;;  %4261 = vmatpush1.bf16.msra.mxu1 %v7580_v21  ;;  %v3982_v21 = vld [vmem:[%s9833_s5 + $0x2a0] sm:$0xff] }
0x14bf   : > { %4262 = vmatprep.subr.bf16.mxu1 %v7725_v1 }
0x14c5   : > { %6594 = vmatmul.mubr.msk.bf16.gmra.mrb[112].mxu1 %vm3835_vm15, %v7571_v54 }
0x14c6   : > { %3945 = vmatprep.mubr.bf16.mxu1 %v7725_v1 }
0x14cd   : > { %6595 = vmatmul.mubr.msk.bf16.gmra.mrb[116].mxu1 %vm3835_vm15, %v7572_v55 }
0x14ce   : > { %3955 = vmatprep.mubr.bf16.mxu1 %v7725_v1 }
0x14d5   : > { %6596 = vmatmul.mubr.msk.bf16.gmra.mrb[120].mxu1 %vm3835_vm15, %v7573_v56 }
0x1578   : > { %v3897_v23 = vpop.f32.mrb[96].mxu1 }
0x1579   : > { %v3899_v25 = vpop.f32.mrb[97].mxu1  ;;  %v3990_v44 = vmul.f32 %v3964_v22, %v3897_v23  ;;  %v3981_v22 = vld [vmem:[%s9833_s5 + $0x298] sm:$0xff] }
0x157a   : > { %v3901_v20 = vpop.f32.mrb[98].mxu1  ;;  %v3991_v2 = vmul.f32 %v3965_v28, %v3899_v25 }
0x157b   : > { %v3992_v62 = vmul.f32 %v3966_v24, %v3901_v20  ;;  %v3903_v0 = vpop.f32.mrb[99].mxu1  ;;  %v3983_v24 = vld [vmem:[%s9833_s5 + $0x2a8] sm:$0xff] }
0x157c   : > { %v3993_v3 = vmul.f32 %v3967_v34, %v3903_v0 }
0x157d   : > { %v4017_v4 = vpack.c.bf16 %v3992_v62, %v3990_v44 }
0x157e   : > { %v4018_v5 = vpack.c.bf16 %v3993_v3, %v3991_v2 }
0x1580   : > { %v3907_v6 = vpop.f32.mrb[100].mxu1  ;;  %4053 = vmatprep.subr.bf16.mxu0 %v4018_v5  ;;  %v3986_v5 = vld [vmem:[%s9833_s5 + $0x2c0] sm:$0xff] }
0x1581   : > { %v3909_v9 = vpop.f32.mrb[101].mxu1  ;;  %4054 = vmatpush1.bf16.msra.mxu0 %v4017_v4  ;;  %v3994_v14 = vmul.f32 %v3968_v7, %v3907_v6  ;;  %v3984_v4 = vld [vmem:[%s9833_s5 + $0x2b0] sm:$0xff]  ;;  %v3985_v7 = vld [vmem:[%s9833_s5 + $0x2b8] sm:$0xff] }
0x1582   : > { %v3911_v13 = vpop.f32.mrb[102].mxu1  ;;  %v3995_v18 = vmul.f32 %v3969_v10, %v3909_v9 }
0x1583   : > { %v3996_v15 = vmul.f32 %v3970_v8, %v3911_v13  ;;  %v3913_v16 = vpop.f32.mrb[103].mxu1  ;;  %v3987_v8 = vld [vmem:[%s9833_s5 + $0x2c8] sm:$0xff] }
0x1584   : > { %v3997_v19 = vmul.f32 %v3971_v12, %v3913_v16 }
0x1585   : > { %v4019_v31 = vpack.c.bf16 %v3996_v15, %v3994_v14 }
0x1586   : > { %v4020_v26 = vpack.c.bf16 %v3997_v19, %v3995_v18  ;;  %v3988_v19 = vld [vmem:[%s9833_s5 + $0x2d0] sm:$0xf] }
0x1588   : > { %v3917_v27 = vpop.f32.mrb[104].mxu1  ;;  %4055 = vmatprep.subr.bf16.mxu0 %v4020_v26 }
0x1589   : > { %v3919_v35 = vpop.f32.mrb[105].mxu1  ;;  %4056 = vmatpush1.bf16.msra.mxu0 %v4019_v31  ;;  %v3998_v61 = vmul.f32 %v3972_v30, %v3917_v27  ;;  %v3989_v31 = vld [vmem:[%s9833_s5 + $0x2d8] sm:$0xf] }
0x158a   : > { %v3921_v41 = vpop.f32.mrb[106].mxu1  ;;  %v3999_v45 = vmul.f32 %v3973_v36, %v3919_v35 }
0x158b   : > { %v4000_v42 = vmul.f32 %v3974_v33, %v3921_v41  ;;  %v3923_v43 = vpop.f32.mrb[107].mxu1 }
0x158c   : > { %v4001_v46 = vmul.f32 %v3975_v40, %v3923_v43  ;;  %v7581_v43 = vld [vmem:[%s9832_s4 + $0x780] ss:$8 sps:$4 sm:$0xff]  }
0x158d   : > { %v4021_v47 = vpack.c.bf16 %v4000_v42, %v3998_v61  ;;  %v4016_v42 = vld [vmem:[%s9832_s4 + $0x700] sm:$0x3]  ;;  %4263 = vmatpush1.bf16.msra.mxu1 %v7581_v43 }
0x158e   : > { %v4022_v48 = vpack.c.bf16 %v4001_v46, %v3999_v45  ;;  %4264 = vmatprep.subr.bf16.mxu1 %v7725_v1  ;;  %v7582_v45 = vld [vmem:[%s9832_s4 + $0x790] ss:$8 sps:$4 sm:$0xff]   ;;  %v7583_v46 = vld [vmem:[%s9832_s4 + $0x7a0] ss:$8 sps:$4 sm:$0xff]  }
0x1590   : > { %v3927_v49 = vpop.f32.mrb[108].mxu1  ;;  %4057 = vmatprep.subr.bf16.mxu0 %v4022_v48  ;;  %v7585_v48 = vld [vmem:[%s9832_s4 + $0x7c0] ss:$8 sps:$4 sm:$0xff]  }
0x1591   : > { %v3929_v51 = vpop.f32.mrb[109].mxu1  ;;  %4058 = vmatpush1.bf16.msra.mxu0 %v4021_v47  ;;  %v4002_v54 = vmul.f32 %v3976_v38, %v3927_v49  ;;  %4265 = vmatpush1.bf16.msra.mxu1 %v7582_v45  ;;  %v7584_v47 = vld [vmem:[%s9832_s4 + $0x7b0] ss:$8 sps:$4 sm:$0xff]   ;;  %v7587_v38 = vld [vmem:[%s9832_s4 + $0x7e0] ss:$8 sps:$4 sm:$0xff]  }
0x1592   : > { %v3931_v53 = vpop.f32.mrb[110].mxu1  ;;  %v4003_v57 = vmul.f32 %v3977_v39, %v3929_v51  ;;  %4266 = vmatprep.subr.bf16.mxu1 %v7725_v1  ;;  %v7586_v49 = vld [vmem:[%s9832_s4 + $0x7d0] ss:$8 sps:$4 sm:$0xff]   ;;  %v7589_v51 = vld [vmem:[%s9832_s4 + $0x800] ss:$8 sps:$4 sm:$0xff]  }
0x1593   : > { %v4004_v55 = vmul.f32 %v3978_v50, %v3931_v53  ;;  %v3933_v56 = vpop.f32.mrb[111].mxu1  ;;  %v7588_v50 = vld [vmem:[%s9832_s4 + $0x7f0] ss:$8 sps:$4 sm:$0xff]   ;;  %v7591_v39 = vld [vmem:[%s9832_s4 + $0x804] ss:$8 sps:$4 sm:$0xff]  }
0x1594   : > { %v4005_v37 = vmul.f32 %v3979_v52, %v3933_v56  ;;  %v7594_v52 = vld [vmem:[%s9832_s4 + $0x814] ss:$8 sps:$4 sm:$0xff]   ;;  %v7592_v53 = vld [vmem:[%s9832_s4 + $0x810] ss:$8 sps:$4 sm:$0xff]   ;;  %v7601_v45 = vld [vmem:[%s9832_s4 + $0x840] ss:$8 sps:$4 sm:$0xff]  }
0x1595   : > { %v4023_v58 = vpack.c.bf16 %v4004_v55, %v4002_v54  ;;  %4267 = vmatpush1.bf16.msra.mxu1 %v7583_v46  ;;  %v7597_v54 = vld [vmem:[%s9832_s4 + $0x824] ss:$8 sps:$4 sm:$0xff]   ;;  %v7595_v55 = vld [vmem:[%s9832_s4 + $0x820] ss:$8 sps:$4 sm:$0xff]  }
0x1596   : > { %v4024_v59 = vpack.c.bf16 %v4005_v37, %v4003_v57  ;;  %4268 = vmatprep.subr.bf16.mxu1 %v7725_v1  ;;  %v6597_v56 = vld [vmem:[%s9834_s6 + $0x6] ss:$8 sm:$0x3] }
0x1597   : > { %v4037_v57 = vrot.slane %v6597_v56, %v8901_v63  ;;  %v4041_v37 = vrot.slane %v6597_v56, %v8924_v17  ;;  %v7613_v56 = vld [vmem:[%s9832_s4 + $0x900] ss:$8 sps:$4 sm:$0xff]  }
0x1598   : > { %v3937_v60 = vpop.f32.mrb[112].mxu1  ;;  %4059 = vmatprep.subr.bf16.mxu0 %v4024_v59 }
0x1599   : > { %v3939_v23 = vpop.f32.mrb[113].mxu1  ;;  %4060 = vmatpush1.bf16.msra.mxu0 %v4023_v58  ;;  %v4006_v28 = vmul.f32 %v3980_v32, %v3937_v60  ;;  %4269 = vmatpush1.bf16.msra.mxu1 %v7584_v47  ;;  %v7602_v47 = vld [vmem:[%s9832_s4 + $0x850] ss:$8 sps:$4 sm:$0xff]  }
0x159a   : > { %v3941_v25 = vpop.f32.mrb[114].mxu1  ;;  %v4007_v44 = vmul.f32 %v3981_v22, %v3939_v23  ;;  %4270 = vmatprep.subr.bf16.mxu1 %v7725_v1 }
0x159b   : > { %v4008_v34 = vmul.f32 %v3982_v21, %v3941_v25  ;;  %v3943_v20 = vpop.f32.mrb[115].mxu1 }
0x159c   : > { %v4009_v62 = vmul.f32 %v3983_v24, %v3943_v20 }
0x159d   : > { %v4025_v0 = vpack.c.bf16 %v4008_v34, %v4006_v28  ;;  %4271 = vmatpush1.bf16.msra.mxu1 %v7585_v48  ;;  %v7603_v48 = vld [vmem:[%s9832_s4 + $0x860] ss:$8 sps:$4 sm:$0xff]  }
0x159e   : > { %v4026_v2 = vpack.c.bf16 %v4009_v62, %v4007_v44  ;;  %4272 = vmatprep.subr.bf16.mxu1 %v7725_v1 }
0x15a0   : > { %v3947_v3 = vpop.f32.mrb[116].mxu1  ;;  %4061 = vmatprep.subr.bf16.mxu0 %v4026_v2 }
0x15a1   : > { %v3949_v6 = vpop.f32.mrb[117].mxu1  ;;  %4062 = vmatpush1.bf16.msra.mxu0 %v4025_v0  ;;  %v4010_v10 = vmul.f32 %v3984_v4, %v3947_v3  ;;  %4273 = vmatpush1.bf16.msra.mxu1 %v7586_v49  ;;  %v7604_v49 = vld [vmem:[%s9832_s4 + $0x870] ss:$8 sps:$4 sm:$0xff]  }
0x15a2   : > { %v3951_v9 = vpop.f32.mrb[118].mxu1  ;;  %v4011_v14 = vmul.f32 %v3985_v7, %v3949_v6  ;;  %4274 = vmatprep.subr.bf16.mxu1 %v7725_v1 }
0x15a3   : > { %v4012_v12 = vmul.f32 %v3986_v5, %v3951_v9  ;;  %v3953_v13 = vpop.f32.mrb[119].mxu1 }
0x15a4   : > { %v4013_v15 = vmul.f32 %v3987_v8, %v3953_v13 }
0x15a5   : > { %v4027_v16 = vpack.c.bf16 %v4012_v12, %v4010_v10  ;;  %4275 = vmatpush1.bf16.msra.mxu1 %v7587_v38  ;;  %v7605_v38 = vld [vmem:[%s9832_s4 + $0x880] ss:$8 sps:$4 sm:$0xff]  }
0x15a6   : > { %v4028_v18 = vpack.c.bf16 %v4013_v15, %v4011_v14  ;;  %4276 = vmatprep.subr.bf16.mxu1 %v7725_v1 }
0x15a8   : > { %v3957_v26 = vpop.f32.mrb[120].mxu1  ;;  %4063 = vmatprep.subr.bf16.mxu0 %v4028_v18 }
0x15a9   : > { %v4014_v27 = vmul.f32 %v3988_v19, %v3957_v26  ;;  %v3959_v30 = vpop.f32.mrb[121].mxu1  ;;  %4064 = vmatpush1.bf16.msra.mxu0 %v4027_v16  ;;  %4277 = vmatpush1.bf16.msra.mxu1 %v7588_v50  ;;  %v7606_v50 = vld [vmem:[%s9832_s4 + $0x890] ss:$8 sps:$4 sm:$0xff]  }
0x15aa   : > { %v4015_v33 = vmul.f32 %v3989_v31, %v3959_v30  ;;  %v3961_v35 = vpop.f32.mrb[122].mxu1  ;;  %v7600_v30 = vld [vmem:[%s9832_s4 + $0x834] ss:$8 sps:$4 sm:$0xff]  }
0x15ab   : > { %v4029_v36 = vpack.c.bf16 %v4014_v27, %v4014_v27  ;;  %v3962_v40 = vpop.f32.mrb[123].mxu1  ;;  %v4153_v35 = vld [vmem:[%s9834_s6 + $0x7] ss:$0 sm:$0xff] }
0x15ac   : > { %v4030_v41 = vpack.c.bf16 %v4015_v33, %v4015_v33  ;;  %v7598_v33 = vld [vmem:[%s9832_s4 + $0x830] ss:$8 sps:$4 sm:$0xff]  }
0x15ad   : > { %v4048_v61 = vsel %vm3366_vm10, %v4029_v36, 0 }
0x15ae   : > { %6598 = vmatprep.subr.msk.bf16.mxu0 %vm3366_vm10, %v4030_v41 }
0x15af   : > { %4066 = vmatpush1.bf16.msra.mxu0 %v4048_v61 }
0x15b0   : > { %4354 = vmatprep.subr.bf16.mxu0 %v7591_v39  ;;  %v7608_v39 = vld [vmem:[%s9832_s4 + $0x8b0] ss:$8 sps:$4 sm:$0xff]  }
0x15b2   : > { %6599 = vmatmul.mubr.msk.bf16.vlgmr.msra.gmra.mrb[124].mxu0 %vm3362_vm11, %v4016_v42 }
0x15b3   : > { %4386 = vmatprep.mubr.bf16.mxu0 %v7725_v1  ;;  %4355 = vmatpush1.bf16.msra.mxu0 %v7589_v51  ;;  %v7607_v51 = vld [vmem:[%s9832_s4 + $0x8a0] ss:$8 sps:$4 sm:$0xff]  }
0x15b4   : > { %4356 = vmatprep.subr.bf16.mxu0 %v7594_v52  ;;  %v7609_v52 = vld [vmem:[%s9832_s4 + $0x8c0] ss:$8 sps:$4 sm:$0xff]  }
0x15b7   : > { %4357 = vmatpush1.bf16.msra.mxu0 %v7592_v53  ;;  %v7610_v53 = vld [vmem:[%s9832_s4 + $0x8d0] ss:$8 sps:$4 sm:$0xff]  }
0x15b8   : > { %4358 = vmatprep.subr.bf16.mxu0 %v7597_v54  ;;  %v7611_v54 = vld [vmem:[%s9832_s4 + $0x8e0] ss:$8 sps:$4 sm:$0xff]  }
0x15bb   : > { %4359 = vmatpush1.bf16.msra.mxu0 %v7595_v55  ;;  %v7612_v55 = vld [vmem:[%s9832_s4 + $0x8f0] ss:$8 sps:$4 sm:$0xff]  }
0x15bc   : > { %4360 = vmatprep.subr.bf16.mxu0 %v7600_v30 }
0x15bf   : > { %4361 = vmatpush1.bf16.msra.mxu0 %v7598_v33 }
0x15c0   : > { %4539 = vmatprep.subr.bf16.mxu0 %v7725_v1 }
0x1685   : > { %v4087_v58 = vpop.f32.mrb[124].mxu0 }
0x1686   : > { %v4088_v59 = vadd.f32 %v4087_v58, %v4037_v57  ;;  %v4089_v60 = vpop.f32.mrb[125].mxu0  ;;  %v7614_v57 = vld [vmem:[%s9832_s4 + $0x910] ss:$8 sps:$4 sm:$0xff]  }
0x1687   : > { %v4090_v32 = vadd.f32 %v4089_v60, %v4041_v37  ;;  %v4091_v21 = vpop.f32.mrb[126].mxu0  ;;  %v7615_v37 = vld [vmem:[%s9832_s4 + $0x920] ss:$8 sps:$4 sm:$0xff]   ;;  %v7616_v58 = vld [vmem:[%s9832_s4 + $0x930] ss:$8 sps:$4 sm:$0xff]  }
0x1688   : > { %v4094_v23 = vadd.f32 3.0, %v4088_v59  ;;  %v4092_v22 = vpop.f32.mrb[127].mxu0  ;;  %v7621_v60 = vld [vmem:[%s9832_s4 + $0x944] ss:$8 sps:$4 sm:$0xff]  }
0x1689   : > { %v4095_v24 = vadd.f32 3.0, %v4090_v32  ;;  %v6616_v21 = vld [vmem:[%s9834_s6 + $0x10] ss:$8 sm:$0x3] }
0x168a   : > { %v4096_v25 = vmax.f32 %v4094_v23, 0.0  ;;  %v4344_v23 = vrot.slane %v6616_v21, %v8901_v63  ;;  %v4348_v22 = vrot.slane %v6616_v21, %v8924_v17  ;;  %v7627_v21 = vld [vmem:[%s9832_s4 + $0x990] ss:$8 sps:$4 sm:$0xff]  }
0x168b   : > { %v4097_v28 = vmax.f32 %v4095_v24, 0.0 }
0x168c   : > { %v4098_v34 = vmin.f32 %v4096_v25, 6.0 }
0x168d   : > { %v4099_v20 = vmin.f32 %v4097_v28, 6.0 }
0x168e   : > { %v4100_v44 = vmul.f32 0.16666667, %v4098_v34 }
0x168f   : > { %v4101_v62 = vmul.f32 0.16666667, %v4099_v20 }
0x1690   : > { %v9132_v0 = vmul.f32 %v4100_v44, %v4088_v59  ;;  %v7618_v59 = vld [vmem:[%s9832_s4 + $0x934] ss:$8 sps:$4 sm:$0xff]  }
0x1691   : > { %v9134_v2 = vmul.f32 %v4101_v62, %v4090_v32  ;;  %4633 = vmatprep.subr.bf16.mxu1 %v7618_v59  ;;  %v7619_v32 = vld [vmem:[%s9832_s4 + $0x940] ss:$8 sps:$4 sm:$0xff]  }
0x1692   : > { %v4104_v3 = vsel %vm309_vm0, %v9132_v0, 0.0  ;;  %v7624_v59 = vld [vmem:[%s9832_s4 + $0x960] ss:$8 sps:$4 sm:$0xff]  }
0x1693   : > { %v4105_v4 = vrot.slane %v4104_v3, 4  ;;  %v4112_v5 = vsel %vm4111_vm1, %v9134_v2, 0.0 }
0x1694   : > { %v4113_v6 = vrot.slane %v4112_v5, 4 }
0x1695   : > { %v4106_v7 = vadd.f32 %v4105_v4, %v4104_v3 }
0x1696   : > { %v4114_v8 = vadd.f32 %v4113_v6, %v4112_v5 }
0x1697   : > { %v4107_v9 = vrot.slane %v4106_v7, 2 }
0x1698   : > { %v4115_v10 = vrot.slane %v4114_v8, 2 }
0x1699   : > { %v4108_v12 = vadd.f32 %v4107_v9, %v4106_v7 }
0x169a   : > { %v4116_v13 = vadd.f32 %v4115_v10, %v4114_v8 }
0x169b   : > { %v4109_v14 = vrot.slane %v4108_v12, 1 }
0x169c   : > { %v4117_v15 = vrot.slane %v4116_v13, 1 }
0x169d   : > { %v4110_v16 = vadd.f32 %v4109_v14, %v4108_v12 }
0x169e   : > { %v4118_v18 = vadd.f32 %v4117_v15, %v4116_v13 }
0x169f   : > { %v4119_v19 = vmul.f32 0.25, %v4110_v16 }
0x16a0   : > { %v4120_v31 = vmul.f32 0.25, %v4118_v18  ;;  %v4585_v18 = vld [vmem:[%s9832_s4 + $0x950] sm:$0xff] }
0x16a1   : > { %v4121_v27 = vpack.c.bf16 %v4119_v19, %v4119_v19  ;;  %v6648_v19 = vcombine.high %v4585_v18, %v4585_v18 }
0x16a2   : > { %v4122_v26 = vpack.c.bf16 %v4120_v31, %v4120_v31  ;;  %v6647_v31 = vcombine.low %v4585_v18, %v4585_v18 }
0x16a4   : > { %6615 = vmatprep.mubr.msk.bf16.mxu1 %vm4244_vm2, %v4122_v26  ;;  %v4628_v26 = vsel %vm309_vm0, %v6647_v31, 0 }
0x16a5   : > { %4281 = vmatmul.mubr.bf16.vlgmr.msra.gmra.mrb[124].mxu1 %v4121_v27 }
0x16a6   : > { %4665 = vmatprep.mubr.bf16.mxu1 %v7725_v1  ;;  %4634 = vmatpush1.bf16.msra.mxu1 %v7616_v58 }
0x16a7   : > { %4635 = vmatprep.subr.bf16.mxu1 %v7621_v60  ;;  %v7625_v60 = vld [vmem:[%s9832_s4 + $0x970] ss:$8 sps:$4 sm:$0xff]  }
0x16aa   : > { %4636 = vmatpush1.bf16.msra.mxu1 %v7619_v32  ;;  %v7626_v32 = vld [vmem:[%s9832_s4 + $0x980] ss:$8 sps:$4 sm:$0xff]  }
0x16ab   : > { %6649 = vmatprep.subr.msk.bf16.mxu1 %vm309_vm0, %v6648_v19 }
0x16ae   : > { %4638 = vmatpush1.bf16.msra.mxu1 %v4628_v26  ;;  %v4864_v26 = vld [vmem:[%s9833_s5 + $0x300] sm:$0xff] }
0x1778   : > { %v4282_v36 = vpop.f32.mrb[124].mxu1 }
0x1779   : > { %v4283_v40 = vadd.f32 %v4282_v36, %v4153_v35  ;;  %v4284_v41 = vpop.f32.mrb[125].mxu1 }
0x177a   : > { %v4285_v61 = vpop.f32.mrb[126].mxu1  ;;  %v6642_v41 = vld [vmem:[%s9834_s6 + $0x12] ss:$8 sm:$0x3] }
0x177b   : > { %v4288_v42 = vmax.f32 %v4283_v40, 0.0  ;;  %v4286_v43 = vpop.f32.mrb[127].mxu1  ;;  %v4592_v61 = vrot.slane %v6642_v41, %v8901_v63 }
0x177d   : > { %v4289_v46 = vpack.c.bf16 %v4288_v42, %v4288_v42  ;;  %v4596_v42 = vrot.slane %v6642_v41, %v8924_v17 }
0x177f   : > { %6625 = vmatmul.mubr.msk.bf16.vlgmr.msra.gmra.mrb[128].mxu0 %vm1344_vm4, %v4289_v46 }
0x1780   : > { %4540 = vmatpush1.bf16.msra.mxu0 %v7601_v45 }
0x1781   : > { %4541 = vmatprep.subr.bf16.mxu0 %v7725_v1 }
0x1784   : > { %4542 = vmatpush1.bf16.msra.mxu0 %v7602_v47 }
0x1785   : > { %4543 = vmatprep.subr.bf16.mxu0 %v7725_v1 }
0x1788   : > { %4544 = vmatpush1.bf16.msra.mxu0 %v7603_v48 }
0x1789   : > { %4545 = vmatprep.subr.bf16.mxu0 %v7725_v1 }
0x178c   : > { %4546 = vmatpush1.bf16.msra.mxu0 %v7604_v49 }
0x178d   : > { %4547 = vmatprep.subr.bf16.mxu0 %v7725_v1 }
0x1790   : > { %4548 = vmatpush1.bf16.msra.mxu0 %v7605_v38 }
0x1791   : > { %4549 = vmatprep.subr.bf16.mxu0 %v7725_v1 }
0x1794   : > { %4550 = vmatpush1.bf16.msra.mxu0 %v7606_v50 }
0x1795   : > { %4551 = vmatprep.subr.bf16.mxu0 %v7725_v1 }
0x1798   : > { %4552 = vmatpush1.bf16.msra.mxu0 %v7607_v51 }
0x1799   : > { %4553 = vmatprep.subr.bf16.mxu0 %v7725_v1 }
0x179c   : > { %4554 = vmatpush1.bf16.msra.mxu0 %v7608_v39 }
0x179d   : > { %4555 = vmatprep.subr.bf16.mxu0 %v7725_v1 }
0x17a0   : > { %4556 = vmatpush1.bf16.msra.mxu0 %v7609_v52 }
0x17a1   : > { %4557 = vmatprep.subr.bf16.mxu0 %v7725_v1 }
0x17a4   : > { %4558 = vmatpush1.bf16.msra.mxu0 %v7610_v53 }
0x17a5   : > { %4559 = vmatprep.subr.bf16.mxu0 %v7725_v1 }
0x17a8   : > { %4560 = vmatpush1.bf16.msra.mxu0 %v7611_v54 }
0x17a9   : > { %4561 = vmatprep.subr.bf16.mxu0 %v7725_v1 }
0x17ac   : > { %4562 = vmatpush1.bf16.msra.mxu0 %v7612_v55 }
0x17ad   : > { %4563 = vmatprep.subr.bf16.mxu0 %v7725_v1 }
0x17b0   : > { %4564 = vmatpush1.bf16.msra.mxu0 %v7613_v56 }
0x17b1   : > { %4565 = vmatprep.subr.bf16.mxu0 %v7725_v1 }
0x17b4   : > { %4566 = vmatpush1.bf16.msra.mxu0 %v7614_v57 }
0x17b5   : > { %4567 = vmatprep.subr.bf16.mxu0 %v7725_v1 }
0x17b8   : > { %4568 = vmatpush1.bf16.msra.mxu0 %v7615_v37 }
0x1852   : > { %v4388_v24 = vpop.f32.mrb[128].mxu0 }
0x1853   : > { %v4389_v25 = vadd.f32 %v4388_v24, %v4344_v23  ;;  %v4390_v28 = vpop.f32.mrb[129].mxu0  ;;  %v7628_v23 = vld [vmem:[%s9832_s4 + $0x9a0] ss:$8 sps:$4 sm:$0xff]  }
0x1854   : > { %v4391_v34 = vadd.f32 %v4390_v28, %v4348_v22  ;;  %v4392_v20 = vpop.f32.mrb[130].mxu0  ;;  %v7629_v22 = vld [vmem:[%s9832_s4 + $0x9b0] ss:$8 sps:$4 sm:$0xff]   ;;  %v7630_v24 = vld [vmem:[%s9832_s4 + $0x9c0] ss:$0 sps:$4 sm:$0x33]  }
0x1855   : > { %v4395_v44 = vadd.f32 3.0, %v4389_v25  ;;  %v4393_v62 = vpop.f32.mrb[131].mxu0  ;;  %v7631_v25 = vld [vmem:[%s9832_s4 + $0x9e0] ss:$8 sps:$4 sm:$0xff]   ;;  %v7632_v28 = vld [vmem:[%s9832_s4 + $0x9f0] ss:$8 sps:$4 sm:$0xff]  }
0x1856   : > { %v4396_v3 = vadd.f32 3.0, %v4391_v34  ;;  %v7633_v34 = vld [vmem:[%s9832_s4 + $0xa00] ss:$8 sps:$4 sm:$0xff]   ;;  %v7634_v20 = vld [vmem:[%s9832_s4 + $0xa10] ss:$8 sps:$4 sm:$0xff]  }
0x1857   : > { %v4397_v4 = vmax.f32 %v4395_v44, 0.0  ;;  %v7635_v44 = vld [vmem:[%s9832_s4 + $0xa20] ss:$8 sps:$4 sm:$0xff]   ;;  %v7636_v62 = vld [vmem:[%s9832_s4 + $0xa30] ss:$8 sps:$4 sm:$0xff]  }
0x1858   : > { %v4398_v5 = vmax.f32 %v4396_v3, 0.0  ;;  %v7637_v3 = vld [vmem:[%s9832_s4 + $0xa40] ss:$8 sps:$4 sm:$0xff]  }
0x1859   : > { %v4399_v6 = vmin.f32 %v4397_v4, 6.0 }
0x185a   : > { %v4400_v7 = vmin.f32 %v4398_v5, 6.0  ;;  %v4860_v5 = vld [vmem:[%s9833_s5 + $0x2e0] sm:$0xff] }
0x185b   : > { %v4401_v8 = vmul.f32 0.16666667, %v4399_v6  ;;  %v4862_v6 = vld [vmem:[%s9833_s5 + $0x2f0] sm:$0xff] }
0x185c   : > { %v4402_v9 = vmul.f32 0.16666667, %v4400_v7 }
0x185d   : > { %v4406_v10 = vrot.slane %v4401_v8, %v8901_v63  ;;  %v4861_v8 = vld [vmem:[%s9833_s5 + $0x2e8] sm:$0xff] }
0x185e   : > { %v4410_v12 = vrot.slane %v4402_v9, %v8901_v63  ;;  %v4863_v9 = vld [vmem:[%s9833_s5 + $0x2f8] sm:$0xff] }
0x185f   : > { %v4411_v13 = vmul.f32 %v4406_v10, %v9132_v0  ;;  %v4445_v0 = vld [vmem:[%s9834_s6 + $0x11] ss:$0 sm:$0xff] }
0x1860   : > { %v4412_v14 = vmul.f32 %v4410_v12, %v9134_v2 }
0x1861   : > { %v4413_v16 = vpack.c.bf16 %v4411_v13, %v4411_v13 }
0x1862   : > { %v4414_v15 = vpack.c.bf16 %v4412_v14, %v4412_v14 }
0x1864   : > { %6641 = vmatprep.mubr.msk.bf16.mxu0 %vm4244_vm2, %v4414_v15 }
0x1865   : > { %4572 = vmatmul.mubr.bf16.vlgmr.msra.gmra.mrb[132].mxu0 %v4413_v16 }
0x1866   : > { %4981 = vmatprep.mubr.bf16.mxu0 %v7725_v1 }
0x1938   : > { %v4573_v2 = vpop.f32.mrb[132].mxu0 }
0x1939   : > { %v4574_v27 = vadd.f32 %v4573_v2, %v4445_v0  ;;  %v4575_v30 = vpop.f32.mrb[133].mxu0  ;;  %v4866_v0 = vld [vmem:[%s9833_s5 + $0x310] sm:$0xff] }
0x193a   : > { %v4576_v33 = vpop.f32.mrb[134].mxu0  ;;  %v4867_v30 = vld [vmem:[%s9833_s5 + $0x318] sm:$0xff] }
0x193b   : > { %v9244_v35 = vadd.f32 %v4574_v27, %v8915_v11  ;;  %v4577_v36 = vpop.f32.mrb[135].mxu0  ;;  %v4865_v27 = vld [vmem:[%s9833_s5 + $0x308] sm:$0xff] }
0x193d   : > { %v4580_v40 = vpack.c.bf16 %v9244_v35, %v9244_v35 }
0x193f   : > { %6650 = vmatmul.mubr.msk.bf16.vlgmr.msra.gmra.mrb[128].mxu1 %vm3726_vm14, %v4580_v40 }
0x1940   : > { %4791 = vmatprep.mubr.bf16.mxu1 %v7725_v1 }
0x1a12   : > { %v4667_v43 = vpop.f32.mrb[128].mxu1 }
0x1a13   : > { %v4668_v45 = vadd.f32 %v4667_v43, %v4592_v61  ;;  %v4669_v11 = vpop.f32.mrb[129].mxu1 }
0x1a14   : > { %v4670_v46 = vadd.f32 %v4669_v11, %v4596_v42  ;;  %v4671_v47 = vpop.f32.mrb[130].mxu1 }
0x1a15   : > { %v4674_v48 = vadd.f32 3.0, %v4668_v45  ;;  %v4672_v49 = vpop.f32.mrb[131].mxu1  ;;  %v4870_v47 = vld [vmem:[%s9833_s5 + $0x330] sm:$0xff] }
0x1a16   : > { %v4675_v38 = vadd.f32 3.0, %v4670_v46  ;;  %v4869_v49 = vld [vmem:[%s9833_s5 + $0x328] sm:$0xff] }
0x1a17   : > { %v4676_v50 = vmax.f32 %v4674_v48, 0.0 }
0x1a18   : > { %v4677_v51 = vmax.f32 %v4675_v38, 0.0  ;;  %v4871_v38 = vld [vmem:[%s9833_s5 + $0x338] sm:$0xff] }
0x1a19   : > { %v4678_v39 = vmin.f32 %v4676_v50, 6.0 }
0x1a1a   : > { %v4679_v52 = vmin.f32 %v4677_v51, 6.0 }
0x1a1b   : > { %v4680_v53 = vmul.f32 0.16666667, %v4678_v39 }
0x1a1c   : > { %v4681_v54 = vmul.f32 0.16666667, %v4679_v52 }
0x1a1d   : > { %v4682_v55 = vmul.f32 %v4680_v53, %v4668_v45 }
0x1a1e   : > { %v4683_v56 = vmul.f32 %v4681_v54, %v4670_v46  ;;  %v4868_v46 = vld [vmem:[%s9833_s5 + $0x320] sm:$0xff] }
0x1a1f   : > { %v4697_v57 = vpack.c.bf16 %v4682_v55, %v4682_v55 }
0x1a20   : > { %v4698_v37 = vpack.c.bf16 %v4683_v56, %v4683_v56 }
0x1a21   : > { %v4754_v58 = vsel %vm3366_vm10, %v4697_v57, 0 }
0x1a22   : > { %6658 = vmatprep.subr.msk.bf16.mxu1 %vm3366_vm10, %v4698_v37  ;;  %v4872_v37 = vld [vmem:[%s9833_s5 + $0x340] sm:$0xff] }
0x1a23   : > { %4760 = vmatpush1.bf16.msra.mxu1 %v4754_v58  ;;  %v4874_v58 = vld [vmem:[%s9833_s5 + $0x350] sm:$0xff] }
0x1a24   : > { %5142 = vmatprep.subr.bf16.mxu1 %v7725_v1 }
0x1a26   : > { %6659 = vmatmul.mubr.msk.bf16.vlgmr.msra.gmra.mrb[132].mxu1 %vm3835_vm15, %v7624_v59 }
0x1a27   : > { %4801 = vmatprep.mubr.bf16.mxu1 %v7725_v1  ;;  %5143 = vmatpush1.bf16.msra.mxu1 %v7631_v25 }
0x1a28   : > { %5144 = vmatprep.subr.bf16.mxu1 %v7725_v1 }
0x1a2b   : > { %5145 = vmatpush1.bf16.msra.mxu1 %v7632_v28 }
0x1a2c   : > { %5146 = vmatprep.subr.bf16.mxu1 %v7725_v1 }
0x1a2e   : > { %6660 = vmatmul.mubr.msk.bf16.gmra.mrb[136].mxu1 %vm3835_vm15, %v7625_v60  ;;  %v4873_v60 = vld [vmem:[%s9833_s5 + $0x348] sm:$0xff] }
0x1a2f   : > { %4811 = vmatprep.mubr.bf16.mxu1 %v7725_v1  ;;  %5147 = vmatpush1.bf16.msra.mxu1 %v7633_v34 }
0x1a30   : > { %5148 = vmatprep.subr.bf16.mxu1 %v7725_v1 }
0x1a33   : > { %5149 = vmatpush1.bf16.msra.mxu1 %v7634_v20 }
0x1a34   : > { %5150 = vmatprep.subr.bf16.mxu1 %v7725_v1 }
0x1a36   : > { %6661 = vmatmul.mubr.msk.bf16.gmra.mrb[140].mxu1 %vm3835_vm15, %v7626_v32  ;;  %v4875_v32 = vld [vmem:[%s9833_s5 + $0x358] sm:$0xff] }
0x1a37   : > { %4821 = vmatprep.mubr.bf16.mxu1 %v7725_v1  ;;  %5151 = vmatpush1.bf16.msra.mxu1 %v7635_v44 }
0x1a38   : > { %5152 = vmatprep.subr.bf16.mxu1 %v7725_v1 }
0x1a3b   : > { %5153 = vmatpush1.bf16.msra.mxu1 %v7636_v62  ;;  %v4876_v62 = vld [vmem:[%s9833_s5 + $0x360] sm:$0xff] }
0x1a3c   : > { %5154 = vmatprep.subr.bf16.mxu1 %v7725_v1 }
0x1a3e   : > { %6662 = vmatmul.mubr.msk.bf16.gmra.mrb[144].mxu1 %vm3835_vm15, %v7627_v21 }
0x1a3f   : > { %4831 = vmatprep.mubr.bf16.mxu1 %v7725_v1  ;;  %5155 = vmatpush1.bf16.msra.mxu1 %v7637_v3  ;;  %v4878_v3 = vld [vmem:[%s9833_s5 + $0x370] sm:$0xff] }
0x1a40   : > { %5156 = vmatprep.subr.bf16.mxu1 %v7725_v1 }
0x1a46   : > { %6663 = vmatmul.mubr.msk.bf16.gmra.mrb[148].mxu1 %vm3835_vm15, %v7628_v23 }
0x1a47   : > { %4841 = vmatprep.mubr.bf16.mxu1 %v7725_v1 }
0x1a4e   : > { %6664 = vmatmul.mubr.msk.bf16.gmra.mrb[152].mxu1 %vm3835_vm15, %v7629_v22 }
0x1a4f   : > { %4851 = vmatprep.mubr.bf16.mxu1 %v7725_v1 }
0x1a56   : > { %6665 = vmatmul.mubr.msk.bf16.gmra.mrb[156].mxu1 %vm3835_vm15, %v7630_v24 }
0x1af9   : > { %v4793_v4 = vpop.f32.mrb[132].mxu1 }
0x1afa   : > { %v4795_v7 = vpop.f32.mrb[133].mxu1  ;;  %v4886_v12 = vmul.f32 %v4860_v5, %v4793_v4  ;;  %v4877_v5 = vld [vmem:[%s9833_s5 + $0x368] sm:$0xff] }
0x1afb   : > { %v4797_v10 = vpop.f32.mrb[134].mxu1  ;;  %v4887_v15 = vmul.f32 %v4861_v8, %v4795_v7 }
0x1afc   : > { %v4888_v13 = vmul.f32 %v4862_v6, %v4797_v10  ;;  %v4799_v14 = vpop.f32.mrb[135].mxu1  ;;  %v4879_v6 = vld [vmem:[%s9833_s5 + $0x378] sm:$0xff] }
0x1afd   : > { %v4889_v16 = vmul.f32 %v4863_v9, %v4799_v14 }
0x1afe   : > { %v4913_v18 = vpack.c.bf16 %v4888_v13, %v4886_v12 }
0x1aff   : > { %v4914_v19 = vpack.c.bf16 %v4889_v16, %v4887_v15 }
0x1b01   : > { %v4803_v31 = vpop.f32.mrb[136].mxu1  ;;  %4949 = vmatprep.subr.bf16.mxu0 %v4914_v19  ;;  %v4882_v19 = vld [vmem:[%s9833_s5 + $0x390] sm:$0xff] }
0x1b02   : > { %v4805_v2 = vpop.f32.mrb[137].mxu1  ;;  %4950 = vmatpush1.bf16.msra.mxu0 %v4913_v18  ;;  %v4890_v36 = vmul.f32 %v4864_v26, %v4803_v31  ;;  %v4880_v18 = vld [vmem:[%s9833_s5 + $0x380] sm:$0xff]  ;;  %v4881_v26 = vld [vmem:[%s9833_s5 + $0x388] sm:$0xff] }
0x1b03   : > { %v4807_v33 = vpop.f32.mrb[138].mxu1  ;;  %v4891_v61 = vmul.f32 %v4865_v27, %v4805_v2 }
0x1b04   : > { %v4892_v40 = vmul.f32 %v4866_v0, %v4807_v33  ;;  %v4809_v41 = vpop.f32.mrb[139].mxu1  ;;  %v4883_v0 = vld [vmem:[%s9833_s5 + $0x398] sm:$0xff] }
0x1b05   : > { %v4893_v42 = vmul.f32 %v4867_v30, %v4809_v41 }
0x1b06   : > { %v4915_v43 = vpack.c.bf16 %v4892_v40, %v4890_v36 }
0x1b07   : > { %v4916_v45 = vpack.c.bf16 %v4893_v42, %v4891_v61  ;;  %v4884_v42 = vld [vmem:[%s9833_s5 + $0x3a0] sm:$0xf] }
0x1b09   : > { %v4813_v11 = vpop.f32.mrb[140].mxu1  ;;  %4951 = vmatprep.subr.bf16.mxu0 %v4916_v45 }
0x1b0a   : > { %v4815_v48 = vpop.f32.mrb[141].mxu1  ;;  %4952 = vmatpush1.bf16.msra.mxu0 %v4915_v43  ;;  %v4894_v51 = vmul.f32 %v4868_v46, %v4813_v11  ;;  %v4885_v43 = vld [vmem:[%s9833_s5 + $0x3a8] sm:$0xf] }
0x1b0b   : > { %v4817_v50 = vpop.f32.mrb[142].mxu1  ;;  %v4895_v53 = vmul.f32 %v4869_v49, %v4815_v48 }
0x1b0c   : > { %v4896_v39 = vmul.f32 %v4870_v47, %v4817_v50  ;;  %v4819_v52 = vpop.f32.mrb[143].mxu1 }
0x1b0d   : > { %v4897_v54 = vmul.f32 %v4871_v38, %v4819_v52  ;;  %v7638_v52 = vld [vmem:[%s9832_s4 + $0xa50] ss:$8 sps:$4 sm:$0xff]  }
0x1b0e   : > { %v4917_v55 = vpack.c.bf16 %v4896_v39, %v4894_v51  ;;  %v4912_v39 = vld [vmem:[%s9832_s4 + $0x9d0] sm:$0x3]  ;;  %5157 = vmatpush1.bf16.msra.mxu1 %v7638_v52 }
0x1b0f   : > { %v4918_v56 = vpack.c.bf16 %v4897_v54, %v4895_v53  ;;  %5158 = vmatprep.subr.bf16.mxu1 %v7725_v1  ;;  %v7639_v53 = vld [vmem:[%s9832_s4 + $0xa60] ss:$8 sps:$4 sm:$0xff]   ;;  %v7640_v54 = vld [vmem:[%s9832_s4 + $0xa70] ss:$8 sps:$4 sm:$0xff]  }
0x1b10   : > { %v7664_v52 = vld [vmem:[%s9832_s4 + $0xb70] ss:$8 sps:$4 sm:$0xff]  }
0x1b11   : > { %v4823_v57 = vpop.f32.mrb[144].mxu1  ;;  %4953 = vmatprep.subr.bf16.mxu0 %v4918_v56  ;;  %v7642_v56 = vld [vmem:[%s9832_s4 + $0xa90] ss:$8 sps:$4 sm:$0xff]  }
0x1b12   : > { %v4825_v59 = vpop.f32.mrb[145].mxu1  ;;  %4954 = vmatpush1.bf16.msra.mxu0 %v4917_v55  ;;  %v4898_v23 = vmul.f32 %v4872_v37, %v4823_v57  ;;  %5159 = vmatpush1.bf16.msra.mxu1 %v7639_v53  ;;  %v7641_v55 = vld [vmem:[%s9832_s4 + $0xa80] ss:$8 sps:$4 sm:$0xff]   ;;  %v7644_v37 = vld [vmem:[%s9832_s4 + $0xab0] ss:$8 sps:$4 sm:$0xff]  }
0x1b13   : > { %v4827_v21 = vpop.f32.mrb[146].mxu1  ;;  %v4899_v25 = vmul.f32 %v4873_v60, %v4825_v59  ;;  %5160 = vmatprep.subr.bf16.mxu1 %v7725_v1  ;;  %v7643_v57 = vld [vmem:[%s9832_s4 + $0xaa0] ss:$8 sps:$4 sm:$0xff]   ;;  %v7646_v59 = vld [vmem:[%s9832_s4 + $0xad0] ss:$8 sps:$4 sm:$0xff]  }
0x1b14   : > { %v4900_v22 = vmul.f32 %v4874_v58, %v4827_v21  ;;  %v4829_v24 = vpop.f32.mrb[147].mxu1  ;;  %v7645_v58 = vld [vmem:[%s9832_s4 + $0xac0] ss:$8 sps:$4 sm:$0xff]   ;;  %v7648_v60 = vld [vmem:[%s9832_s4 + $0xad4] ss:$8 sps:$4 sm:$0xff]  }
0x1b15   : > { %v4901_v28 = vmul.f32 %v4875_v32, %v4829_v24  ;;  %v7651_v32 = vld [vmem:[%s9832_s4 + $0xae4] ss:$8 sps:$4 sm:$0xff]   ;;  %v7649_v21 = vld [vmem:[%s9832_s4 + $0xae0] ss:$8 sps:$4 sm:$0xff]  }
0x1b16   : > { %v4919_v34 = vpack.c.bf16 %v4900_v22, %v4898_v23  ;;  %5161 = vmatpush1.bf16.msra.mxu1 %v7640_v54  ;;  %v7654_v23 = vld [vmem:[%s9832_s4 + $0xaf4] ss:$8 sps:$4 sm:$0xff]   ;;  %v7652_v22 = vld [vmem:[%s9832_s4 + $0xaf0] ss:$8 sps:$4 sm:$0xff]   ;;  %v7665_v53 = vld [vmem:[%s9832_s4 + $0xb80] ss:$8 sps:$4 sm:$0xff]  }
0x1b17   : > { %v4920_v20 = vpack.c.bf16 %v4901_v28, %v4899_v25  ;;  %5162 = vmatprep.subr.bf16.mxu1 %v7725_v1  ;;  %v6666_v24 = vld [vmem:[%s9834_s6 + $0x13] ss:$8 sm:$0x3] }
0x1b18   : > { %v4933_v25 = vrot.slane %v6666_v24, %v8901_v63  ;;  %v4937_v28 = vrot.slane %v6666_v24, %v8924_v17  ;;  %v7666_v54 = vld [vmem:[%s9832_s4 + $0xb90] ss:$8 sps:$4 sm:$0xff]  }
0x1b19   : > { %v4833_v44 = vpop.f32.mrb[148].mxu1  ;;  %4955 = vmatprep.subr.bf16.mxu0 %v4920_v20  ;;  %v7670_v24 = vld [vmem:[%s9832_s4 + $0xbd0] ss:$8 sps:$4 sm:$0xff]  }
0x1b1a   : > { %v4835_v4 = vpop.f32.mrb[149].mxu1  ;;  %4956 = vmatpush1.bf16.msra.mxu0 %v4919_v34  ;;  %v4902_v8 = vmul.f32 %v4876_v62, %v4833_v44  ;;  %5163 = vmatpush1.bf16.msra.mxu1 %v7641_v55  ;;  %v7667_v55 = vld [vmem:[%s9832_s4 + $0xba0] ss:$8 sps:$4 sm:$0xff]  }
0x1b1b   : > { %v4837_v7 = vpop.f32.mrb[150].mxu1  ;;  %v4903_v12 = vmul.f32 %v4877_v5, %v4835_v4  ;;  %5164 = vmatprep.subr.bf16.mxu1 %v7725_v1 }
0x1b1c   : > { %v4904_v9 = vmul.f32 %v4878_v3, %v4837_v7  ;;  %v4839_v10 = vpop.f32.mrb[151].mxu1 }
0x1b1d   : > { %v4905_v13 = vmul.f32 %v4879_v6, %v4839_v10 }
0x1b1e   : > { %v4921_v14 = vpack.c.bf16 %v4904_v9, %v4902_v8  ;;  %5165 = vmatpush1.bf16.msra.mxu1 %v7642_v56  ;;  %v5048_v56 = vld [vmem:[%s9834_s6 + $0x14] ss:$0 sm:$0xff] }
0x1b1f   : > { %v4922_v15 = vpack.c.bf16 %v4905_v13, %v4903_v12  ;;  %5166 = vmatprep.subr.bf16.mxu1 %v7725_v1 }
0x1b21   : > { %v4843_v16 = vpop.f32.mrb[152].mxu1  ;;  %4957 = vmatprep.subr.bf16.mxu0 %v4922_v15 }
0x1b22   : > { %v4845_v31 = vpop.f32.mrb[153].mxu1  ;;  %4958 = vmatpush1.bf16.msra.mxu0 %v4921_v14  ;;  %v4906_v27 = vmul.f32 %v4880_v18, %v4843_v16  ;;  %5167 = vmatpush1.bf16.msra.mxu1 %v7643_v57 }
0x1b23   : > { %v4847_v2 = vpop.f32.mrb[154].mxu1  ;;  %v4907_v36 = vmul.f32 %v4881_v26, %v4845_v31  ;;  %5168 = vmatprep.subr.bf16.mxu1 %v7725_v1 }
0x1b24   : > { %v4908_v30 = vmul.f32 %v4882_v19, %v4847_v2  ;;  %v4849_v33 = vpop.f32.mrb[155].mxu1 }
0x1b25   : > { %v4909_v40 = vmul.f32 %v4883_v0, %v4849_v33 }
0x1b26   : > { %v4923_v41 = vpack.c.bf16 %v4908_v30, %v4906_v27  ;;  %5169 = vmatpush1.bf16.msra.mxu1 %v7644_v37 }
0x1b27   : > { %v4924_v61 = vpack.c.bf16 %v4909_v40, %v4907_v36  ;;  %5170 = vmatprep.subr.bf16.mxu1 %v7725_v1 }
0x1b29   : > { %v4853_v45 = vpop.f32.mrb[156].mxu1  ;;  %4959 = vmatprep.subr.bf16.mxu0 %v4924_v61 }
0x1b2a   : > { %v4910_v11 = vmul.f32 %v4884_v42, %v4853_v45  ;;  %v4855_v46 = vpop.f32.mrb[157].mxu1  ;;  %4960 = vmatpush1.bf16.msra.mxu0 %v4923_v41  ;;  %5171 = vmatpush1.bf16.msra.mxu1 %v7645_v58 }
0x1b2b   : > { %v4911_v47 = vmul.f32 %v4885_v43, %v4855_v46  ;;  %v4857_v48 = vpop.f32.mrb[158].mxu1  ;;  %5433 = vmatprep.subr.bf16.mxu1 %v7725_v1  ;;  %v7657_v46 = vld [vmem:[%s9832_s4 + $0xb04] ss:$8 sps:$4 sm:$0xff]  }
0x1b2c   : > { %v4925_v49 = vpack.c.bf16 %v4910_v11, %v4910_v11  ;;  %v4858_v38 = vpop.f32.mrb[159].mxu1  ;;  %v7658_v48 = vld [vmem:[%s9832_s4 + $0xb10] ss:$8 sps:$4 sm:$0xff]  }
0x1b2d   : > { %v4926_v50 = vpack.c.bf16 %v4911_v47, %v4911_v47  ;;  %v7655_v47 = vld [vmem:[%s9832_s4 + $0xb00] ss:$8 sps:$4 sm:$0xff]   ;;  %v7660_v38 = vld [vmem:[%s9832_s4 + $0xb30] ss:$8 sps:$4 sm:$0xff]  }
0x1b2e   : > { %v4944_v51 = vsel %vm3366_vm10, %v4925_v49, 0  ;;  %v7659_v49 = vld [vmem:[%s9832_s4 + $0xb20] ss:$8 sps:$4 sm:$0xff]  }
0x1b2f   : > { %6667 = vmatprep.subr.msk.bf16.mxu0 %vm3366_vm10, %v4926_v50  ;;  %v7661_v50 = vld [vmem:[%s9832_s4 + $0xb40] ss:$8 sps:$4 sm:$0xff]  }
0x1b30   : > { %4962 = vmatpush1.bf16.msra.mxu0 %v4944_v51  ;;  %v7662_v51 = vld [vmem:[%s9832_s4 + $0xb50] ss:$8 sps:$4 sm:$0xff]  }
0x1b31   : > { %5248 = vmatprep.subr.bf16.mxu0 %v7648_v60 }
0x1b33   : > { %6668 = vmatmul.mubr.msk.bf16.vlgmr.msra.gmra.mrb[136].mxu0 %vm3362_vm11, %v4912_v39  ;;  %v7663_v39 = vld [vmem:[%s9832_s4 + $0xb60] ss:$8 sps:$4 sm:$0xff]  }
0x1b34   : > { %5280 = vmatprep.mubr.bf16.mxu0 %v7725_v1  ;;  %5249 = vmatpush1.bf16.msra.mxu0 %v7646_v59 }
0x1b35   : > { %5250 = vmatprep.subr.bf16.mxu0 %v7651_v32 }
0x1b38   : > { %5251 = vmatpush1.bf16.msra.mxu0 %v7649_v21 }
0x1b39   : > { %5252 = vmatprep.subr.bf16.mxu0 %v7654_v23  ;;  %v7668_v23 = vld [vmem:[%s9832_s4 + $0xbb0] ss:$8 sps:$4 sm:$0xff]  }
0x1b3c   : > { %5253 = vmatpush1.bf16.msra.mxu0 %v7652_v22  ;;  %v7669_v22 = vld [vmem:[%s9832_s4 + $0xbc0] ss:$8 sps:$4 sm:$0xff]  }
0x1b3d   : > { %5254 = vmatprep.subr.bf16.mxu0 %v7657_v46 }
0x1b40   : > { %5255 = vmatpush1.bf16.msra.mxu0 %v7655_v47 }
0x1b41   : > { %7156 = vmatprep.subr.bf16.mxu0 %v7727_v29 }
0x1c06   : > { %v4983_v34 = vpop.f32.mrb[136].mxu0 }
0x1c07   : > { %v4984_v20 = vadd.f32 %v4983_v34, %v4933_v25  ;;  %v4985_v44 = vpop.f32.mrb[137].mxu0  ;;  %v7671_v25 = vld [vmem:[%s9832_s4 + $0xbe0] ss:$8 sps:$4 sm:$0xff]  }
0x1c08   : > { %v4986_v62 = vadd.f32 %v4985_v44, %v4937_v28  ;;  %v4987_v3 = vpop.f32.mrb[138].mxu0  ;;  %v7672_v28 = vld [vmem:[%s9832_s4 + $0xbf0] ss:$8 sps:$4 sm:$0xff]   ;;  %v7673_v34 = vld [vmem:[%s9832_s4 + $0xc00] ss:$8 sps:$4 sm:$0xff]  }
0x1c09   : > { %v4990_v4 = vadd.f32 3.0, %v4984_v20  ;;  %v4988_v5 = vpop.f32.mrb[139].mxu0 }
0x1c0a   : > { %v4991_v6 = vadd.f32 3.0, %v4986_v62 }
0x1c0b   : > { %v4992_v7 = vmax.f32 %v4990_v4, 0.0 }
0x1c0c   : > { %v4993_v8 = vmax.f32 %v4991_v6, 0.0 }
0x1c0d   : > { %v4994_v9 = vmin.f32 %v4992_v7, 6.0 }
0x1c0e   : > { %v4995_v10 = vmin.f32 %v4993_v8, 6.0 }
0x1c0f   : > { %v4996_v12 = vmul.f32 0.16666667, %v4994_v9 }
0x1c10   : > { %v4997_v13 = vmul.f32 0.16666667, %v4995_v10 }
0x1c11   : > { %v9460_v14 = vmul.f32 %v4996_v12, %v4984_v20  ;;  %v6685_v20 = vld [vmem:[%s9834_s6 + $0x15] ss:$8 sm:$0x3] }
0x1c12   : > { %v9462_v15 = vmul.f32 %v4997_v13, %v4986_v62  ;;  %v5242_v44 = vrot.slane %v6685_v20, %v8924_v17 }
0x1c13   : > { %v5000_v16 = vsel %vm309_vm0, %v9460_v14, 0.0 }
0x1c14   : > { %v5001_v18 = vrot.slane %v5000_v16, 4  ;;  %v5007_v19 = vsel %vm4111_vm1, %v9462_v15, 0.0 }
0x1c15   : > { %v5008_v31 = vrot.slane %v5007_v19, 4 }
0x1c16   : > { %v5002_v26 = vadd.f32 %v5001_v18, %v5000_v16 }
0x1c17   : > { %v5009_v0 = vadd.f32 %v5008_v31, %v5007_v19 }
0x1c18   : > { %v5003_v2 = vrot.slane %v5002_v26, 2 }
0x1c19   : > { %v5010_v27 = vrot.slane %v5009_v0, 2 }
0x1c1a   : > { %v5004_v30 = vadd.f32 %v5003_v2, %v5002_v26 }
0x1c1b   : > { %v5011_v33 = vadd.f32 %v5010_v27, %v5009_v0 }
0x1c1c   : > { %v5005_v36 = vrot.slane %v5004_v30, 1 }
0x1c1d   : > { %v5012_v40 = vrot.slane %v5011_v33, 1 }
0x1c1e   : > { %v5006_v41 = vadd.f32 %v5005_v36, %v5004_v30  ;;  %v7674_v30 = vld [vmem:[%s9832_s4 + $0xc10] ss:$8 sps:$4 sm:$0xff]  }
0x1c1f   : > { %v5013_v61 = vadd.f32 %v5012_v40, %v5011_v33  ;;  %v5339_v33 = vld [vmem:[%s9834_s6 + $0x16] ss:$0 sm:$0xff] }
0x1c20   : > { %v5014_v42 = vmul.f32 0.25, %v5006_v41 }
0x1c21   : > { %v5015_v43 = vmul.f32 0.25, %v5013_v61 }
0x1c22   : > { %v5016_v11 = vpack.c.bf16 %v5014_v42, %v5014_v42 }
0x1c23   : > { %v5017_v45 = vpack.c.bf16 %v5015_v43, %v5015_v43 }
0x1c25   : > { %6684 = vmatprep.mubr.msk.bf16.mxu1 %vm4244_vm2, %v5017_v45 }
0x1c26   : > { %5175 = vmatmul.mubr.bf16.vlgmr.msra.gmra.mrb[160].mxu1 %v5016_v11  ;;  %v5480_v11 = vld [vmem:[%s9834_s6 + $0x17] ss:$0 sm:$0xff] }
0x1c27   : > { %5434 = vmatpush1.bf16.msra.mxu1 %v7658_v48 }
0x1c28   : > { %5435 = vmatprep.subr.bf16.mxu1 %v7725_v1 }
0x1c2b   : > { %5436 = vmatpush1.bf16.msra.mxu1 %v7659_v49 }
0x1c2c   : > { %5437 = vmatprep.subr.bf16.mxu1 %v7725_v1 }
0x1c2f   : > { %5438 = vmatpush1.bf16.msra.mxu1 %v7660_v38 }
0x1c30   : > { %5439 = vmatprep.subr.bf16.mxu1 %v7725_v1 }
0x1c33   : > { %5440 = vmatpush1.bf16.msra.mxu1 %v7661_v50 }
0x1c34   : > { %5441 = vmatprep.subr.bf16.mxu1 %v7725_v1 }
0x1c37   : > { %5442 = vmatpush1.bf16.msra.mxu1 %v7662_v51 }
0x1c38   : > { %5443 = vmatprep.subr.bf16.mxu1 %v7725_v1 }
0x1c3b   : > { %5444 = vmatpush1.bf16.msra.mxu1 %v7663_v39 }
0x1c3c   : > { %5445 = vmatprep.subr.bf16.mxu1 %v7725_v1 }
0x1c3f   : > { %5446 = vmatpush1.bf16.msra.mxu1 %v7664_v52 }
0x1c40   : > { %5447 = vmatprep.subr.bf16.mxu1 %v7725_v1 }
0x1c43   : > { %5448 = vmatpush1.bf16.msra.mxu1 %v7665_v53 }
0x1c44   : > { %5449 = vmatprep.subr.bf16.mxu1 %v7725_v1 }
0x1c47   : > { %5450 = vmatpush1.bf16.msra.mxu1 %v7666_v54 }
0x1c48   : > { %5451 = vmatprep.subr.bf16.mxu1 %v7725_v1 }
0x1c4b   : > { %5452 = vmatpush1.bf16.msra.mxu1 %v7667_v55  ;;  %v7676_v55 = vld [vmem:[%s9832_s4 + $0xc30] ss:$8 sps:$4 sm:$0xff]  }
0x1c4c   : > { %5453 = vmatprep.subr.bf16.mxu1 %v7725_v1 }
0x1c4f   : > { %5454 = vmatpush1.bf16.msra.mxu1 %v7668_v23  ;;  %v5706_v23 = vld [vmem:[%s9833_s5 + $0x3b0] sm:$0xff] }
0x1c50   : > { %5455 = vmatprep.subr.bf16.mxu1 %v7725_v1 }
0x1c53   : > { %5456 = vmatpush1.bf16.msra.mxu1 %v7669_v22  ;;  %v5707_v22 = vld [vmem:[%s9833_s5 + $0x3c0] sm:$0xff] }
0x1c54   : > { %5457 = vmatprep.subr.bf16.mxu1 %v7725_v1 }
0x1c57   : > { %5458 = vmatpush1.bf16.msra.mxu1 %v7670_v24 }
0x1c58   : > { %5459 = vmatprep.subr.bf16.mxu1 %v7725_v1 }
0x1c5b   : > { %5460 = vmatpush1.bf16.msra.mxu1 %v7671_v25 }
0x1c5c   : > { %5461 = vmatprep.subr.bf16.mxu1 %v7725_v1  ;;  %v5238_v1 = vrot.slane %v6685_v20, %v8901_v63 }
0x1c5f   : > { %5462 = vmatpush1.bf16.msra.mxu1 %v7672_v28 }
0x1c60   : > { %7214 = vmatprep.subr.bf16.mxu1 %v7727_v29 }
0x1cf9   : > { %v5176_v57 = vpop.f32.mrb[160].mxu1 }
0x1cfa   : > { %v5177_v37 = vadd.f32 %v5176_v57, %v5048_v56  ;;  %v5178_v58 = vpop.f32.mrb[161].mxu1  ;;  %v7677_v56 = vld [vmem:[%s9832_s4 + $0xc40] ss:$8 sps:$4 sm:$0xff]   ;;  %v7678_v57 = vld [vmem:[%s9832_s4 + $0xc50] ss:$8 sps:$4 sm:$0xff]  }
0x1cfb   : > { %v5179_v59 = vpop.f32.mrb[162].mxu1  ;;  %v7680_v58 = vld [vmem:[%s9832_s4 + $0xc70] ss:$8 sps:$4 sm:$0xff]  }
0x1cfc   : > { %v5182_v60 = vmax.f32 %v5177_v37, 0.0  ;;  %v5180_v32 = vpop.f32.mrb[163].mxu1  ;;  %v7679_v37 = vld [vmem:[%s9832_s4 + $0xc60] ss:$8 sps:$4 sm:$0xff]  }
0x1cfd   : > { %v7681_v59 = vld [vmem:[%s9832_s4 + $0xc80] ss:$8 sps:$4 sm:$0xff]   ;;  %v7683_v32 = vld [vmem:[%s9832_s4 + $0xcb0] ss:$8 sps:$4 sm:$0xff]  }
0x1cfe   : > { %v5183_v21 = vpack.c.bf16 %v5182_v60, %v5182_v60  ;;  %v7682_v60 = vld [vmem:[%s9832_s4 + $0xc90] ss:$0 sps:$4 sm:$0x33]  }
0x1d00   : > { %6694 = vmatmul.mubr.msk.bf16.vlgmr.msra.gmra.mrb[140].mxu0 %vm1344_vm4, %v5183_v21  ;;  %vm5792_vm4 = vcmask 977920  }
0x1d01   : > { %7162 = vmatprep.mubr.msk.bf16.mxu0 %vm7729_vm3, %v7727_v29  ;;  %7157 = vmatpush3.bf16.msra.mxu0 %v7673_v34 }
0x1d02   : > { %7158 = vmatprep.subr.bf16.mxu0 %v7727_v29 }
0x1d05   : > { %7159 = vmatpush3.bf16.msra.mxu0 %v7674_v30 }
0x1d06   : > { %7160 = vmatprep.subr.bf16.mxu0 %v7727_v29 }
0x1dd3   : > { %v5282_v62 = vpop.f32.mrb[140].mxu0 }
0x1dd4   : > { %v5283_v3 = vadd.f32 %v5282_v62, %v5238_v1  ;;  %v5284_v4 = vpop.f32.mrb[141].mxu0  ;;  %v5708_v62 = vld [vmem:[%s9833_s5 + $0x3d0] sm:$0xff] }
0x1dd5   : > { %v5285_v5 = vadd.f32 %v5284_v4, %v5242_v44  ;;  %v5286_v6 = vpop.f32.mrb[142].mxu0 }
0x1dd6   : > { %v5289_v7 = vadd.f32 3.0, %v5283_v3  ;;  %v5287_v8 = vpop.f32.mrb[143].mxu0  ;;  %v5709_v3 = vld [vmem:[%s9833_s5 + $0x3e0] sm:$0xff] }
0x1dd7   : > { %v5290_v9 = vadd.f32 3.0, %v5285_v5 }
0x1dd8   : > { %v5291_v10 = vmax.f32 %v5289_v7, 0.0 }
0x1dd9   : > { %v5292_v12 = vmax.f32 %v5290_v9, 0.0 }
0x1dda   : > { %v5293_v13 = vmin.f32 %v5291_v10, 6.0 }
0x1ddb   : > { %v5294_v16 = vmin.f32 %v5292_v12, 6.0  ;;  %v5710_v12 = vld [vmem:[%s9833_s5 + $0x3f0] sm:$0xff] }
0x1ddc   : > { %v5295_v18 = vmul.f32 0.16666667, %v5293_v13  ;;  %v5711_v13 = vld [vmem:[%s9833_s5 + $0x400] sm:$0xff] }
0x1ddd   : > { %v5296_v19 = vmul.f32 0.16666667, %v5294_v16 }
0x1dde   : > { %v5300_v31 = vrot.slane %v5295_v18, %v8901_v63 }
0x1ddf   : > { %v5304_v26 = vrot.slane %v5296_v19, %v8901_v63 }
0x1de0   : > { %v5305_v17 = vmul.f32 %v5300_v31, %v9460_v14  ;;  %v7675_v14 = vld [vmem:[%s9832_s4 + $0xc20] ss:$0 sps:$4 sm:$0xff]  }
0x1de1   : > { %v5306_v0 = vmul.f32 %v5304_v26, %v9462_v15  ;;  %v5500_v15 = vsel %vm309_vm0, %v7675_v14, 0 }
0x1de2   : > { %v5307_v27 = vpack.c.bf16 %v5305_v17, %v5305_v17  ;;  %7161 = vmatpush3.bf16.msra.mxu0 %v5500_v15 }
0x1de3   : > { %v5308_v2 = vpack.c.bf16 %v5306_v0, %v5306_v0  ;;  %7166 = vmatprep.subr.bf16.mxu0 %v7727_v29 }
0x1de5   : > { %6710 = vmatprep.mubr.msk.bf16.mxu1 %vm4244_vm2, %v5308_v2  ;;  %v5712_v2 = vld [vmem:[%s9833_s5 + $0x410] sm:$0xff] }
0x1de6   : > { %5466 = vmatmul.mubr.bf16.vlgmr.msra.gmra.mrb[164].mxu1 %v5307_v27  ;;  %v5713_v27 = vld [vmem:[%s9833_s5 + $0x420] sm:$0xff] }
0x1de7   : > { %7230 = vmatprep.mubr.msk.bf16.mxu1 %vm7729_vm3, %v7727_v29  ;;  %7215 = vmatpush3.bf16.msra.mxu1 %v7683_v32 }
0x1de8   : > { %7216 = vmatprep.subr.bf16.mxu1 %v7727_v29 }
0x1eb9   : > { %v5467_v36 = vpop.f32.mrb[164].mxu1 }
0x1eba   : > { %v5468_v40 = vadd.f32 %v5467_v36, %v5339_v33  ;;  %v5469_v41 = vpop.f32.mrb[165].mxu1 }
0x1ebb   : > { %v5470_v61 = vpop.f32.mrb[166].mxu1 }
0x1ebc   : > { %v5473_v42 = vadd.f32 %v5468_v40, %v9244_v35  ;;  %v5471_v43 = vpop.f32.mrb[167].mxu1  ;;  %v5714_v61 = vld [vmem:[%s9833_s5 + $0x430] sm:$0xff] }
0x1ebe   : > { %v5474_v45 = vpack.c.bf16 %v5473_v42, %v5473_v42  ;;  %v5715_v42 = vld [vmem:[%s9833_s5 + $0x440] sm:$0xff] }
0x1ec0   : > { %7163 = vmatmul.mubr.msk.bf16.vlgmr.msra.gmra.mrb[144].mxu0 %vm3726_vm14, %v5474_v45 }
0x1ec1   : > { %7168 = vmatprep.mubr.msk.bf16.mxu0 %vm7729_vm3, %v7727_v29 }
0x1f93   : > { %v5536_v46 = vpop.f32.mrb[144].mxu0 }
0x1f94   : > { %v5537_v47 = vadd.f32 %v5536_v46, %v5480_v11  ;;  %v7164_v48 = vpop.f32.mrb[145].mxu0 }
0x1f95   : > { %v5539_v49 = vpop.f32.mrb[146].mxu0 }
0x1f96   : > { %v5542_v38 = vadd.f32 3.0, %v5537_v47  ;;  %v7165_v50 = vpop.f32.mrb[147].mxu0 }
0x1f97   : > { %v5717_v50 = vld [vmem:[%s9833_s5 + $0x460] sm:$0xff] }
0x1f98   : > { %v5543_v51 = vmax.f32 %v5542_v38, 0.0  ;;  %v5716_v38 = vld [vmem:[%s9833_s5 + $0x450] sm:$0xff] }
0x1f9a   : > { %v5544_v39 = vmin.f32 %v5543_v51, 6.0 }
0x1f9c   : > { %v5545_v35 = vmul.f32 0.16666667, %v5544_v39 }
0x1f9e   : > { %v5546_v52 = vmul.f32 %v5545_v35, %v5537_v47 }
0x1fa0   : > { %v5560_v53 = vpack.c.bf16 %v5546_v52, %v5546_v52 }
0x1fa2   : > { %v5616_v54 = vsel %vm3366_vm10, %v5560_v53, 0 }
0x1fa3   : > { %7167 = vmatpush3.bf16.msra.mxu0 %v5616_v54 }
0x1fa4   : > { %7196 = vmatprep.subr.bf16.mxu0 %v7727_v29 }
0x1fa6   : > { %7169 = vmatmul.mubr.msk.bf16.vlgmr.msra.gmra.mrb[148].mxu0 %vm3835_vm15, %v7676_v55  ;;  %v5718_v55 = vld [vmem:[%s9833_s5 + $0x470] sm:$0xf] }
0x1fa7   : > { %7172 = vmatprep.mubr.msk.bf16.mxu0 %vm7729_vm3, %v7727_v29 }
0x1fae   : > { %7173 = vmatmul.mubr.msk.bf16.gmra.mrb[152].mxu0 %vm3835_vm15, %v7677_v56 }
0x1faf   : > { %7176 = vmatprep.mubr.msk.bf16.mxu0 %vm7729_vm3, %v7727_v29 }
0x1fb6   : > { %7177 = vmatmul.mubr.msk.bf16.gmra.mrb[156].mxu0 %vm3835_vm15, %v7678_v57 }
0x1fb7   : > { %7180 = vmatprep.mubr.msk.bf16.mxu0 %vm7729_vm3, %v7727_v29 }
0x1fbe   : > { %7181 = vmatmul.mubr.msk.bf16.gmra.mrb[160].mxu0 %vm3835_vm15, %v7679_v37 }
0x1fbf   : > { %7184 = vmatprep.mubr.msk.bf16.mxu0 %vm7729_vm3, %v7727_v29 }
0x1fc6   : > { %7185 = vmatmul.mubr.msk.bf16.gmra.mrb[164].mxu0 %vm3835_vm15, %v7680_v58 }
0x1fc7   : > { %7188 = vmatprep.mubr.msk.bf16.mxu0 %vm7729_vm3, %v7727_v29 }
0x1fce   : > { %7189 = vmatmul.mubr.msk.bf16.gmra.mrb[168].mxu0 %vm3835_vm15, %v7681_v59 }
0x1fcf   : > { %7192 = vmatprep.mubr.msk.bf16.mxu0 %vm7729_vm3, %v7727_v29 }
0x1fd6   : > { %7193 = vmatmul.mubr.msk.bf16.gmra.mrb[172].mxu0 %vm3835_vm15, %v7682_v60 }
0x1fd7   : > { %7210 = vmatprep.mubr.msk.bf16.mxu0 %vm7729_vm3, %v7727_v29 }
0x2079   : > { %v5652_v21 = vpop.f32.mrb[148].mxu0 }
0x207a   : > { %v7170_v24 = vpop.f32.mrb[149].mxu0  ;;  %v5719_v28 = vmul.f32 %v5706_v23, %v5652_v21  ;;  %v5732_v21 = vld [vmem:[%s9832_s4 + $0xca0] sm:$0x3] }
0x207b   : > { %v5655_v25 = vpop.f32.mrb[150].mxu0  ;;  %v7684_v23 = vld [vmem:[%s9832_s4 + $0xcc0] ss:$8 sps:$4 sm:$0xff]  }
0x207c   : > { %v5720_v34 = vmul.f32 %v5707_v22, %v5655_v25  ;;  %v7171_v20 = vpop.f32.mrb[151].mxu0  ;;  %7217 = vmatpush3.bf16.msra.mxu1 %v7684_v23  ;;  %v7685_v22 = vld [vmem:[%s9832_s4 + $0xcd0] ss:$8 sps:$4 sm:$0xff]   ;;  %v7686_v24 = vld [vmem:[%s9832_s4 + $0xce0] ss:$8 sps:$4 sm:$0xff]  }
0x207d   : > { %7218 = vmatprep.subr.bf16.mxu1 %v7727_v29  ;;  %v7687_v25 = vld [vmem:[%s9832_s4 + $0xcf0] ss:$8 sps:$4 sm:$0xff]   ;;  %v7690_v20 = vld [vmem:[%s9832_s4 + $0xd20] ss:$0 sps:$4 sm:$0xff]   ;;  %v5998_v23 = vld [vmem:[%s9834_s6 + $0x23] ss:$0 sm:$0xff] }
0x207e   : > { %v5733_v1 = vpack.c.bf16 %v5720_v34, %v5719_v28  ;;  %v7688_v28 = vld [vmem:[%s9832_s4 + $0xd00] ss:$8 sps:$4 sm:$0xff]   ;;  %v7689_v34 = vld [vmem:[%s9832_s4 + $0xd10] ss:$8 sps:$4 sm:$0xff]  }
0x2080   : > { %7197 = vmatpush3.bf16.msra.mxu0 %v5733_v1  ;;  %7219 = vmatpush3.bf16.msra.mxu1 %v7685_v22  ;;  %v5868_v1 = vsel %vm309_vm0, %v7690_v20, 0 }
0x2081   : > { %v5660_v44 = vpop.f32.mrb[152].mxu0  ;;  %7198 = vmatprep.subr.bf16.mxu0 %v7727_v29  ;;  %7220 = vmatprep.subr.bf16.mxu1 %v7727_v29 }
0x2082   : > { %v7174_v4 = vpop.f32.mrb[153].mxu0  ;;  %v5721_v6 = vmul.f32 %v5708_v62, %v5660_v44  ;;  %v5740_v44 = vld [vmem:[%s9834_s6 + $0x20] ss:$0 sm:$0xff] }
0x2083   : > { %v5663_v5 = vpop.f32.mrb[154].mxu0 }
0x2084   : > { %v5722_v7 = vmul.f32 %v5709_v3, %v5663_v5  ;;  %v7175_v8 = vpop.f32.mrb[155].mxu0  ;;  %7221 = vmatpush3.bf16.msra.mxu1 %v7686_v24 }
0x2085   : > { %7222 = vmatprep.subr.bf16.mxu1 %v7727_v29 }
0x2086   : > { %v5734_v9 = vpack.c.bf16 %v5722_v7, %v5721_v6 }
0x2088   : > { %7199 = vmatpush3.bf16.msra.mxu0 %v5734_v9  ;;  %7223 = vmatpush3.bf16.msra.mxu1 %v7687_v25 }
0x2089   : > { %v5668_v10 = vpop.f32.mrb[156].mxu0  ;;  %7200 = vmatprep.subr.bf16.mxu0 %v7727_v29  ;;  %7224 = vmatprep.subr.bf16.mxu1 %v7727_v29 }
0x208a   : > { %v7178_v16 = vpop.f32.mrb[157].mxu0  ;;  %v5723_v19 = vmul.f32 %v5710_v12, %v5668_v10 }
0x208b   : > { %v5671_v18 = vpop.f32.mrb[158].mxu0 }
0x208c   : > { %v5724_v31 = vmul.f32 %v5711_v13, %v5671_v18  ;;  %v7179_v26 = vpop.f32.mrb[159].mxu0  ;;  %7225 = vmatpush3.bf16.msra.mxu1 %v7688_v28 }
0x208d   : > { %7226 = vmatprep.subr.bf16.mxu1 %v7727_v29 }
0x208e   : > { %v5735_v17 = vpack.c.bf16 %v5724_v31, %v5723_v19 }
0x2090   : > { %7201 = vmatpush3.bf16.msra.mxu0 %v5735_v17  ;;  %7227 = vmatpush3.bf16.msra.mxu1 %v7689_v34 }
0x2091   : > { %v5676_v0 = vpop.f32.mrb[160].mxu0  ;;  %7202 = vmatprep.subr.bf16.mxu0 %v7727_v29  ;;  %7228 = vmatprep.subr.bf16.mxu1 %v7727_v29 }
0x2092   : > { %v7182_v30 = vpop.f32.mrb[161].mxu0  ;;  %v5725_v15 = vmul.f32 %v5712_v2, %v5676_v0 }
0x2093   : > { %v5679_v14 = vpop.f32.mrb[162].mxu0  ;;  %v7692_v30 = vld [vmem:[%s9832_s4 + $0xd40] ss:$8 sps:$4 sm:$0xff]  }
0x2094   : > { %v5726_v33 = vmul.f32 %v5713_v27, %v5679_v14  ;;  %v7183_v36 = vpop.f32.mrb[163].mxu0  ;;  %7229 = vmatpush3.bf16.msra.mxu1 %v5868_v1  ;;  %v7691_v27 = vld [vmem:[%s9832_s4 + $0xd30] ss:$8 sps:$4 sm:$0xff]  }
0x2095   : > { %7242 = vmatprep.subr.bf16.mxu1 %v7727_v29  ;;  %v7693_v14 = vld [vmem:[%s9832_s4 + $0xd50] ss:$8 sps:$4 sm:$0xff]   ;;  %v7696_v36 = vld [vmem:[%s9832_s4 + $0xd80] ss:$8 sps:$4 sm:$0xff]  }
0x2096   : > { %v5736_v40 = vpack.c.bf16 %v5726_v33, %v5725_v15  ;;  %v7694_v15 = vld [vmem:[%s9832_s4 + $0xd60] ss:$8 sps:$4 sm:$0xff]   ;;  %v7695_v33 = vld [vmem:[%s9832_s4 + $0xd70] ss:$8 sps:$4 sm:$0xff]  }
0x2098   : > { %7203 = vmatpush3.bf16.msra.mxu0 %v5736_v40  ;;  %v5817_v40 = vld [vmem:[%s9834_s6 + $0x21] ss:$0 sm:$0xff] }
0x2099   : > { %v5684_v41 = vpop.f32.mrb[164].mxu0  ;;  %7204 = vmatprep.subr.bf16.mxu0 %v7727_v29 }
0x209a   : > { %v7186_v43 = vpop.f32.mrb[165].mxu0  ;;  %v5727_v11 = vmul.f32 %v5714_v61, %v5684_v41 }
0x209b   : > { %v5687_v45 = vpop.f32.mrb[166].mxu0 }
0x209c   : > { %v5728_v46 = vmul.f32 %v5715_v42, %v5687_v45  ;;  %v7187_v47 = vpop.f32.mrb[167].mxu0 }
0x209d   : > { %v7697_v47 = vld [vmem:[%s9832_s4 + $0xd90] ss:$8 sps:$4 sm:$0xff]  }
0x209e   : > { %v5737_v48 = vpack.c.bf16 %v5728_v46, %v5727_v11 }
0x20a0   : > { %7205 = vmatpush3.bf16.msra.mxu0 %v5737_v48  ;;  %v7698_v48 = vld [vmem:[%s9832_s4 + $0xda0] ss:$8 sps:$4 sm:$0xff]  }
0x20a1   : > { %v5692_v49 = vpop.f32.mrb[168].mxu0  ;;  %7206 = vmatprep.subr.bf16.mxu0 %v7727_v29 }
0x20a2   : > { %v7190_v51 = vpop.f32.mrb[169].mxu0  ;;  %v5729_v35 = vmul.f32 %v5716_v38, %v5692_v49  ;;  %v7699_v49 = vld [vmem:[%s9832_s4 + $0xdb0] ss:$8 sps:$4 sm:$0xff]   ;;  %v7700_v38 = vld [vmem:[%s9832_s4 + $0xdc0] ss:$0 sps:$4 sm:$0xff]  }
0x20a3   : > { %v5695_v39 = vpop.f32.mrb[170].mxu0  ;;  %v5916_v51 = vld [vmem:[%s9834_s6 + $0x22] ss:$0 sm:$0xff] }
0x20a4   : > { %v5730_v52 = vmul.f32 %v5717_v50, %v5695_v39  ;;  %v7191_v53 = vpop.f32.mrb[171].mxu0  ;;  %v6048_v50 = vsel %vm309_vm0, %v7700_v38, 0  ;;  %vm6090_vm0 = vcmask 388096  }
0x20a6   : > { %v5738_v54 = vpack.c.bf16 %v5730_v52, %v5729_v35 }
0x20a8   : > { %7207 = vmatpush3.bf16.msra.mxu0 %v5738_v54 }
0x20a9   : > { %v5700_v56 = vpop.f32.mrb[172].mxu0  ;;  %7208 = vmatprep.subr.bf16.mxu0 %v7727_v29 }
0x20aa   : > { %v5731_v57 = vmul.f32 %v5718_v55, %v5700_v56  ;;  %v7194_v37 = vpop.f32.mrb[173].mxu0 }
0x20ab   : > { %v5703_v58 = vpop.f32.mrb[174].mxu0 }
0x20ac   : > { %v5739_v59 = vpack.c.bf16 %v5731_v57, %v5731_v57  ;;  %v7195_v60 = vpop.f32.mrb[175].mxu0 }
0x20ae   : > { %v5745_v32 = vsel %vm3366_vm10, %v5739_v59, 0 }
0x20af   : > { %7209 = vmatpush3.bf16.msra.mxu0 %v5745_v32  ;;  %v7701_v32 = vld [vmem:[%s9832_s4 + $0xdd0] ss:$8 sps:$4 sm:$0xff]  }
0x20b0   : > { %7234 = vmatprep.subr.bf16.mxu0 %v7727_v29 }
0x20b2   : > { %7211 = vmatmul.mubr.msk.bf16.vlgmr.msra.gmra.mrb[176].mxu0 %vm3362_vm11, %v5732_v21  ;;  %v7702_v21 = vld [vmem:[%s9832_s4 + $0xde0] ss:$8 sps:$4 sm:$0xff]  }
0x20b3   : > { %7238 = vmatprep.mubr.msk.bf16.mxu0 %vm7729_vm3, %v7727_v29  ;;  %7235 = vmatpush3.bf16.msra.mxu0 %v7691_v27 }
0x20b4   : > { %7236 = vmatprep.subr.bf16.mxu0 %v7727_v29 }
0x20b7   : > { %7237 = vmatpush3.bf16.msra.mxu0 %v7692_v30 }
0x20b8   : > { %7262 = vmatprep.subr.bf16.mxu0 %v7727_v29 }
0x2185   : > { %v5781_v62 = vpop.f32.mrb[176].mxu0 }
0x2186   : > { %v5782_v3 = vadd.f32 %v5781_v62, %v5740_v44  ;;  %v7212_v4 = vpop.f32.mrb[177].mxu0 }
0x2187   : > { %v5784_v5 = vpop.f32.mrb[178].mxu0 }
0x2188   : > { %v5787_v6 = vadd.f32 3.0, %v5782_v3  ;;  %v7213_v7 = vpop.f32.mrb[179].mxu0 }
0x2189   : > { %v7704_v7 = vld [vmem:[%s9832_s4 + $0xe00] ss:$8 sps:$4 sm:$0xff]  }
0x218a   : > { %v5788_v8 = vmax.f32 %v5787_v6, 0.0 }
0x218c   : > { %v5789_v9 = vmin.f32 %v5788_v8, 6.0 }
0x218e   : > { %v5790_v10 = vmul.f32 0.16666667, %v5789_v9  ;;  %v7705_v9 = vld [vmem:[%s9832_s4 + $0xe10] ss:$8 sps:$4 sm:$0xff]  }
0x2190   : > { %v9710_v12 = vmul.f32 %v5790_v10, %v5782_v3  ;;  %v7706_v10 = vld [vmem:[%s9832_s4 + $0xe20] ss:$8 sps:$4 sm:$0xff]  }
0x2192   : > { %v5793_v13 = vsel %vm5792_vm4, %v9710_v12, 0.0 }
0x2193   : > { %v5794_v16 = vrot.slane %v5793_v13, 4 }
0x2195   : > { %v5795_v18 = vadd.f32 %v5794_v16, %v5793_v13  ;;  %v7708_v13 = vld [vmem:[%s9832_s4 + $0xe40] ss:$8 sps:$4 sm:$0xff]   ;;  %v7709_v16 = vld [vmem:[%s9832_s4 + $0xe50] ss:$8 sps:$4 sm:$0xff]  }
0x2197   : > { %v5796_v19 = vrot.slane %v5795_v18, 2 }
0x2199   : > { %v5797_v31 = vadd.f32 %v5796_v19, %v5795_v18  ;;  %v7710_v18 = vld [vmem:[%s9832_s4 + $0xe60] ss:$8 sps:$4 sm:$0xff]   ;;  %v7711_v19 = vld [vmem:[%s9832_s4 + $0xe70] ss:$8 sps:$4 sm:$0xff]  }
0x219b   : > { %v5798_v26 = vrot.slane %v5797_v31, 1 }
0x219d   : > { %v5799_v17 = vadd.f32 %v5798_v26, %v5797_v31  ;;  %v6106_v31 = vld [vmem:[%s9834_s6 + $0x24] ss:$0 sm:$0xff] }
0x219f   : > { %v5800_v0 = vmul.f32 0.25, %v5799_v17 }
0x21a1   : > { %v5801_v2 = vpack.c.bf16 %v5800_v0, %v5800_v0 }
0x21a3   : > { %7231 = vmatmul.mubr.msk.bf16.vlgmr.msra.gmra.mrb[168].mxu1 %vm5863_vm5, %v5801_v2 }
0x21a4   : > { %7258 = vmatprep.mubr.msk.bf16.mxu1 %vm7729_vm3, %v7727_v29  ;;  %7243 = vmatpush3.bf16.msra.mxu1 %v7693_v14 }
0x21a5   : > { %7244 = vmatprep.subr.bf16.mxu1 %v7727_v29 }
0x21a8   : > { %7245 = vmatpush3.bf16.msra.mxu1 %v7694_v15 }
0x21a9   : > { %7246 = vmatprep.subr.bf16.mxu1 %v7727_v29 }
0x21ac   : > { %7247 = vmatpush3.bf16.msra.mxu1 %v7695_v33 }
0x21ad   : > { %7248 = vmatprep.subr.bf16.mxu1 %v7727_v29 }
0x21b0   : > { %7249 = vmatpush3.bf16.msra.mxu1 %v7696_v36 }
0x21b1   : > { %7250 = vmatprep.subr.bf16.mxu1 %v7727_v29 }
0x21b4   : > { %7251 = vmatpush3.bf16.msra.mxu1 %v7697_v47 }
0x21b5   : > { %7252 = vmatprep.subr.bf16.mxu1 %v7727_v29 }
0x21b8   : > { %7253 = vmatpush3.bf16.msra.mxu1 %v7698_v48 }
0x21b9   : > { %7254 = vmatprep.subr.bf16.mxu1 %v7727_v29 }
0x21bc   : > { %7255 = vmatpush3.bf16.msra.mxu1 %v7699_v49 }
0x21bd   : > { %7256 = vmatprep.subr.bf16.mxu1 %v7727_v29 }
0x21c0   : > { %7257 = vmatpush3.bf16.msra.mxu1 %v6048_v50 }
0x2276   : > { %v5904_v41 = vpop.f32.mrb[168].mxu1 }
0x2277   : > { %v5905_v61 = vadd.f32 %v5904_v41, %v5817_v40  ;;  %v7232_v42 = vpop.f32.mrb[169].mxu1 }
0x2278   : > { %v5907_v43 = vpop.f32.mrb[170].mxu1 }
0x2279   : > { %v5910_v45 = vmax.f32 %v5905_v61, 0.0  ;;  %v7233_v11 = vpop.f32.mrb[171].mxu1 }
0x227b   : > { %v5911_v46 = vpack.c.bf16 %v5910_v45, %v5910_v45 }
0x227d   : > { %7239 = vmatmul.mubr.msk.bf16.vlgmr.msra.gmra.mrb[180].mxu0 %vm5929_vm6, %v5911_v46 }
0x227e   : > { %7268 = vmatprep.mubr.msk.bf16.mxu0 %vm7729_vm3, %v7727_v29  ;;  %7263 = vmatpush3.bf16.msra.mxu0 %v7701_v32 }
0x227f   : > { %7264 = vmatprep.subr.bf16.mxu0 %v7727_v29 }
0x2282   : > { %7265 = vmatpush3.bf16.msra.mxu0 %v7702_v21 }
0x2283   : > { %7266 = vmatprep.subr.bf16.mxu0 %v7727_v29 }
0x2350   : > { %v5967_v39 = vpop.f32.mrb[180].mxu0 }
0x2351   : > { %v5968_v35 = vadd.f32 %v5967_v39, %v5916_v51  ;;  %v7240_v52 = vpop.f32.mrb[181].mxu0 }
0x2352   : > { %v5970_v53 = vpop.f32.mrb[182].mxu0 }
0x2353   : > { %v5973_v54 = vadd.f32 3.0, %v5968_v35  ;;  %v7241_v55 = vpop.f32.mrb[183].mxu0 }
0x2355   : > { %v5974_v56 = vmax.f32 %v5973_v54, 0.0 }
0x2357   : > { %v5975_v57 = vmin.f32 %v5974_v56, 6.0 }
0x2359   : > { %v5976_v37 = vmul.f32 0.16666667, %v5975_v57 }
0x235b   : > { %v5980_v58 = vrot.slane %v5976_v37, %v8901_v63  ;;  %v7703_v63 = vld [vmem:[%s9832_s4 + $0xdf0] ss:$8 sps:$4 sm:$0xff]  }
0x235c   : > { %7267 = vmatpush3.bf16.msra.mxu0 %v7703_v63 }
0x235d   : > { %v5981_v59 = vmul.f32 %v5980_v58, %v9710_v12  ;;  %7272 = vmatprep.subr.bf16.mxu0 %v7727_v29  ;;  %v7707_v12 = vld [vmem:[%s9832_s4 + $0xe30] ss:$8 sps:$4 sm:$0xff]  }
0x235f   : > { %v5982_v60 = vpack.c.bf16 %v5981_v59, %v5981_v59 }
0x2361   : > { %7259 = vmatmul.mubr.msk.bf16.vlgmr.msra.gmra.mrb[172].mxu1 %vm5863_vm5, %v5982_v60 }
0x2434   : > { %v6084_v22 = vpop.f32.mrb[172].mxu1 }
0x2435   : > { %v6085_v24 = vadd.f32 %v6084_v22, %v5998_v23  ;;  %v7260_v25 = vpop.f32.mrb[173].mxu1 }
0x2436   : > { %v6087_v28 = vpop.f32.mrb[174].mxu1 }
0x2437   : > { %v6091_v34 = vsel %vm6090_vm0, %v6085_v24, 0.0  ;;  %v7261_v20 = vpop.f32.mrb[175].mxu1 }
0x2438   : > { %v6092_v1 = vrot.slane %v6091_v34, 4 }
0x243a   : > { %v6093_v44 = vadd.f32 %v6092_v1, %v6091_v34 }
0x243c   : > { %v6094_v62 = vrot.slane %v6093_v44, 2 }
0x243e   : > { %v6095_v3 = vadd.f32 %v6094_v62, %v6093_v44 }
0x2440   : > { %v6096_v4 = vrot.slane %v6095_v3, 1 }
0x2442   : > { %v6097_v5 = vadd.f32 %v6096_v4, %v6095_v3 }
0x2444   : > { %v6098_v6 = vmul.f32 0.25, %v6097_v5 }
0x2446   : > { %v6099_v8 = vpack.c.bf16 %v6098_v6, %v6098_v6 }
0x2448   : > { %7269 = vmatmul.mubr.msk.bf16.vlgmr.msra.gmra.mrb[184].mxu0 %vm6125_vm7, %v6099_v8 }
0x2449   : > { %7273 = vmatpush3.bf16.msra.mxu0 %v7704_v7  ;;  %7288 = vmatprep.mubr.msk.bf16.mxu0 %vm7729_vm3, %v7727_v29  ;;  %vm6276_vm3 = vcmask 81920  }
0x244a   : > { %7274 = vmatprep.subr.bf16.mxu0 %v7727_v29 }
0x244d   : > { %7275 = vmatpush3.bf16.msra.mxu0 %v7705_v9 }
0x244e   : > { %7276 = vmatprep.subr.bf16.mxu0 %v7727_v29 }
0x2451   : > { %7277 = vmatpush3.bf16.msra.mxu0 %v7706_v10 }
0x2452   : > { %7278 = vmatprep.subr.bf16.mxu0 %v7727_v29 }
0x2455   : > { %7279 = vmatpush3.bf16.msra.mxu0 %v7707_v12 }
0x2456   : > { %7280 = vmatprep.subr.bf16.mxu0 %v7727_v29 }
0x2459   : > { %7281 = vmatpush3.bf16.msra.mxu0 %v7708_v13 }
0x245a   : > { %7282 = vmatprep.subr.bf16.mxu0 %v7727_v29 }
0x245d   : > { %7283 = vmatpush3.bf16.msra.mxu0 %v7709_v16 }
0x245e   : > { %7284 = vmatprep.subr.bf16.mxu0 %v7727_v29 }
0x2461   : > { %7285 = vmatpush3.bf16.msra.mxu0 %v7710_v18 }
0x2462   : > { %7286 = vmatprep.subr.bf16.mxu0 %v7727_v29  ;;  %v6187_v29 = vld [vmem:[%s9834_s6 + $0x25] ss:$0 sm:$0xff] }
0x2465   : > { %7287 = vmatpush3.bf16.msra.mxu0 %v7711_v19 }
0x251b   : > { %v6163_v26 = vpop.f32.mrb[184].mxu0 }
0x251c   : > { %v6164_v17 = vadd.f32 %v6163_v26, %v6106_v31  ;;  %v7270_v0 = vpop.f32.mrb[185].mxu0 }
0x251d   : > { %v6166_v2 = vpop.f32.mrb[186].mxu0 }
0x251e   : > { %v6169_v27 = vmax.f32 %v6164_v17, 0.0  ;;  %v7271_v30 = vpop.f32.mrb[187].mxu0 }
0x2520   : > { %v6170_v14 = vpack.c.bf16 %v6169_v27, %v6169_v27 }
0x2522   : > { %7289 = vmatmul.mubr.bf16.vlgmr.msra.gmra.mrb[188].mxu0 %v6170_v14 }
0x25f5   : > { %v6270_v15 = vpop.f32.mrb[188].mxu0 }
0x25f6   : > { %v6271_v33 = vadd.f32 %v6270_v15, %v6187_v29  ;;  %v7290_v36 = vpop.f32.mrb[189].mxu0 }
0x25f7   : > { %v6273_v40 = vpop.f32.mrb[190].mxu0 }
0x25f8   : > { %6277 = vst.msk [vmem:[%s274_s18] sm:$0x1] %vm6276_vm3, %v6271_v33  ;;  %v7291_v41 = vpop.f32.mrb[191].mxu0 }
0x25f9 PF: > { %s17_s24 = sadd.s32 1, %s7723_s24  }
0x25fa   : > { %p14_p4 = scmp.ge.s32.totalorder %s17_s24, 4  }
0x25fc   :  { %16 = sbr.rel (!%p14_p4) target bundleno = 1 (0x1), region = 84 }

</bundles_post_ra>
